<compile_context>
chip_gen: v7x
topology: tpu7x:2x2x1
jax: 0.10.0
libtpu: 0.0.40
codegen_flags: <defaults>
</compile_context>

<pallas_src>
import jax
import jax.numpy as jnp
from jax import lax
from jax.experimental import pallas as pl
from jax.experimental.pallas import tpu as pltpu


def _round_up(n, m):
    return ((n + m - 1) // m) * m


def _choose_time_chunk(T, cap=32):
    """Largest chunk <= cap that divides T, preferring multiples of 8 (sublane aligned)."""
    if T <= cap:
        return T
    for c in range(cap, 0, -1):
        if T % c == 0 and c % 8 == 0:
            return c
    for c in range(cap, 0, -1):
        if T % c == 0:
            return c
    return 1


def gru_model_kernel(x_ref, wx_ref, bx_ref, wh_ref, bh_ref, wfc_ref, bfc_ref,
                     out_ref, h_ref):
    """One (batch-block, time-chunk) grid step of the GRU + final FC.

    x_ref  : (Bb, C, D)   streamed input chunk (native batch-major layout)
    wx_ref : (D, 3H), bx_ref: (1, 3H)    input-to-hidden (per-gate lane aligned)
    wh_ref : (H, 3H), bh_ref: (1, 3H)    hidden-to-hidden
    wfc_ref: (H, O),  bfc_ref:(1, O)     final linear
    out_ref: (Bb, O)                      written only at the last time block
    h_ref  : (Bb, H)  VMEM scratch carrying the hidden state across time blocks
    """
    t_blk = pl.program_id(1)

    @pl.when(t_blk == 0)
    def _init():
        h_ref[...] = jnp.zeros_like(h_ref)

    Bb, C, D = x_ref.shape
    H = wh_ref.shape[0]
    G = 3 * H

    wx = wx_ref[...]
    bx = bx_ref[...]
    wh = wh_ref[...]
    bh = jnp.broadcast_to(bh_ref[...], (Bb, G))          # hoisted broadcast

    if C % 8 == 0:
        # Hoisted input projection: one MXU pass for the whole chunk.
        x2 = x_ref[...].reshape(Bb * C, D)
        gx_all = (jnp.dot(x2, wx, preferred_element_type=jnp.float32) + bx
                  ).reshape(Bb, C, G)

        def get_gx(c):
            return gx_all[:, c, :]                       # static slice, (Bb, 3H)
    else:
        # Fallback for layouts where the chunk merge isn't sublane aligned.
        xc = x_ref[...]

        def get_gx(c):
            return jnp.dot(xc[:, c, :], wx, preferred_element_type=jnp.float32) + bx

    h = h_ref[...]
    # Statically unrolled recurrence: only h @ Wh (the serial dependency) remains.
    for c in range(C):
        gx = get_gx(c)
        gh = jnp.dot(h, wh, preferred_element_type=jnp.float32) + bh
        r = jax.nn.sigmoid(gx[:, 0 * H:1 * H] + gh[:, 0 * H:1 * H])
        z = jax.nn.sigmoid(gx[:, 1 * H:2 * H] + gh[:, 1 * H:2 * H])
        n = jnp.tanh(gx[:, 2 * H:3 * H] + r * gh[:, 2 * H:3 * H])
        h = n + z * (h - n)                              # == (1-z)*n + z*h
    h_ref[...] = h

    @pl.when(t_blk == pl.num_programs(1) - 1)
    def _finalize():
        out_ref[...] = (
            jnp.dot(h, wfc_ref[...], preferred_element_type=jnp.float32)
            + bfc_ref[...]
        )


def gru_model_forward(x, params, *, time_chunk=None):
    """x: (batch, seq, input_dim) f32 -> (batch, output_dim) f32."""
    wx, bx, wh, bh, wfc, bfc = params
    B, T, D = x.shape
    H = wh.shape[0]
    O = wfc.shape[1]
    f32 = jnp.float32

    # ---- TPU-friendly padded sizes (lane/sublane aligned) ----
    Hp = _round_up(H, 128)                      # lane-aligned hidden
    Op = _round_up(O, 128)                      # lane-dense output slab
    Bb = min(_round_up(B, 8), 64)               # batch block (sublane aligned)
    Bp = _round_up(B, Bb)
    C = time_chunk if time_chunk is not None else _choose_time_chunk(T)
    assert T % C == 0, "time_chunk must divide the sequence length"

    # Pad the fused 3H axis per gate so each H slice stays lane aligned.
    def pad_gates(w, rows_out):
        rows_in = w.shape[0]
        out = jnp.zeros((rows_out, 3 * Hp), f32)
        for g in range(3):
            out = out.at[:rows_in, g * Hp:g * Hp + H].set(w[:, g * H:(g + 1) * H])
        return out

    wx_p = pad_gates(wx, D)
    bx_p = pad_gates(bx, 1)
    wh_p = pad_gates(wh, Hp)
    bh_p = pad_gates(bh, 1)
    wfc_p = jnp.zeros((Hp, Op), f32).at[:H, :O].set(wfc)
    bfc_p = jnp.zeros((1, Op), f32).at[:, :O].set(bfc)
    x_p = jnp.zeros((Bp, T, D), f32).at[:B].set(x)

    grid = (Bp // Bb, T // C)

    def const_spec(shape):
        return pl.BlockSpec(shape, lambda b, t: (0,) * len(shape))

    out_p = pl.pallas_call(
        gru_model_kernel,
        out_shape=jax.ShapeDtypeStruct((Bp, Op), f32),
        grid=grid,
        in_specs=[
            pl.BlockSpec((Bb, C, D), lambda b, t: (b, t, 0)),   # streamed x chunks
            const_spec(wx_p.shape), const_spec(bx_p.shape),
            const_spec(wh_p.shape), const_spec(bh_p.shape),
            const_spec(wfc_p.shape), const_spec(bfc_p.shape),
        ],
        out_specs=pl.BlockSpec((Bb, Op), lambda b, t: (b, 0)),
        scratch_shapes=[pltpu.VMEM((Bb, Hp), f32)],             # hidden-state carry
        compiler_params=pltpu.CompilerParams(
            dimension_semantics=("parallel", "arbitrary")),
    )(x_p, wx_p, bx_p, wh_p, bh_p, wfc_p, bfc_p)

    return out_p[:B, :O]


def init_params(key, input_dim, hidden_dim, output_dim):
    """Deterministic uniform(-1/sqrt(H), 1/sqrt(H)) init, PyTorch-GRUCell style."""
    k = 1.0 / jnp.sqrt(jnp.float32(hidden_dim))
    keys = jax.random.split(key, 6)
    wx = jax.random.uniform(keys[0], (input_dim, 3 * hidden_dim), jnp.float32, -k, k)
    bx = jax.random.uniform(keys[1], (1, 3 * hidden_dim), jnp.float32, -k, k)
    wh = jax.random.uniform(keys[2], (hidden_dim, 3 * hidden_dim), jnp.float32, -k, k)
    bh = jax.random.uniform(keys[3], (1, 3 * hidden_dim), jnp.float32, -k, k)
    wfc = jax.random.uniform(keys[4], (hidden_dim, output_dim), jnp.float32, -k, k)
    bfc = jax.random.uniform(keys[5], (1, output_dim), jnp.float32, -k, k)
    return wx, bx, wh, bh, wfc, bfc


def reference_forward(x, params):
    """Pure-JAX reference of the same GRU forward for sanity checking."""
    wx, bx, wh, bh, wfc, bfc = params
    B, T, _ = x.shape
    H = wh.shape[0]
    h = jnp.zeros((B, H), jnp.float32)
    for t in range(T):
        gx = x[:, t, :] @ wx + bx
        gh = h @ wh + bh
        i_r, i_i, i_n = gx[:, :H], gx[:, H:2 * H], gx[:, 2 * H:]
        h_r, h_i, h_n = gh[:, :H], gh[:, H:2 * H], gh[:, 2 * H:]
        r = jax.nn.sigmoid(i_r + h_r)
        z = jax.nn.sigmoid(i_i + h_i)
        n = jnp.tanh(i_n + r * h_n)
        h = n + z * (h - n)
    return h @ wfc + bfc


if __name__ == "__main__":
    batch, seq, input_dim, hidden_dim, output_dim = 2, 8, 16, 32, 8
    # layer_dim = 1  (GRUModel only ever uses layer 0)
    # TODO(synk): the PyTorch .squeeze() drops the batch dim when batch==1;
    #             this wrapper keeps (batch, output_dim) intentionally.

    key = jax.random.PRNGKey(0)
    k_x, k_p = jax.random.split(key)
    x = jax.random.normal(k_x, (batch, seq, input_dim), jnp.float32)
    params = init_params(k_p, input_dim, hidden_dim, output_dim)

    out = jax.block_until_ready(gru_model_forward(x, params))
    ref = reference_forward(x, params)

    assert out.shape == (batch, output_dim)
    assert jnp.allclose(out, ref, atol=1e-4, rtol=1e-4), "mismatch vs reference"

    print("KERNEL_OK")
</pallas_src>

<mosaic_0001>
module attributes {stable_mosaic.version = 11 : i64} {
  func.func @gru_model_kernel(%arg0: i32, %arg1: i32, %arg2: memref<8x8x16xf32, #tpu.memory_space<vmem>>, %arg3: memref<16x384xf32, #tpu.memory_space<vmem>>, %arg4: memref<1x384xf32, #tpu.memory_space<vmem>>, %arg5: memref<128x384xf32, #tpu.memory_space<vmem>>, %arg6: memref<1x384xf32, #tpu.memory_space<vmem>>, %arg7: memref<128x128xf32, #tpu.memory_space<vmem>>, %arg8: memref<1x128xf32, #tpu.memory_space<vmem>>, %arg9: memref<8x128xf32, #tpu.memory_space<vmem>>, %arg10: memref<8x128xf32, #tpu.memory_space<vmem>>) attributes {dimension_semantics = [#tpu.dimension_semantics<parallel>, #tpu.dimension_semantics<arbitrary>], iteration_bounds = array<i64: 1, 1>, scalar_prefetch = 0 : i64, scratch_operands = 1 : i64, tpu.core_type = #tpu.core_type<tc>, window_params = [{transform_indices = @transform_0, window_bounds = array<i64: 8, 8, 16>}, {pipeline_mode = #tpu.pipeline_mode<synchronous>, transform_indices = @transform_1, window_bounds = array<i64: 16, 384>}, {pipeline_mode = #tpu.pipeline_mode<synchronous>, transform_indices = @transform_2, window_bounds = array<i64: 1, 384>}, {pipeline_mode = #tpu.pipeline_mode<synchronous>, transform_indices = @transform_3, window_bounds = array<i64: 128, 384>}, {pipeline_mode = #tpu.pipeline_mode<synchronous>, transform_indices = @transform_4, window_bounds = array<i64: 1, 384>}, {pipeline_mode = #tpu.pipeline_mode<synchronous>, transform_indices = @transform_5, window_bounds = array<i64: 128, 128>}, {pipeline_mode = #tpu.pipeline_mode<synchronous>, transform_indices = @transform_6, window_bounds = array<i64: 1, 128>}, {transform_indices = @transform_7, window_bounds = array<i64: 8, 128>}]} {
    %c0_i32 = arith.constant 0 : i32
    %0 = arith.cmpi eq, %arg1, %c0_i32 : i32
    %1 = arith.extui %0 : i1 to i32
    %c0_i32_0 = arith.constant 0 : i32
    %2 = arith.cmpi ne, %1, %c0_i32_0 : i32
    scf.if %2 {
      %cst_41 = arith.constant 0.000000e+00 : f32
      %244 = vector.broadcast %cst_41 : f32 to vector<8x128xf32>
      %c0_42 = arith.constant 0 : index
      %c0_43 = arith.constant 0 : index
      %245 = vector.load %arg10[%c0_42, %c0_43] : memref<8x128xf32, #tpu.memory_space<vmem>>, vector<8x128xf32>
      tpu.vector_store %arg10[%c0_42, %c0_43], %244 {strides = array<i32>} : memref<8x128xf32, #tpu.memory_space<vmem>>, vector<8x128xf32>,
    } else {
    }
    %c0 = arith.constant 0 : index
    %c0_1 = arith.constant 0 : index
    %3 = vector.load %arg3[%c0, %c0_1] : memref<16x384xf32, #tpu.memory_space<vmem>>, vector<16x384xf32>
    %c0_2 = arith.constant 0 : index
    %c0_3 = arith.constant 0 : index
    %4 = vector.load %arg4[%c0_2, %c0_3] : memref<1x384xf32, #tpu.memory_space<vmem>>, vector<1x384xf32>
    %c0_4 = arith.constant 0 : index
    %c0_5 = arith.constant 0 : index
    %5 = vector.load %arg5[%c0_4, %c0_5] : memref<128x384xf32, #tpu.memory_space<vmem>>, vector<128x384xf32>
    %c0_6 = arith.constant 0 : index
    %c0_7 = arith.constant 0 : index
    %6 = vector.load %arg6[%c0_6, %c0_7] : memref<1x384xf32, #tpu.memory_space<vmem>>, vector<1x384xf32>
    %7 = vector.shape_cast %6 : vector<1x384xf32> to vector<1x384xf32>
    %8 = vector.broadcast %7 : vector<1x384xf32> to vector<8x384xf32>
    %c0_8 = arith.constant 0 : index
    %c0_9 = arith.constant 0 : index
    %c0_10 = arith.constant 0 : index
    %9 = vector.load %arg2[%c0_8, %c0_9, %c0_10] : memref<8x8x16xf32, #tpu.memory_space<vmem>>, vector<8x8x16xf32>
    %10 = vector.shape_cast %9 : vector<8x8x16xf32> to vector<64x16xf32>
    %cst = arith.constant dense<0.000000e+00> : vector<64x384xf32>
    %11 = tpu.matmul %10, %3, %cst {dimension_numbers = #tpu.dot_dimension_numbers<[1], [0], [0], [1], [0, 0, 1, 1], [], []>} : vector<64x16xf32>, vector<16x384xf32>, vector<64x384xf32> -> vector<64x384xf32>
    %12 = vector.broadcast %4 : vector<1x384xf32> to vector<64x384xf32>
    %13 = arith.addf %11, %12 : vector<64x384xf32>
    %14 = vector.shape_cast %13 : vector<64x384xf32> to vector<8x8x384xf32>
    %c0_11 = arith.constant 0 : index
    %c0_12 = arith.constant 0 : index
    %15 = vector.load %arg10[%c0_11, %c0_12] : memref<8x128xf32, #tpu.memory_space<vmem>>, vector<8x128xf32>
    %16 = vector.extract_strided_slice %14 {offsets = [0, 0, 0], sizes = [8, 1, 384], strides = [1, 1, 1]} : vector<8x8x384xf32> to vector<8x1x384xf32>
    %17 = vector.shape_cast %16 : vector<8x1x384xf32> to vector<8x384xf32>
    %cst_13 = arith.constant dense<0.000000e+00> : vector<8x384xf32>
    %18 = tpu.matmul %15, %5, %cst_13 {dimension_numbers = #tpu.dot_dimension_numbers<[1], [0], [0], [1], [0, 0, 1, 1], [], []>} : vector<8x128xf32>, vector<128x384xf32>, vector<8x384xf32> -> vector<8x384xf32>
    %19 = arith.addf %18, %8 : vector<8x384xf32>
    %20 = vector.extract_strided_slice %17 {offsets = [0, 0], sizes = [8, 128], strides = [1, 1]} : vector<8x384xf32> to vector<8x128xf32>
    %21 = vector.extract_strided_slice %19 {offsets = [0, 0], sizes = [8, 128], strides = [1, 1]} : vector<8x384xf32> to vector<8x128xf32>
    %22 = arith.addf %20, %21 : vector<8x128xf32>
    %23 = arith.negf %22 : vector<8x128xf32>
    %24 = math.exp %23 : vector<8x128xf32>
    %cst_14 = arith.constant 1.000000e+00 : f32
    %25 = vector.broadcast %cst_14 : f32 to vector<8x128xf32>
    %26 = arith.addf %25, %24 : vector<8x128xf32>
    %27 = arith.divf %25, %26 : vector<8x128xf32>
    %28 = vector.extract_strided_slice %17 {offsets = [0, 128], sizes = [8, 128], strides = [1, 1]} : vector<8x384xf32> to vector<8x128xf32>
    %29 = vector.extract_strided_slice %19 {offsets = [0, 128], sizes = [8, 128], strides = [1, 1]} : vector<8x384xf32> to vector<8x128xf32>
    %30 = arith.addf %28, %29 : vector<8x128xf32>
    %31 = arith.negf %30 : vector<8x128xf32>
    %32 = math.exp %31 : vector<8x128xf32>
    %cst_15 = arith.constant 1.000000e+00 : f32
    %33 = vector.broadcast %cst_15 : f32 to vector<8x128xf32>
    %34 = arith.addf %33, %32 : vector<8x128xf32>
    %35 = arith.divf %33, %34 : vector<8x128xf32>
    %36 = vector.extract_strided_slice %17 {offsets = [0, 256], sizes = [8, 128], strides = [1, 1]} : vector<8x384xf32> to vector<8x128xf32>
    %37 = vector.extract_strided_slice %19 {offsets = [0, 256], sizes = [8, 128], strides = [1, 1]} : vector<8x384xf32> to vector<8x128xf32>
    %38 = arith.mulf %27, %37 : vector<8x128xf32>
    %39 = arith.addf %36, %38 : vector<8x128xf32>
    %40 = math.tanh %39 : vector<8x128xf32>
    %41 = arith.subf %15, %40 : vector<8x128xf32>
    %42 = arith.mulf %35, %41 : vector<8x128xf32>
    %43 = arith.addf %40, %42 : vector<8x128xf32>
    %44 = vector.extract_strided_slice %14 {offsets = [0, 1, 0], sizes = [8, 1, 384], strides = [1, 1, 1]} : vector<8x8x384xf32> to vector<8x1x384xf32>
    %45 = vector.shape_cast %44 : vector<8x1x384xf32> to vector<8x384xf32>
    %cst_16 = arith.constant dense<0.000000e+00> : vector<8x384xf32>
    %46 = tpu.matmul %43, %5, %cst_16 {dimension_numbers = #tpu.dot_dimension_numbers<[1], [0], [0], [1], [0, 0, 1, 1], [], []>} : vector<8x128xf32>, vector<128x384xf32>, vector<8x384xf32> -> vector<8x384xf32>
    %47 = arith.addf %46, %8 : vector<8x384xf32>
    %48 = vector.extract_strided_slice %45 {offsets = [0, 0], sizes = [8, 128], strides = [1, 1]} : vector<8x384xf32> to vector<8x128xf32>
    %49 = vector.extract_strided_slice %47 {offsets = [0, 0], sizes = [8, 128], strides = [1, 1]} : vector<8x384xf32> to vector<8x128xf32>
    %50 = arith.addf %48, %49 : vector<8x128xf32>
    %51 = arith.negf %50 : vector<8x128xf32>
    %52 = math.exp %51 : vector<8x128xf32>
    %cst_17 = arith.constant 1.000000e+00 : f32
    %53 = vector.broadcast %cst_17 : f32 to vector<8x128xf32>
    %54 = arith.addf %53, %52 : vector<8x128xf32>
    %55 = arith.divf %53, %54 : vector<8x128xf32>
    %56 = vector.extract_strided_slice %45 {offsets = [0, 128], sizes = [8, 128], strides = [1, 1]} : vector<8x384xf32> to vector<8x128xf32>
    %57 = vector.extract_strided_slice %47 {offsets = [0, 128], sizes = [8, 128], strides = [1, 1]} : vector<8x384xf32> to vector<8x128xf32>
    %58 = arith.addf %56, %57 : vector<8x128xf32>
    %59 = arith.negf %58 : vector<8x128xf32>
    %60 = math.exp %59 : vector<8x128xf32>
    %cst_18 = arith.constant 1.000000e+00 : f32
    %61 = vector.broadcast %cst_18 : f32 to vector<8x128xf32>
    %62 = arith.addf %61, %60 : vector<8x128xf32>
    %63 = arith.divf %61, %62 : vector<8x128xf32>
    %64 = vector.extract_strided_slice %45 {offsets = [0, 256], sizes = [8, 128], strides = [1, 1]} : vector<8x384xf32> to vector<8x128xf32>
    %65 = vector.extract_strided_slice %47 {offsets = [0, 256], sizes = [8, 128], strides = [1, 1]} : vector<8x384xf32> to vector<8x128xf32>
    %66 = arith.mulf %55, %65 : vector<8x128xf32>
    %67 = arith.addf %64, %66 : vector<8x128xf32>
    %68 = math.tanh %67 : vector<8x128xf32>
    %69 = arith.subf %43, %68 : vector<8x128xf32>
    %70 = arith.mulf %63, %69 : vector<8x128xf32>
    %71 = arith.addf %68, %70 : vector<8x128xf32>
    %72 = vector.extract_strided_slice %14 {offsets = [0, 2, 0], sizes = [8, 1, 384], strides = [1, 1, 1]} : vector<8x8x384xf32> to vector<8x1x384xf32>
    %73 = vector.shape_cast %72 : vector<8x1x384xf32> to vector<8x384xf32>
    %cst_19 = arith.constant dense<0.000000e+00> : vector<8x384xf32>
    %74 = tpu.matmul %71, %5, %cst_19 {dimension_numbers = #tpu.dot_dimension_numbers<[1], [0], [0], [1], [0, 0, 1, 1], [], []>} : vector<8x128xf32>, vector<128x384xf32>, vector<8x384xf32> -> vector<8x384xf32>
    %75 = arith.addf %74, %8 : vector<8x384xf32>
    %76 = vector.extract_strided_slice %73 {offsets = [0, 0], sizes = [8, 128], strides = [1, 1]} : vector<8x384xf32> to vector<8x128xf32>
    %77 = vector.extract_strided_slice %75 {offsets = [0, 0], sizes = [8, 128], strides = [1, 1]} : vector<8x384xf32> to vector<8x128xf32>
    %78 = arith.addf %76, %77 : vector<8x128xf32>
    %79 = arith.negf %78 : vector<8x128xf32>
    %80 = math.exp %79 : vector<8x128xf32>
    %cst_20 = arith.constant 1.000000e+00 : f32
    %81 = vector.broadcast %cst_20 : f32 to vector<8x128xf32>
    %82 = arith.addf %81, %80 : vector<8x128xf32>
    %83 = arith.divf %81, %82 : vector<8x128xf32>
    %84 = vector.extract_strided_slice %73 {offsets = [0, 128], sizes = [8, 128], strides = [1, 1]} : vector<8x384xf32> to vector<8x128xf32>
    %85 = vector.extract_strided_slice %75 {offsets = [0, 128], sizes = [8, 128], strides = [1, 1]} : vector<8x384xf32> to vector<8x128xf32>
    %86 = arith.addf %84, %85 : vector<8x128xf32>
    %87 = arith.negf %86 : vector<8x128xf32>
    %88 = math.exp %87 : vector<8x128xf32>
    %cst_21 = arith.constant 1.000000e+00 : f32
    %89 = vector.broadcast %cst_21 : f32 to vector<8x128xf32>
    %90 = arith.addf %89, %88 : vector<8x128xf32>
    %91 = arith.divf %89, %90 : vector<8x128xf32>
    %92 = vector.extract_strided_slice %73 {offsets = [0, 256], sizes = [8, 128], strides = [1, 1]} : vector<8x384xf32> to vector<8x128xf32>
    %93 = vector.extract_strided_slice %75 {offsets = [0, 256], sizes = [8, 128], strides = [1, 1]} : vector<8x384xf32> to vector<8x128xf32>
    %94 = arith.mulf %83, %93 : vector<8x128xf32>
    %95 = arith.addf %92, %94 : vector<8x128xf32>
    %96 = math.tanh %95 : vector<8x128xf32>
    %97 = arith.subf %71, %96 : vector<8x128xf32>
    %98 = arith.mulf %91, %97 : vector<8x128xf32>
    %99 = arith.addf %96, %98 : vector<8x128xf32>
    %100 = vector.extract_strided_slice %14 {offsets = [0, 3, 0], sizes = [8, 1, 384], strides = [1, 1, 1]} : vector<8x8x384xf32> to vector<8x1x384xf32>
    %101 = vector.shape_cast %100 : vector<8x1x384xf32> to vector<8x384xf32>
    %cst_22 = arith.constant dense<0.000000e+00> : vector<8x384xf32>
    %102 = tpu.matmul %99, %5, %cst_22 {dimension_numbers = #tpu.dot_dimension_numbers<[1], [0], [0], [1], [0, 0, 1, 1], [], []>} : vector<8x128xf32>, vector<128x384xf32>, vector<8x384xf32> -> vector<8x384xf32>
    %103 = arith.addf %102, %8 : vector<8x384xf32>
    %104 = vector.extract_strided_slice %101 {offsets = [0, 0], sizes = [8, 128], strides = [1, 1]} : vector<8x384xf32> to vector<8x128xf32>
    %105 = vector.extract_strided_slice %103 {offsets = [0, 0], sizes = [8, 128], strides = [1, 1]} : vector<8x384xf32> to vector<8x128xf32>
    %106 = arith.addf %104, %105 : vector<8x128xf32>
    %107 = arith.negf %106 : vector<8x128xf32>
    %108 = math.exp %107 : vector<8x128xf32>
    %cst_23 = arith.constant 1.000000e+00 : f32
    %109 = vector.broadcast %cst_23 : f32 to vector<8x128xf32>
    %110 = arith.addf %109, %108 : vector<8x128xf32>
    %111 = arith.divf %109, %110 : vector<8x128xf32>
    %112 = vector.extract_strided_slice %101 {offsets = [0, 128], sizes = [8, 128], strides = [1, 1]} : vector<8x384xf32> to vector<8x128xf32>
    %113 = vector.extract_strided_slice %103 {offsets = [0, 128], sizes = [8, 128], strides = [1, 1]} : vector<8x384xf32> to vector<8x128xf32>
    %114 = arith.addf %112, %113 : vector<8x128xf32>
    %115 = arith.negf %114 : vector<8x128xf32>
    %116 = math.exp %115 : vector<8x128xf32>
    %cst_24 = arith.constant 1.000000e+00 : f32
    %117 = vector.broadcast %cst_24 : f32 to vector<8x128xf32>
    %118 = arith.addf %117, %116 : vector<8x128xf32>
    %119 = arith.divf %117, %118 : vector<8x128xf32>
    %120 = vector.extract_strided_slice %101 {offsets = [0, 256], sizes = [8, 128], strides = [1, 1]} : vector<8x384xf32> to vector<8x128xf32>
    %121 = vector.extract_strided_slice %103 {offsets = [0, 256], sizes = [8, 128], strides = [1, 1]} : vector<8x384xf32> to vector<8x128xf32>
    %122 = arith.mulf %111, %121 : vector<8x128xf32>
    %123 = arith.addf %120, %122 : vector<8x128xf32>
    %124 = math.tanh %123 : vector<8x128xf32>
    %125 = arith.subf %99, %124 : vector<8x128xf32>
    %126 = arith.mulf %119, %125 : vector<8x128xf32>
    %127 = arith.addf %124, %126 : vector<8x128xf32>
    %128 = vector.extract_strided_slice %14 {offsets = [0, 4, 0], sizes = [8, 1, 384], strides = [1, 1, 1]} : vector<8x8x384xf32> to vector<8x1x384xf32>
    %129 = vector.shape_cast %128 : vector<8x1x384xf32> to vector<8x384xf32>
    %cst_25 = arith.constant dense<0.000000e+00> : vector<8x384xf32>
    %130 = tpu.matmul %127, %5, %cst_25 {dimension_numbers = #tpu.dot_dimension_numbers<[1], [0], [0], [1], [0, 0, 1, 1], [], []>} : vector<8x128xf32>, vector<128x384xf32>, vector<8x384xf32> -> vector<8x384xf32>
    %131 = arith.addf %130, %8 : vector<8x384xf32>
    %132 = vector.extract_strided_slice %129 {offsets = [0, 0], sizes = [8, 128], strides = [1, 1]} : vector<8x384xf32> to vector<8x128xf32>
    %133 = vector.extract_strided_slice %131 {offsets = [0, 0], sizes = [8, 128], strides = [1, 1]} : vector<8x384xf32> to vector<8x128xf32>
    %134 = arith.addf %132, %133 : vector<8x128xf32>
    %135 = arith.negf %134 : vector<8x128xf32>
    %136 = math.exp %135 : vector<8x128xf32>
    %cst_26 = arith.constant 1.000000e+00 : f32
    %137 = vector.broadcast %cst_26 : f32 to vector<8x128xf32>
    %138 = arith.addf %137, %136 : vector<8x128xf32>
    %139 = arith.divf %137, %138 : vector<8x128xf32>
    %140 = vector.extract_strided_slice %129 {offsets = [0, 128], sizes = [8, 128], strides = [1, 1]} : vector<8x384xf32> to vector<8x128xf32>
    %141 = vector.extract_strided_slice %131 {offsets = [0, 128], sizes = [8, 128], strides = [1, 1]} : vector<8x384xf32> to vector<8x128xf32>
    %142 = arith.addf %140, %141 : vector<8x128xf32>
    %143 = arith.negf %142 : vector<8x128xf32>
    %144 = math.exp %143 : vector<8x128xf32>
    %cst_27 = arith.constant 1.000000e+00 : f32
    %145 = vector.broadcast %cst_27 : f32 to vector<8x128xf32>
    %146 = arith.addf %145, %144 : vector<8x128xf32>
    %147 = arith.divf %145, %146 : vector<8x128xf32>
    %148 = vector.extract_strided_slice %129 {offsets = [0, 256], sizes = [8, 128], strides = [1, 1]} : vector<8x384xf32> to vector<8x128xf32>
    %149 = vector.extract_strided_slice %131 {offsets = [0, 256], sizes = [8, 128], strides = [1, 1]} : vector<8x384xf32> to vector<8x128xf32>
    %150 = arith.mulf %139, %149 : vector<8x128xf32>
    %151 = arith.addf %148, %150 : vector<8x128xf32>
    %152 = math.tanh %151 : vector<8x128xf32>
    %153 = arith.subf %127, %152 : vector<8x128xf32>
    %154 = arith.mulf %147, %153 : vector<8x128xf32>
    %155 = arith.addf %152, %154 : vector<8x128xf32>
    %156 = vector.extract_strided_slice %14 {offsets = [0, 5, 0], sizes = [8, 1, 384], strides = [1, 1, 1]} : vector<8x8x384xf32> to vector<8x1x384xf32>
    %157 = vector.shape_cast %156 : vector<8x1x384xf32> to vector<8x384xf32>
    %cst_28 = arith.constant dense<0.000000e+00> : vector<8x384xf32>
    %158 = tpu.matmul %155, %5, %cst_28 {dimension_numbers = #tpu.dot_dimension_numbers<[1], [0], [0], [1], [0, 0, 1, 1], [], []>} : vector<8x128xf32>, vector<128x384xf32>, vector<8x384xf32> -> vector<8x384xf32>
    %159 = arith.addf %158, %8 : vector<8x384xf32>
    %160 = vector.extract_strided_slice %157 {offsets = [0, 0], sizes = [8, 128], strides = [1, 1]} : vector<8x384xf32> to vector<8x128xf32>
    %161 = vector.extract_strided_slice %159 {offsets = [0, 0], sizes = [8, 128], strides = [1, 1]} : vector<8x384xf32> to vector<8x128xf32>
    %162 = arith.addf %160, %161 : vector<8x128xf32>
    %163 = arith.negf %162 : vector<8x128xf32>
    %164 = math.exp %163 : vector<8x128xf32>
    %cst_29 = arith.constant 1.000000e+00 : f32
    %165 = vector.broadcast %cst_29 : f32 to vector<8x128xf32>
    %166 = arith.addf %165, %164 : vector<8x128xf32>
    %167 = arith.divf %165, %166 : vector<8x128xf32>
    %168 = vector.extract_strided_slice %157 {offsets = [0, 128], sizes = [8, 128], strides = [1, 1]} : vector<8x384xf32> to vector<8x128xf32>
    %169 = vector.extract_strided_slice %159 {offsets = [0, 128], sizes = [8, 128], strides = [1, 1]} : vector<8x384xf32> to vector<8x128xf32>
    %170 = arith.addf %168, %169 : vector<8x128xf32>
    %171 = arith.negf %170 : vector<8x128xf32>
    %172 = math.exp %171 : vector<8x128xf32>
    %cst_30 = arith.constant 1.000000e+00 : f32
    %173 = vector.broadcast %cst_30 : f32 to vector<8x128xf32>
    %174 = arith.addf %173, %172 : vector<8x128xf32>
    %175 = arith.divf %173, %174 : vector<8x128xf32>
    %176 = vector.extract_strided_slice %157 {offsets = [0, 256], sizes = [8, 128], strides = [1, 1]} : vector<8x384xf32> to vector<8x128xf32>
    %177 = vector.extract_strided_slice %159 {offsets = [0, 256], sizes = [8, 128], strides = [1, 1]} : vector<8x384xf32> to vector<8x128xf32>
    %178 = arith.mulf %167, %177 : vector<8x128xf32>
    %179 = arith.addf %176, %178 : vector<8x128xf32>
    %180 = math.tanh %179 : vector<8x128xf32>
    %181 = arith.subf %155, %180 : vector<8x128xf32>
    %182 = arith.mulf %175, %181 : vector<8x128xf32>
    %183 = arith.addf %180, %182 : vector<8x128xf32>
    %184 = vector.extract_strided_slice %14 {offsets = [0, 6, 0], sizes = [8, 1, 384], strides = [1, 1, 1]} : vector<8x8x384xf32> to vector<8x1x384xf32>
    %185 = vector.shape_cast %184 : vector<8x1x384xf32> to vector<8x384xf32>
    %cst_31 = arith.constant dense<0.000000e+00> : vector<8x384xf32>
    %186 = tpu.matmul %183, %5, %cst_31 {dimension_numbers = #tpu.dot_dimension_numbers<[1], [0], [0], [1], [0, 0, 1, 1], [], []>} : vector<8x128xf32>, vector<128x384xf32>, vector<8x384xf32> -> vector<8x384xf32>
    %187 = arith.addf %186, %8 : vector<8x384xf32>
    %188 = vector.extract_strided_slice %185 {offsets = [0, 0], sizes = [8, 128], strides = [1, 1]} : vector<8x384xf32> to vector<8x128xf32>
    %189 = vector.extract_strided_slice %187 {offsets = [0, 0], sizes = [8, 128], strides = [1, 1]} : vector<8x384xf32> to vector<8x128xf32>
    %190 = arith.addf %188, %189 : vector<8x128xf32>
    %191 = arith.negf %190 : vector<8x128xf32>
    %192 = math.exp %191 : vector<8x128xf32>
    %cst_32 = arith.constant 1.000000e+00 : f32
    %193 = vector.broadcast %cst_32 : f32 to vector<8x128xf32>
    %194 = arith.addf %193, %192 : vector<8x128xf32>
    %195 = arith.divf %193, %194 : vector<8x128xf32>
    %196 = vector.extract_strided_slice %185 {offsets = [0, 128], sizes = [8, 128], strides = [1, 1]} : vector<8x384xf32> to vector<8x128xf32>
    %197 = vector.extract_strided_slice %187 {offsets = [0, 128], sizes = [8, 128], strides = [1, 1]} : vector<8x384xf32> to vector<8x128xf32>
    %198 = arith.addf %196, %197 : vector<8x128xf32>
    %199 = arith.negf %198 : vector<8x128xf32>
    %200 = math.exp %199 : vector<8x128xf32>
    %cst_33 = arith.constant 1.000000e+00 : f32
    %201 = vector.broadcast %cst_33 : f32 to vector<8x128xf32>
    %202 = arith.addf %201, %200 : vector<8x128xf32>
    %203 = arith.divf %201, %202 : vector<8x128xf32>
    %204 = vector.extract_strided_slice %185 {offsets = [0, 256], sizes = [8, 128], strides = [1, 1]} : vector<8x384xf32> to vector<8x128xf32>
    %205 = vector.extract_strided_slice %187 {offsets = [0, 256], sizes = [8, 128], strides = [1, 1]} : vector<8x384xf32> to vector<8x128xf32>
    %206 = arith.mulf %195, %205 : vector<8x128xf32>
    %207 = arith.addf %204, %206 : vector<8x128xf32>
    %208 = math.tanh %207 : vector<8x128xf32>
    %209 = arith.subf %183, %208 : vector<8x128xf32>
    %210 = arith.mulf %203, %209 : vector<8x128xf32>
    %211 = arith.addf %208, %210 : vector<8x128xf32>
    %212 = vector.extract_strided_slice %14 {offsets = [0, 7, 0], sizes = [8, 1, 384], strides = [1, 1, 1]} : vector<8x8x384xf32> to vector<8x1x384xf32>
    %213 = vector.shape_cast %212 : vector<8x1x384xf32> to vector<8x384xf32>
    %cst_34 = arith.constant dense<0.000000e+00> : vector<8x384xf32>
    %214 = tpu.matmul %211, %5, %cst_34 {dimension_numbers = #tpu.dot_dimension_numbers<[1], [0], [0], [1], [0, 0, 1, 1], [], []>} : vector<8x128xf32>, vector<128x384xf32>, vector<8x384xf32> -> vector<8x384xf32>
    %215 = arith.addf %214, %8 : vector<8x384xf32>
    %216 = vector.extract_strided_slice %213 {offsets = [0, 0], sizes = [8, 128], strides = [1, 1]} : vector<8x384xf32> to vector<8x128xf32>
    %217 = vector.extract_strided_slice %215 {offsets = [0, 0], sizes = [8, 128], strides = [1, 1]} : vector<8x384xf32> to vector<8x128xf32>
    %218 = arith.addf %216, %217 : vector<8x128xf32>
    %219 = arith.negf %218 : vector<8x128xf32>
    %220 = math.exp %219 : vector<8x128xf32>
    %cst_35 = arith.constant 1.000000e+00 : f32
    %221 = vector.broadcast %cst_35 : f32 to vector<8x128xf32>
    %222 = arith.addf %221, %220 : vector<8x128xf32>
    %223 = arith.divf %221, %222 : vector<8x128xf32>
    %224 = vector.extract_strided_slice %213 {offsets = [0, 128], sizes = [8, 128], strides = [1, 1]} : vector<8x384xf32> to vector<8x128xf32>
    %225 = vector.extract_strided_slice %215 {offsets = [0, 128], sizes = [8, 128], strides = [1, 1]} : vector<8x384xf32> to vector<8x128xf32>
    %226 = arith.addf %224, %225 : vector<8x128xf32>
    %227 = arith.negf %226 : vector<8x128xf32>
    %228 = math.exp %227 : vector<8x128xf32>
    %cst_36 = arith.constant 1.000000e+00 : f32
    %229 = vector.broadcast %cst_36 : f32 to vector<8x128xf32>
    %230 = arith.addf %229, %228 : vector<8x128xf32>
    %231 = arith.divf %229, %230 : vector<8x128xf32>
    %232 = vector.extract_strided_slice %213 {offsets = [0, 256], sizes = [8, 128], strides = [1, 1]} : vector<8x384xf32> to vector<8x128xf32>
    %233 = vector.extract_strided_slice %215 {offsets = [0, 256], sizes = [8, 128], strides = [1, 1]} : vector<8x384xf32> to vector<8x128xf32>
    %234 = arith.mulf %223, %233 : vector<8x128xf32>
    %235 = arith.addf %232, %234 : vector<8x128xf32>
    %236 = math.tanh %235 : vector<8x128xf32>
    %237 = arith.subf %211, %236 : vector<8x128xf32>
    %238 = arith.mulf %231, %237 : vector<8x128xf32>
    %239 = arith.addf %236, %238 : vector<8x128xf32>
    %c0_37 = arith.constant 0 : index
    %c0_38 = arith.constant 0 : index
    %240 = vector.load %arg10[%c0_37, %c0_38] : memref<8x128xf32, #tpu.memory_space<vmem>>, vector<8x128xf32>
    tpu.vector_store %arg10[%c0_37, %c0_38], %239 {strides = array<i32>} : memref<8x128xf32, #tpu.memory_space<vmem>>, vector<8x128xf32>,
    %c0_i32_39 = arith.constant 0 : i32
    %241 = arith.cmpi eq, %arg1, %c0_i32_39 : i32
    %242 = arith.extui %241 : i1 to i32
    %c0_i32_40 = arith.constant 0 : i32
    %243 = arith.cmpi ne, %242, %c0_i32_40 : i32
    scf.if %243 {
      %c0_41 = arith.constant 0 : index
      %c0_42 = arith.constant 0 : index
      %244 = vector.load %arg7[%c0_41, %c0_42] : memref<128x128xf32, #tpu.memory_space<vmem>>, vector<128x128xf32>
      %cst_43 = arith.constant dense<0.000000e+00> : vector<8x128xf32>
      %245 = tpu.matmul %239, %244, %cst_43 {dimension_numbers = #tpu.dot_dimension_numbers<[1], [0], [0], [1], [0, 0, 1, 1], [], []>} : vector<8x128xf32>, vector<128x128xf32>, vector<8x128xf32> -> vector<8x128xf32>
      %c0_44 = arith.constant 0 : index
      %c0_45 = arith.constant 0 : index
      %246 = vector.load %arg8[%c0_44, %c0_45] : memref<1x128xf32, #tpu.memory_space<vmem>>, vector<1x128xf32>
      %247 = vector.broadcast %246 : vector<1x128xf32> to vector<8x128xf32>
      %248 = arith.addf %245, %247 : vector<8x128xf32>
      %c0_46 = arith.constant 0 : index
      %c0_47 = arith.constant 0 : index
      %249 = vector.load %arg9[%c0_46, %c0_47] : memref<8x128xf32, #tpu.memory_space<vmem>>, vector<8x128xf32>
      tpu.vector_store %arg9[%c0_46, %c0_47], %248 {strides = array<i32>} : memref<8x128xf32, #tpu.memory_space<vmem>>, vector<8x128xf32>,
    } else {
    }
    return
  }
  func.func @transform_0(%arg0: i32, %arg1: i32) -> (i32, i32, i32) {
    %c0_i32 = arith.constant 0 : i32
    %c0_i32_0 = arith.constant 0 : i32
    return %arg0, %arg1, %c0_i32 : i32, i32, i32
  }
  func.func @transform_1(%arg0: i32, %arg1: i32) -> (i32, i32) {
    %c0_i32 = arith.constant 0 : i32
    %c0_i32_0 = arith.constant 0 : i32
    %c0_i32_1 = arith.constant 0 : i32
    return %c0_i32, %c0_i32_0 : i32, i32
  }
  func.func @transform_2(%arg0: i32, %arg1: i32) -> (i32, i32) {
    %c0_i32 = arith.constant 0 : i32
    %c0_i32_0 = arith.constant 0 : i32
    %c0_i32_1 = arith.constant 0 : i32
    return %c0_i32, %c0_i32_0 : i32, i32
  }
  func.func @transform_3(%arg0: i32, %arg1: i32) -> (i32, i32) {
    %c0_i32 = arith.constant 0 : i32
    %c0_i32_0 = arith.constant 0 : i32
    %c0_i32_1 = arith.constant 0 : i32
    return %c0_i32, %c0_i32_0 : i32, i32
  }
  func.func @transform_4(%arg0: i32, %arg1: i32) -> (i32, i32) {
    %c0_i32 = arith.constant 0 : i32
    %c0_i32_0 = arith.constant 0 : i32
    %c0_i32_1 = arith.constant 0 : i32
    return %c0_i32, %c0_i32_0 : i32, i32
  }
  func.func @transform_5(%arg0: i32, %arg1: i32) -> (i32, i32) {
    %c0_i32 = arith.constant 0 : i32
    %c0_i32_0 = arith.constant 0 : i32
    %c0_i32_1 = arith.constant 0 : i32
    return %c0_i32, %c0_i32_0 : i32, i32
  }
  func.func @transform_6(%arg0: i32, %arg1: i32) -> (i32, i32) {
    %c0_i32 = arith.constant 0 : i32
    %c0_i32_0 = arith.constant 0 : i32
    %c0_i32_1 = arith.constant 0 : i32
    return %c0_i32, %c0_i32_0 : i32, i32
  }
  func.func @transform_7(%arg0: i32, %arg1: i32) -> (i32, i32) {
    %c0_i32 = arith.constant 0 : i32
    %c0_i32_0 = arith.constant 0 : i32
    return %arg0, %c0_i32 : i32, i32
  }
}

</mosaic_0001>

<bundles_post_ra>
// kernel: tpu_custom_call.1
= control target key start
LH: loop header
LB: loop body
LE: loop exit
PB: predicated region body
PF: predicated region fallthrough
CT: control target
= control target key end

     0   :  { %12 = vsyncpa [#allocation4], 0  ;;  %s7037_s0 = inlined_call_operand.hbm [shape: f32[8,8,16], index: 0, kind: input, shape index: {}]   ;;  %s7038_s1 = inlined_call_operand.hbm [shape: f32[16,384], index: 1, kind: input, shape index: {}]   ;;  %s7039_s2 = inlined_call_operand.vmem [shape: f32[1,384], index: 2, kind: input, shape index: {}]   ;;  %s7040_s3 = inlined_call_operand.hbm [shape: f32[128,384], index: 3, kind: input, shape index: {}]   ;;  %s7041_s4 = inlined_call_operand.vmem [shape: f32[1,384], index: 4, kind: input, shape index: {}]   ;;  %s7042_s5 = inlined_call_operand.hbm [shape: f32[128,128], index: 5, kind: input, shape index: {}]   ;;  %s7043_s6 = inlined_call_operand.vmem [shape: f32[1,128], index: 6, kind: input, shape index: {}]   ;;  %s7044_s7 = inlined_call_operand.hbm [shape: f32[8,128], index: 7, kind: output, shape index: {}]  }
   0x1   :  { %13 = vsyncpa [#allocation7], 0 }
   0x2   :  { %14 = vsyncpa [#allocation10], 0 }
   0x3   :  { %15 = vsyncpa [#allocation5], 0  ;;  %s5801_s24 = smov [#allocation6]   ;;  %s5683_s28 = scalar_lea.hbm %s7038_s1, 768 }
   0x4   :  { %s33_s25 = sshll.u32 %s5801_s24, 4  ;;  %p5684_p0 = scmp.ne.s32.totalorder %s7038_s1, %s5683_s28  ;;  %s34_s25 = int_to_ptr.vmem [resolvable:$true] %s33_s25 }
   0x5   :  { %p5687_p1 = scmp.lt.u32.totalorder %s5683_s28, %s7038_s1 }
   0x7   :  { %p5689_p2 = pnand %p5687_p1, %p5684_p0 }
   0x9   :  { %5692 = shalt.err (!%p5689_p2)
}
   0xa   :  { %s5693_s10 = scalar_lea.vmem %s34_s25, 768  ;;  %p5698_p4 = scmp.lt.s32.totalorder %s34_s25, %s34_s25 }
   0xb   :  { %p5694_p3 = scmp.ne.s32.totalorder %s34_s25, %s5693_s10  ;;  %p5699_p5 = scmp.lt.s32.totalorder %s5693_s10, %s5693_s10 }
   0xd   :  { %p5700_p6 = por %p5699_p5, %p5698_p4 }
   0xf   :  { %p5701_p7 = pnand %p5700_p6, %p5694_p3 }
  0x11   :  { %5704 = shalt.err (!%p5701_p7)
}
  0x12   :  { %s5802_s11 = smov 384   ;;  %s5803_s12 = smov 24  }
  0x13   :  { %39 = dma.hbm_to_vmem [thread:$0]  %s7038_s1, 768, %s34_s25, [#allocation7], %s5802_s11, %s5802_s11, %s5803_s12  }
  0x14   :  { %s5804_s15 = smov [#allocation3]   ;;  %s5705_s19 = scalar_lea.hbm %s7037_s0, 1024 }
  0x15   :  { %s21_s16 = sshll.u32 %s5804_s15, 4  ;;  %p5706_p8 = scmp.ne.s32.totalorder %s7037_s0, %s5705_s19  ;;  %s22_s16 = int_to_ptr.vmem [resolvable:$true] %s21_s16 }
  0x16   :  { %p5709_p9 = scmp.lt.u32.totalorder %s5705_s19, %s7037_s0 }
  0x18   :  { %p5711_p10 = pnand %p5709_p9, %p5706_p8 }
  0x1a   :  { %5714 = shalt.err (!%p5711_p10)
}
  0x1b   :  { %s5715_s24 = scalar_lea.vmem %s22_s16, 1024  ;;  %p5720_p12 = scmp.lt.s32.totalorder %s22_s16, %s22_s16 }
  0x1c   :  { %p5716_p11 = scmp.ne.s32.totalorder %s22_s16, %s5715_s24  ;;  %p5721_p13 = scmp.lt.s32.totalorder %s5715_s24, %s5715_s24 }
  0x1e   :  { %p5722_p0 = por %p5721_p13, %p5720_p12 }
  0x20   :  { %p5723_p1 = pnand %p5722_p0, %p5716_p11 }
  0x22   :  { %5726 = shalt.err (!%p5723_p1)
}
  0x23   :  { %s5805_s1 = smov 128   ;;  %s5806_s25 = smov 8  }
  0x24   :  { %27 = dma.hbm_to_vmem [thread:$0]  %s7037_s0, 1024, %s22_s16, [#allocation4], %s5805_s1, %s5805_s1, %s5806_s25  }
  0x25   :  { %s5807_s28 = smov [#allocation8]   ;;  %s5808_s30 = smov [#allocation9]  }
  0x26   :  { %s47_s29 = sshll.u32 %s5807_s28, 4  ;;  %s61_s8 = sshll.u32 %s5808_s30, 4  ;;  %s48_s29 = int_to_ptr.vmem [resolvable:$true] %s47_s29  ;;  %s5883_s8 = int_to_ptr.vmem [resolvable:$true] %s61_s8 }
  0x27   :  { %s5727_s13 = scalar_lea.hbm %s7040_s3, 6144 }
  0x28   :  { %p5728_p2 = scmp.ne.s32.totalorder %s7040_s3, %s5727_s13  ;;  %p5731_p3 = scmp.lt.u32.totalorder %s5727_s13, %s7040_s3 }
  0x2a   :  { %p5733_p4 = pnand %p5731_p3, %p5728_p2 }
  0x2c   :  { %5736 = shalt.err (!%p5733_p4)
}
  0x2d   :  { %s5737_s0 = scalar_lea.vmem %s48_s29, 6144  ;;  %p5742_p6 = scmp.lt.s32.totalorder %s48_s29, %s48_s29 }
  0x2e   :  { %p5738_p5 = scmp.ne.s32.totalorder %s48_s29, %s5737_s0  ;;  %p5743_p7 = scmp.lt.s32.totalorder %s5737_s0, %s5737_s0 }
  0x30   :  { %p5744_p8 = por %p5743_p7, %p5742_p6 }
  0x32   :  { %p5745_p9 = pnand %p5744_p8, %p5738_p5 }
  0x34   :  { %5748 = shalt.err (!%p5745_p9)
}
  0x35   :  { %53 = dma.hbm_to_vmem [thread:$0]  %s7040_s3, 6144, %s48_s29, [#allocation7], %s5802_s11, %s5802_s11, %s5803_s12  }
  0x36   :  { %s5749_s22 = scalar_lea.hbm %s7042_s5, 2048 }
  0x37   :  { %p5750_p10 = scmp.ne.s32.totalorder %s7042_s5, %s5749_s22  ;;  %p5753_p11 = scmp.lt.u32.totalorder %s5749_s22, %s7042_s5 }
  0x39   :  { %p5755_p12 = pnand %p5753_p11, %p5750_p10 }
  0x3b   :  { %5758 = shalt.err (!%p5755_p12)
}
  0x3c   :  { %s5759_s28 = scalar_lea.vmem %s5883_s8, 2048  ;;  %p5764_p0 = scmp.lt.s32.totalorder %s5883_s8, %s5883_s8 }
  0x3d   :  { %p5760_p13 = scmp.ne.s32.totalorder %s5883_s8, %s5759_s28  ;;  %p5765_p1 = scmp.lt.s32.totalorder %s5759_s28, %s5759_s28 }
  0x3f   :  { %p5766_p2 = por %p5765_p1, %p5764_p0 }
  0x41   :  { %p5767_p3 = pnand %p5766_p2, %p5760_p13 }
  0x43   :  { %5770 = shalt.err (!%p5767_p3)
}
  0x44   :  { %67 = dma.hbm_to_vmem [thread:$0]  %s7042_s5, 2048, %s5883_s8, [#allocation10], %s5805_s1, %s5805_s1, %s5806_s25  }
  0x45   :  { %5793 = dma.done.wait [#allocation4], 1024  }
  0x46   :  { %5794 = vsyncadd [#allocation4], 4294966272 }
  0x47   :  { %5795 = dma.done.wait [#allocation7], 6912  }
  0x48   :  { %5796 = vsyncadd [#allocation7], 4294960384 }
  0x49   :  { %5797 = dma.done.wait [#allocation10], 2048  }
  0x4a   :  { %5798 = vsyncadd [#allocation10], 4294965248  ;;  %v7045_v0 = vmov 0.0   ;;  %v88_v1 = vld [vmem:[#allocation6 + $0x8] sm:$0xff]  ;;  %v91_v2 = vld [vmem:[#allocation6 + $0x20] sm:$0xff]  ;;  %vm183_vm0 = vcmask 130048  }
  0x4b   :  { %272 = vmatprep.mubr.f32.mxu0 %v7045_v0  ;;  %86 = vst [vmem:[#allocation2] sm:$0xff] %v7045_v0  ;;  %v87_v3 = vld [vmem:[#allocation6] sm:$0xff]  ;;  %v4548_v4 = vpack.c.bf16 %v91_v2, %v88_v1  ;;  %v90_v5 = vld [vmem:[#allocation6 + $0x18] sm:$0xff]  ;;  %v98_v9 = vld [vmem:[#allocation8 + $0x20] sm:$0xff]  ;;  %v7047_v47 = vmov 0.0|0.0   ;;  %vm5811_vm1 = vmmov 0  }
  0x4c   :  { %v159_v6 = vld [vmem:[#allocation3] sm:$0xff]  ;;  %v95_v7 = vld [vmem:[#allocation8 + $0x8] sm:$0xff]  ;;  %v4550_v8 = vpack.c.bf16 %v90_v5, %v87_v3  ;;  %v94_v10 = vld [vmem:[#allocation8] sm:$0xff]  ;;  %vm761_vm2 = vcmask 1041409   ;;  %vm764_vm3 = vcmask 1042434   ;;  %vm767_vm4 = vcmask 1043459  }
  0x4d   :  { %v97_v11 = vld [vmem:[#allocation8 + $0x18] sm:$0xff]  ;;  %4221 = vmatprep.mubr.msk.f32.mxu1 %vm183_vm0, %v159_v6  ;;  %4549 = vmatprep.subr.bf16.mxu0 %v4548_v4  ;;  %v5923_v12 = vpack.c.bf16 %v98_v9, %v95_v7  ;;  %v104_v14 = vld [vmem:[#allocation8 + $0x50] sm:$0xff]  ;;  %v103_v18 = vld [vmem:[#allocation8 + $0x48] sm:$0xff]  ;;  %vm770_vm5 = vcmask 1044484   ;;  %vm773_vm6 = vcmask 1045509   ;;  %vm776_vm7 = vcmask 1046534  }
  0x4e   :  { %v101_v13 = vld [vmem:[#allocation8 + $0x38] sm:$0xff]  ;;  %4551 = vmatpush1.bf16.msra.mxu0 %v4550_v8  ;;  %v5925_v15 = vpack.c.bf16 %v97_v11, %v94_v10  ;;  %v100_v17 = vld [vmem:[#allocation8 + $0x30] sm:$0xff]  ;;  %v107_v19 = vld [vmem:[#allocation8 + $0x68] sm:$0xff]  ;;  %vm779_vm8 = vcmask 1047559   ;;  %s5812_s29 = smov [#allocation11]  }
  0x4f   :  { %7127 = vst [vmem:[#allocation16_spill] sm:$0xff] %v5923_v12  ;;  %4557 = vmatprep.subr.bf16.mxu0 %v5923_v12  ;;  %v5928_v16 = vpack.c.bf16 %v104_v14, %v101_v13  ;;  %v110_v20 = vld [vmem:[#allocation8 + $0x80] sm:$0xff]  ;;  %v160_v21 = vld [vmem:[#allocation3 + $0x8] sm:$0xff]  ;;  %v5933_v22 = vpack.c.bf16 %v103_v18, %v100_v17  ;;  %v116_v27 = vld [vmem:[#allocation8 + $0xb0] sm:$0xff]  ;;  %s3898_s30 = sshll.u32 %s5812_s29, 4  ;;  %s3899_s30 = int_to_ptr.vmem [resolvable:$true] %s3898_s30 }
  0x50   :  { %v5936_v23 = vpack.c.bf16 %v110_v20, %v107_v19  ;;  %v106_v24 = vld [vmem:[#allocation8 + $0x60] sm:$0xff]  ;;  %v109_v25 = vld [vmem:[#allocation8 + $0x78] sm:$0xff]  ;;  %v112_v33 = vld [vmem:[#allocation8 + $0x90] sm:$0xff]  ;;  %s5771_s8 = scalar_lea.vmem %s3899_s30, 128  ;;  %p5776_p5 = scmp.lt.s32.totalorder %s3899_s30, %s3899_s30 }
  0x51   :  { %3909 = vmatmul.mubr.msk.f32.vlgmr.msra.gmra.mrb[0].mxu0 %vm183_vm0, %v159_v6  ;;  %v113_v26 = vld [vmem:[#allocation8 + $0x98] sm:$0xff]  ;;  %v89_v28 = vld [vmem:[#allocation6 + $0x10] sm:$0xff]  ;;  %v5941_v30 = vpack.c.bf16 %v109_v25, %v106_v24  ;;  %v115_v34 = vld [vmem:[#allocation8 + $0xa8] sm:$0xff]  ;;  %p5772_p4 = scmp.ne.s32.totalorder %s3899_s30, %s5771_s8  ;;  %p5777_p6 = scmp.lt.s32.totalorder %s5771_s8, %s5771_s8 }
  0x52   :  { %4559 = vmatpush1.bf16.msra.mxu0 %v5925_v15  ;;  %278 = vmatprep.mubr.f32.mxu0 %v7045_v0  ;;  %v161_v29 = vld [vmem:[#allocation3 + $0x10] sm:$0xff]  ;;  %v92_v31 = vld [vmem:[#allocation6 + $0x28] sm:$0xff]  ;;  %v5944_v32 = vpack.c.bf16 %v116_v27, %v113_v26  ;;  %v119_v36 = vld [vmem:[#allocation8 + $0xc8] sm:$0xff]  ;;  %v5949_v41 = vpack.c.bf16 %v115_v34, %v112_v33 }
  0x53   :  { %4561 = vmatprep.subr.bf16.mxu0 %v5928_v16  ;;  %v4552_v35 = vpack.c.bf16 %v92_v31, %v89_v28  ;;  %v122_v37 = vld [vmem:[#allocation8 + $0xe0] sm:$0xff]  ;;  %v96_v38 = vld [vmem:[#allocation8 + $0x10] sm:$0xff]  ;;  %v99_v39 = vld [vmem:[#allocation8 + $0x28] sm:$0xff]  ;;  %p5778_p7 = por %p5777_p6, %p5776_p5 }
  0x54   :  { %v162_v40 = vld [vmem:[#allocation3 + $0x18] sm:$0xff]  ;;  %v5952_v42 = vpack.c.bf16 %v122_v37, %v119_v36  ;;  %v118_v43 = vld [vmem:[#allocation8 + $0xc0] sm:$0xff]  ;;  %v121_v44 = vld [vmem:[#allocation8 + $0xd8] sm:$0xff]  ;;  %v5955_v48 = vpack.c.bf16 %v99_v39, %v96_v38 }
  0x55   :  { %3910 = vmatmul.mubr.msk.f32.gmra.mrb[2].mxu0 %vm183_vm0, %v160_v21  ;;  %4553 = vmatprep.subr.bf16.mxu1 %v4552_v35  ;;  %v125_v45 = vld [vmem:[#allocation8 + $0xf8] sm:$0xff]  ;;  %v128_v46 = vld [vmem:[#allocation8 + $0x110] sm:$0xff]  ;;  %v102_v49 = vld [vmem:[#allocation8 + $0x40] sm:$0xff]  ;;  %v5960_v52 = vpack.c.bf16 %v121_v44, %v118_v43  ;;  %p5779_p8 = pnand %p5778_p7, %p5772_p4 }
  0x56   :  { %4563 = vmatpush1.bf16.msra.mxu0 %v5933_v22  ;;  %284 = vmatprep.mubr.f32.mxu0 %v7045_v0  ;;  %v105_v50 = vld [vmem:[#allocation8 + $0x58] sm:$0xff]  ;;  %v163_v51 = vld [vmem:[#allocation3 + $0x20] sm:$0xff]  ;;  %v5963_v53 = vpack.c.bf16 %v128_v46, %v125_v45  ;;  %v127_v55 = vld [vmem:[#allocation8 + $0x108] sm:$0xff] }
  0x57   :  { %4565 = vmatprep.subr.bf16.mxu0 %v5936_v23  ;;  %4555 = vmatpush3.bf16.msra.mxu1 %v4552_v35  ;;  %v124_v54 = vld [vmem:[#allocation8 + $0xf0] sm:$0xff]  ;;  %v131_v56 = vld [vmem:[#allocation8 + $0x128] sm:$0xff]  ;;  %v134_v57 = vld [vmem:[#allocation8 + $0x140] sm:$0xff]  ;;  %v5967_v58 = vpack.c.bf16 %v105_v50, %v102_v49  ;;  %v144_v49 = vlaneseq }
  0x58   :  { %4588 = vmatprep.subr.bf16.mxu1 %v7047_v47  ;;  %v108_v59 = vld [vmem:[#allocation8 + $0x70] sm:$0xff]  ;;  %v111_v60 = vld [vmem:[#allocation8 + $0x88] sm:$0xff]  ;;  %v164_v61 = vld [vmem:[#allocation3 + $0x28] sm:$0xff]  ;;  %v5974_v62 = vpack.c.bf16 %v127_v55, %v124_v54  ;;  %v5977_v63 = vpack.c.bf16 %v134_v57, %v131_v56 }
  0x59   :  { %3911 = vmatmul.mubr.msk.f32.gmra.mrb[4].mxu0 %vm183_vm0, %v161_v29  ;;  %v130_v1 = vld [vmem:[#allocation8 + $0x120] sm:$0xff]  ;;  %v133_v2 = vld [vmem:[#allocation8 + $0x138] sm:$0xff]  ;;  %v140_v4 = vld [vmem:[#allocation8 + $0x170] sm:$0xff]  ;;  %v5981_v5 = vpack.c.bf16 %v111_v60, %v108_v59  ;;  %v6085_v56 = vshrl.u32 %v144_v49, 7 }
  0x5a   :  { %4567 = vmatpush1.bf16.msra.mxu0 %v5941_v30  ;;  %290 = vmatprep.mubr.f32.mxu0 %v7045_v0  ;;  %7128 = vst [vmem:[#allocation17_spill] sm:$0xff] %v5977_v63  ;;  %v137_v3 = vld [vmem:[#allocation8 + $0x158] sm:$0xff]  ;;  %v114_v6 = vld [vmem:[#allocation8 + $0xa0] sm:$0xff]  ;;  %v5988_v9 = vpack.c.bf16 %v133_v2, %v130_v1  ;;  %v136_v11 = vld [vmem:[#allocation8 + $0x150] sm:$0xff] }
  0x5b   :  { %4569 = vmatprep.subr.bf16.mxu0 %v5944_v32  ;;  %4222 = vmatmul.mubr.msk.f32.vlgmr.msra.gmra.mrb[0].mxu1 %vm183_vm0, %v160_v21  ;;  %v117_v7 = vld [vmem:[#allocation8 + $0xb8] sm:$0xff]  ;;  %v165_v8 = vld [vmem:[#allocation3 + $0x30] sm:$0xff]  ;;  %v5991_v10 = vpack.c.bf16 %v140_v4, %v137_v3  ;;  %v139_v13 = vld [vmem:[#allocation8 + $0x168] sm:$0xff]  ;;  %v146_v1 = vsub.s32 0, %v6085_v56 }
  0x5c   :  { %4590 = vmatpush3.bf16.msra.mxu1 %v5955_v48  ;;  %4224 = vmatprep.mubr.msk.f32.mxu1 %vm183_vm0, %v161_v29  ;;  %7129 = vst [vmem:[#allocation18_spill] sm:$0xff] %v5988_v9  ;;  %v5995_v14 = vpack.c.bf16 %v117_v7, %v114_v6  ;;  %v120_v17 = vld [vmem:[#allocation8 + $0xd0] sm:$0xff]  ;;  %v123_v18 = vld [vmem:[#allocation8 + $0xe8] sm:$0xff]  ;;  %v6002_v20 = vpack.c.bf16 %v139_v13, %v136_v11  ;;  %v126_v24 = vld [vmem:[#allocation8 + $0x100] sm:$0xff] }
  0x5d   :  { %3912 = vmatmul.mubr.msk.f32.gmra.mrb[6].mxu0 %vm183_vm0, %v162_v40  ;;  %4591 = vmatprep.subr.bf16.mxu1 %v7047_v47  ;;  %7130 = vst [vmem:[#allocation19_spill] sm:$0xff] %v5991_v10  ;;  %v166_v19 = vld [vmem:[#allocation3 + $0x38] sm:$0xff]  ;;  %v6007_v21 = vpack.c.bf16 %v123_v18, %v120_v17  ;;  %v129_v25 = vld [vmem:[#allocation8 + $0x118] sm:$0xff]  ;;  %v132_v27 = vld [vmem:[#allocation8 + $0x130] sm:$0xff] }
  0x5e   :  { %4571 = vmatpush1.bf16.msra.mxu0 %v5949_v41  ;;  %296 = vmatprep.mubr.f32.mxu0 %v7045_v0  ;;  %7131 = vst [vmem:[#allocation20_spill] sm:$0xff] %v6002_v20  ;;  %v6017_v26 = vpack.c.bf16 %v129_v25, %v126_v24  ;;  %v135_v28 = vld [vmem:[#allocation8 + $0x148] sm:$0xff]  ;;  %v138_v31 = vld [vmem:[#allocation8 + $0x160] sm:$0xff]  ;;  %v141_v33 = vld [vmem:[#allocation8 + $0x178] sm:$0xff] }
  0x5f   :  { %4573 = vmatprep.subr.bf16.mxu0 %v5952_v42  ;;  %4225 = vmatmul.mubr.msk.f32.gmra.mrb[2].mxu1 %vm183_vm0, %v162_v40  ;;  %v6025_v29 = vpack.c.bf16 %v135_v28, %v132_v27  ;;  %v6031_v34 = vpack.c.bf16 %v141_v33, %v138_v31  ;;  %v93_v3 = vld [vmem:[%s7039_s2] sm:$0x7] }
  0x60   :  { %4593 = vmatpush3.bf16.msra.mxu1 %v5967_v58  ;;  %4227 = vmatprep.mubr.msk.f32.mxu1 %vm183_vm0, %v163_v51  ;;  %7132 = vst [vmem:[#allocation21_spill] sm:$0xff] %v6017_v26  ;;  %v142_v6 = vld [vmem:[%s7041_s4] sm:$0x7]  ;;  %v171_v11 = vrot.slane %v93_v3, %v146_v1 }
  0x61   :  { %3913 = vmatmul.mubr.msk.f32.gmra.mrb[8].mxu0 %vm183_vm0, %v163_v51  ;;  %4594 = vmatprep.subr.bf16.mxu1 %v7047_v47  ;;  %7133 = vst [vmem:[#allocation22_spill] sm:$0xff] %v6025_v29  ;;  %7134 = vst [vmem:[#allocation23_spill] sm:$0xff] %v6031_v34  ;;  %v6108_v18 = vrot.slane %v142_v6, %v146_v1 }
  0x62   :  { %4575 = vmatpush1.bf16.msra.mxu0 %v5960_v52  ;;  %302 = vmatprep.mubr.f32.mxu0 %v7045_v0 }
  0x63   :  { %4577 = vmatprep.subr.bf16.mxu0 %v5963_v53  ;;  %4228 = vmatmul.mubr.msk.f32.gmra.mrb[4].mxu1 %vm183_vm0, %v164_v61  ;;  %7135 = vst [vmem:[#allocation24_spill] sm:$0xff] %v6108_v18 }
  0x64   :  { %4596 = vmatpush3.bf16.msra.mxu1 %v5981_v5  ;;  %4230 = vmatprep.mubr.msk.f32.mxu1 %vm183_vm0, %v165_v8 }
  0x65   :  { %3914 = vmatmul.mubr.msk.f32.gmra.mrb[10].mxu0 %vm183_vm0, %v164_v61  ;;  %4597 = vmatprep.subr.bf16.mxu1 %v7047_v47 }
  0x66   :  { %4579 = vmatpush1.bf16.msra.mxu0 %v5974_v62  ;;  %308 = vmatprep.mubr.f32.mxu0 %v7045_v0 }
  0x67   :  { %4581 = vmatprep.subr.bf16.mxu0 %v5977_v63  ;;  %4231 = vmatmul.mubr.msk.f32.gmra.mrb[6].mxu1 %vm183_vm0, %v166_v19 }
  0x68   :  { %4599 = vmatpush3.bf16.msra.mxu1 %v5995_v14  ;;  %4265 = vmatprep.mubr.msk.f32.mxu1 %vm5811_vm1, %v7045_v0 }
  0x69   :  { %3915 = vmatmul.mubr.msk.f32.gmra.mrb[12].mxu0 %vm183_vm0, %v165_v8  ;;  %4600 = vmatprep.subr.bf16.mxu1 %v7047_v47 }
  0x6a   :  { %4583 = vmatpush1.bf16.msra.mxu0 %v5988_v9  ;;  %314 = vmatprep.mubr.f32.mxu0 %v7045_v0 }
  0x6b   :  { %4585 = vmatprep.subr.bf16.mxu0 %v5991_v10 }
  0x6c   :  { %4602 = vmatpush3.bf16.msra.mxu1 %v6007_v21 }
  0x6d   :  { %3916 = vmatmul.mubr.msk.f32.gmra.mrb[14].mxu0 %vm183_vm0, %v166_v19  ;;  %4603 = vmatprep.subr.bf16.mxu1 %v7047_v47 }
  0x6e   :  { %4587 = vmatpush1.bf16.msra.mxu0 %v6002_v20  ;;  %491 = vmatprep.mubr.f32.mxu0 %v7045_v0 }
  0x6f   :  { %4613 = vmatprep.subr.bf16.mxu0 %v5923_v12 }
  0x70   :  { %4605 = vmatpush3.bf16.msra.mxu1 %v6017_v26 }
  0x71   :  { %492 = vmatmul.mubr.f32.vlgmr.msra.gmra.mrb[16].mxu0 %v7045_v0  ;;  %4606 = vmatprep.subr.bf16.mxu1 %v7047_v47 }
  0x72   :  { %4615 = vmatpush1.bf16.msra.mxu0 %v5925_v15  ;;  %902 = vmatprep.mubr.f32.mxu0 %v7045_v0 }
  0x73   :  { %4617 = vmatprep.subr.bf16.mxu0 %v5928_v16 }
  0x74   :  { %4608 = vmatpush3.bf16.msra.mxu1 %v6025_v29 }
  0x75   :  { %4609 = vmatprep.subr.bf16.mxu1 %v7047_v47 }
  0x76   :  { %4619 = vmatpush1.bf16.msra.mxu0 %v5933_v22 }
  0x77   :  { %4621 = vmatprep.subr.bf16.mxu0 %v5936_v23 }
  0x78   :  { %4611 = vmatpush3.bf16.msra.mxu1 %v6031_v34 }
  0x79   :  { %4644 = vmatprep.subr.bf16.mxu1 %v7047_v47 }
  0x7a   :  { %4623 = vmatpush1.bf16.msra.mxu0 %v5941_v30 }
  0x7b   :  { %4625 = vmatprep.subr.bf16.mxu0 %v5944_v32  ;;  %4266 = vmatmul.mubr.f32.vlgmr.msra.gmra.mrb[8].mxu1 %v7045_v0 }
  0x7c   :  { %4646 = vmatpush3.bf16.msra.mxu1 %v5955_v48  ;;  %4300 = vmatprep.mubr.msk.f32.mxu1 %vm5811_vm1, %v7045_v0 }
  0x7d   :  { %4647 = vmatprep.subr.bf16.mxu1 %v7047_v47 }
  0x7e   :  { %4627 = vmatpush1.bf16.msra.mxu0 %v5949_v41 }
  0x7f   :  { %4629 = vmatprep.subr.bf16.mxu0 %v5952_v42 }
  0x80   :  { %4649 = vmatpush3.bf16.msra.mxu1 %v5967_v58 }
  0x81   :  { %4650 = vmatprep.subr.bf16.mxu1 %v7047_v47 }
  0x82   :  { %4631 = vmatpush1.bf16.msra.mxu0 %v5960_v52 }
  0x83   :  { %4633 = vmatprep.subr.bf16.mxu0 %v5963_v53 }
  0x84   :  { %4652 = vmatpush3.bf16.msra.mxu1 %v5981_v5 }
  0x85   :  { %4653 = vmatprep.subr.bf16.mxu1 %v7047_v47 }
  0x86   :  { %4635 = vmatpush1.bf16.msra.mxu0 %v5974_v62 }
  0x87   :  { %4637 = vmatprep.subr.bf16.mxu0 %v5977_v63 }
  0x88   :  { %4655 = vmatpush3.bf16.msra.mxu1 %v5995_v14 }
  0x89   :  { %4656 = vmatprep.subr.bf16.mxu1 %v7047_v47 }
  0x8a   :  { %4639 = vmatpush1.bf16.msra.mxu0 %v5988_v9 }
  0x8b   :  { %4641 = vmatprep.subr.bf16.mxu0 %v5991_v10 }
  0x8c   :  { %4658 = vmatpush3.bf16.msra.mxu1 %v6007_v21 }
  0x8d   :  { %4659 = vmatprep.subr.bf16.mxu1 %v7047_v47 }
  0x8e   :  { %4643 = vmatpush1.bf16.msra.mxu0 %v6002_v20 }
  0x8f   :  { %4669 = vmatprep.subr.bf16.mxu0 %v5923_v12 }
  0x90   :  { %4661 = vmatpush3.bf16.msra.mxu1 %v6017_v26 }
  0x91   :  { %4662 = vmatprep.subr.bf16.mxu1 %v7047_v47 }
  0x94   :  { %4664 = vmatpush3.bf16.msra.mxu1 %v6025_v29 }
  0x95   :  { %4665 = vmatprep.subr.bf16.mxu1 %v7047_v47 }
  0x98   :  { %4667 = vmatpush3.bf16.msra.mxu1 %v6031_v34 }
  0x99   :  { %4700 = vmatprep.subr.bf16.mxu1 %v7047_v47 }
 0x124   :  { %v274_v35 = vpop.f32.mrb[0].mxu0 }
 0x125   :  { %v6067_v36 = vpop.f32.mrb[1].mxu0  ;;  %v6110_v19 = vadd.f32 %v274_v35, %v171_v11 }
 0x127   :  { %7136 = vst [vmem:[#allocation25_spill] sm:$0xff] %v6110_v19 }
 0x128   :  { %v280_v37 = vpop.f32.mrb[2].mxu0 }
 0x129   :  { %v6069_v38 = vpop.f32.mrb[3].mxu0  ;;  %v6112_v25 = vadd.f32 %v280_v37, %v171_v11 }
 0x12b   :  { %7137 = vst [vmem:[#allocation26_spill] sm:$0xff] %v6112_v25 }
 0x12c   :  { %v286_v39 = vpop.f32.mrb[4].mxu0 }
 0x12d   :  { %v6071_v40 = vpop.f32.mrb[5].mxu0  ;;  %v6114_v27 = vadd.f32 %v286_v39, %v171_v11 }
 0x12e   :  { %v6075_v45 = vpop.f32.mrb[0].mxu1 }
 0x12f   :  { %v6077_v46 = vpop.f32.mrb[1].mxu1  ;;  %7138 = vst [vmem:[#allocation27_spill] sm:$0xff] %v6114_v27 }
 0x130   :  { %v292_v43 = vpop.f32.mrb[6].mxu0 }
 0x131   :  { %v6073_v44 = vpop.f32.mrb[7].mxu0  ;;  %v6116_v28 = vadd.f32 %v292_v43, %v171_v11 }
 0x132   :  { %v6081_v54 = vpop.f32.mrb[2].mxu1 }
 0x133   :  { %v6083_v55 = vpop.f32.mrb[3].mxu1  ;;  %7139 = vst [vmem:[#allocation28_spill] sm:$0xff] %v6116_v28 }
 0x134   :  { %v298_v50 = vpop.f32.mrb[8].mxu0 }
 0x135   :  { %v6079_v51 = vpop.f32.mrb[9].mxu0  ;;  %v6119_v49 = vadd.f32 %v298_v50, %v171_v11 }
 0x136   :  { %v6089_v60 = vpop.f32.mrb[4].mxu1 }
 0x137   :  { %v6091_v61 = vpop.f32.mrb[5].mxu1  ;;  %7140 = vst [vmem:[#allocation29_spill] sm:$0xff] %v6119_v49 }
 0x138   :  { %v304_v57 = vpop.f32.mrb[10].mxu0 }
 0x139   :  { %v6087_v59 = vpop.f32.mrb[11].mxu0  ;;  %v6121_v0 = vadd.f32 %v304_v57, %v171_v11 }
 0x13a   :  { %v6102_v7 = vpop.f32.mrb[6].mxu1 }
 0x13b   :  { %v6104_v8 = vpop.f32.mrb[7].mxu1  ;;  %7141 = vst [vmem:[#allocation30_spill] sm:$0xff] %v6121_v0 }
 0x13c   :  { %v310_v2 = vpop.f32.mrb[12].mxu0 }
 0x13d   :  { %v6097_v4 = vpop.f32.mrb[13].mxu0  ;;  %v6123_v47 = vadd.f32 %v310_v2, %v171_v11 }
 0x13f   :  { %7142 = vst [vmem:[#allocation31_spill] sm:$0xff] %v6123_v47 }
 0x140   :  { %v316_v13 = vpop.f32.mrb[14].mxu0 }
 0x141   :  { %v6106_v17 = vpop.f32.mrb[15].mxu0  ;;  %v6125_v1 = vadd.f32 %v316_v13, %v171_v11 }
 0x143   :  { %7143 = vst [vmem:[#allocation32_spill] sm:$0xff] %v6125_v1 }
 0x144   :  { %v493_v24 = vpop.f32.mrb[16].mxu0 }
 0x145   :  { %v494_v31 = vadd.f32 %v493_v24, %v6108_v18  ;;  %v495_v33 = vpop.f32.mrb[17].mxu0 }
 0x147   :  { %v569_v35 = vrot.slane %v494_v31, 1  ;;  %v570_v12 = vrot.slane %v494_v31, 2  ;;  %v571_v34 = vrot.slane %v494_v31, 3  ;;  %v572_v37 = vrot.slane %v494_v31, 4 }
 0x148   :  { %v573_v20 = vrot.slane %v494_v31, 5  ;;  %v574_v39 = vrot.slane %v494_v31, 6  ;;  %v575_v10 = vrot.slane %v494_v31, 7  ;;  %v584_v43 = vadd.f32 %v494_v31, %v6110_v19 }
 0x149   :  { %v585_v24 = vadd.f32 %v569_v35, %v6112_v25  ;;  %v586_v50 = vadd.f32 %v570_v12, %v6114_v27  ;;  %v587_v57 = vadd.f32 %v571_v34, %v6116_v28  ;;  %v588_v2 = vadd.f32 %v572_v37, %v6119_v49 }
 0x14a   :  { %v589_v11 = vadd.f32 %v573_v20, %v6121_v0  ;;  %v590_v13 = vadd.f32 %v574_v39, %v6123_v47  ;;  %v3925_v18 = vmul.f32 -1.442695, %v584_v43  ;;  %v591_v29 = vadd.f32 %v575_v10, %v6125_v1 }
 0x14b   :  { %v3926_v9 = vmul.f32 -1.442695, %v585_v24  ;;  %v3927_v63 = vmul.f32 -1.442695, %v586_v50  ;;  %v3928_v26 = vmul.f32 -1.442695, %v587_v57 }
 0x14c   :  { %v150_v31 = vsub.s32 1, %v6085_v56  ;;  %5040 = vpow2.f32 %v3925_v18  ;;  %v3929_v35 = vmul.f32 -1.442695, %v588_v2  ;;  %v3930_v12 = vmul.f32 -1.442695, %v589_v11 }
 0x14d   :  { %5042 = vpow2.f32 %v3926_v9  ;;  %v3931_v34 = vmul.f32 -1.442695, %v590_v13  ;;  %v3932_v20 = vmul.f32 -1.442695, %v591_v29  ;;  %v154_v39 = vsub.s32 2, %v6085_v56 }
 0x14e   :  { %5044 = vpow2.f32 %v3927_v63  ;;  %v6136_v28 = vrot.slane %v142_v6, %v150_v31  ;;  %v175_v37 = vrot.slane %v93_v3, %v150_v31  ;;  %v564_v43 = vpop.f32.mrb[8].mxu1 }
 0x14f   :  { %5046 = vpow2.f32 %v3928_v26  ;;  %v4267_v18 = vpop.f32.mrb[9].mxu1  ;;  %v6146_v24 = vrot.slane %v93_v3, %v154_v39  ;;  %v6148_v26 = vrot.slane %v142_v6, %v154_v39 }
 0x150   :  { %7144 = vst [vmem:[#allocation33_spill] sm:$0xff] %v6136_v28  ;;  %5048 = vpow2.f32 %v3929_v35  ;;  %v496_v10 = vadd.f32 %v495_v33, %v6136_v28  ;;  %v6141_v9 = vadd.f32 %v6067_v36, %v175_v37  ;;  %v6144_v63 = vadd.f32 %v6069_v38, %v175_v37 }
 0x151   :  { %5050 = vpow2.f32 %v3930_v12  ;;  %7147 = vst [vmem:[#allocation36_spill] sm:$0xff] %v6148_v26  ;;  %v6151_v56 = vadd.f32 %v6071_v40, %v175_v37  ;;  %v6154_v50 = vadd.f32 %v6073_v44, %v175_v37  ;;  %v6157_v36 = vadd.f32 %v6079_v51, %v175_v37 }
 0x152   :  { %5052 = vpow2.f32 %v3931_v34  ;;  %7145 = vst [vmem:[#allocation34_spill] sm:$0xff] %v6141_v9  ;;  %7146 = vst [vmem:[#allocation35_spill] sm:$0xff] %v6144_v63  ;;  %v641_v33 = vrot.slane %v496_v10, 1  ;;  %v642_v57 = vrot.slane %v496_v10, 2  ;;  %v6160_v38 = vadd.f32 %v6087_v59, %v175_v37 }
 0x153   :  { %5054 = vpow2.f32 %v3932_v20  ;;  %7148 = vst [vmem:[#allocation37_spill] sm:$0xff] %v6151_v56  ;;  %7149 = vst [vmem:[#allocation38_spill] sm:$0xff] %v6154_v50  ;;  %v656_v6 = vadd.f32 %v496_v10, %v6141_v9  ;;  %v6164_v13 = vadd.f32 %v6097_v4, %v175_v37  ;;  %v6167_v40 = vadd.f32 %v6106_v17, %v175_v37 }
 0x154   :  { %7150 = vst [vmem:[#allocation39_spill] sm:$0xff] %v6157_v36  ;;  %7151 = vst [vmem:[#allocation40_spill] sm:$0xff] %v6160_v38  ;;  %v643_v31 = vrot.slane %v496_v10, 3  ;;  %v644_v51 = vrot.slane %v496_v10, 4  ;;  %v645_v34 = vrot.slane %v496_v10, 5  ;;  %v657_v39 = vadd.f32 %v641_v33, %v6144_v63 }
 0x155   :  { %7152 = vst [vmem:[#allocation41_spill] sm:$0xff] %v6164_v13  ;;  %7153 = vst [vmem:[#allocation42_spill] sm:$0xff] %v6167_v40  ;;  %v658_v18 = vadd.f32 %v642_v57, %v6151_v56  ;;  %v3933_v9 = vmul.f32 -1.442695, %v656_v6  ;;  %v646_v17 = vrot.slane %v496_v10, 6 }
 0x156   :  { %v5041_v29 = vpop.eup %5040  ;;  %v660_v33 = vadd.f32 %v644_v51, %v6157_v36  ;;  %v3934_v57 = vmul.f32 -1.442695, %v657_v39 }
 0x157   :  { %v5043_v2 = vpop.eup %5042  ;;  %v616_v3 = vadd.f32 1.0, %v5041_v29  ;;  %v3935_v6 = vmul.f32 -1.442695, %v658_v18 }
 0x158   :  { %v5045_v11 = vpop.eup %5044  ;;  %v617_v44 = vadd.f32 1.0, %v5043_v2  ;;  %v3937_v51 = vmul.f32 -1.442695, %v660_v33 }
 0x159   :  { %v5047_v35 = vpop.eup %5046  ;;  %v618_v12 = vadd.f32 1.0, %v5045_v11  ;;  %5056 = vrcp.f32 %v616_v3  ;;  %v659_v11 = vadd.f32 %v643_v31, %v6154_v50  ;;  %v647_v3 = vrot.slane %v496_v10, 7 }
 0x15a   :  { %v5049_v20 = vpop.eup %5048  ;;  %v619_v59 = vadd.f32 1.0, %v5047_v35  ;;  %5058 = vrcp.f32 %v617_v44  ;;  %v565_v35 = vadd.f32 %v564_v43, %v6148_v26  ;;  %v6179_v31 = vadd.f32 %v6075_v45, %v6146_v24 }
 0x15b   :  { %v5051_v29 = vpop.eup %5050  ;;  %v620_v4 = vadd.f32 1.0, %v5049_v20  ;;  %5060 = vrcp.f32 %v618_v12  ;;  %v661_v12 = vadd.f32 %v645_v34, %v6160_v38  ;;  %v662_v20 = vadd.f32 %v646_v17, %v6164_v13 }
 0x15c   :  { %v5053_v37 = vpop.eup %5052  ;;  %v621_v2 = vadd.f32 1.0, %v5051_v29  ;;  %5062 = vrcp.f32 %v619_v59  ;;  %v3936_v59 = vmul.f32 -1.442695, %v659_v11  ;;  %v663_v10 = vadd.f32 %v647_v3, %v6167_v40  ;;  %7154 = vst [vmem:[#allocation43_spill] sm:$0xff] %v6179_v31 }
 0x15d   :  { %v5055_v1 = vpop.eup %5054  ;;  %5064 = vrcp.f32 %v620_v4  ;;  %v622_v44 = vadd.f32 1.0, %v5053_v37  ;;  %v713_v43 = vrot.slane %v565_v35, 1  ;;  %v714_v34 = vrot.slane %v565_v35, 2 }
 0x15e   :  { %5066 = vrcp.f32 %v621_v2  ;;  %v623_v56 = vadd.f32 1.0, %v5055_v1  ;;  %v6183_v1 = vadd.f32 %v6077_v46, %v6146_v24  ;;  %v3938_v39 = vmul.f32 -1.442695, %v661_v12 }
 0x15f   :  { %5068 = vrcp.f32 %v622_v44  ;;  %v715_v29 = vrot.slane %v565_v35, 3  ;;  %v3939_v4 = vmul.f32 -1.442695, %v662_v20  ;;  %v716_v37 = vrot.slane %v565_v35, 4 }
 0x160   :  { %5070 = vrcp.f32 %v623_v56  ;;  %7155 = vst [vmem:[#allocation44_spill] sm:$0xff] %v6183_v1  ;;  %v6187_v56 = vadd.f32 %v6081_v54, %v6146_v24  ;;  %v6191_v46 = vadd.f32 %v6083_v55, %v6146_v24  ;;  %v717_v3 = vrot.slane %v565_v35, 5 }
 0x161   :  { %5072 = vpow2.f32 %v3933_v9  ;;  %v3940_v9 = vmul.f32 -1.442695, %v663_v10  ;;  %v718_v54 = vrot.slane %v565_v35, 6  ;;  %v6197_v55 = vadd.f32 %v6091_v61, %v6146_v24 }
 0x162   :  { %5074 = vpow2.f32 %v3934_v57  ;;  %7156 = vst [vmem:[#allocation45_spill] sm:$0xff] %v6187_v56  ;;  %7157 = vst [vmem:[#allocation46_spill] sm:$0xff] %v6191_v46 }
 0x163   :  { %v5057_v18 = vpop.eup %5056  ;;  %5076 = vpow2.f32 %v3935_v6  ;;  %v719_v6 = vrot.slane %v565_v35, 7  ;;  %7158 = vst [vmem:[#allocation47_spill] sm:$0xff] %v6197_v55 }
 0x164   :  { %v5059_v45 = vpop.eup %5058  ;;  %v728_v17 = vmul.f32 %v5057_v18, %v565_v35  ;;  %5078 = vpow2.f32 %v3936_v59 }
 0x165   :  { %v5061_v2 = vpop.eup %5060  ;;  %v729_v11 = vmul.f32 %v5059_v45, %v713_v43  ;;  %5080 = vpow2.f32 %v3937_v51 }
 0x166   :  { %v5063_v44 = vpop.eup %5062  ;;  %v730_v33 = vmul.f32 %v5061_v2, %v714_v34  ;;  %5082 = vpow2.f32 %v3938_v39  ;;  %v736_v57 = vadd.f32 %v728_v17, %v6183_v1  ;;  %v6204_v17 = vadd.f32 %v6089_v60, %v6146_v24 }
 0x167   :  { %v5065_v12 = vpop.eup %5064  ;;  %5084 = vpow2.f32 %v3939_v4  ;;  %v731_v20 = vmul.f32 %v5063_v44, %v715_v29  ;;  %v737_v59 = vadd.f32 %v729_v11, %v6179_v31  ;;  %v6212_v11 = vadd.f32 %v6102_v7, %v6146_v24 }
 0x168   :  { %v5067_v10 = vpop.eup %5066  ;;  %5086 = vpow2.f32 %v3940_v9  ;;  %v732_v43 = vmul.f32 %v5065_v12, %v716_v37  ;;  %v738_v51 = vadd.f32 %v730_v33, %v6191_v46  ;;  %7159 = vst [vmem:[#allocation48_spill] sm:$0xff] %v6204_v17  ;;  %v6208_v37 = vadd.f32 %v6104_v8, %v6146_v24 }
 0x169   :  { %v5069_v34 = vpop.eup %5068  ;;  %v733_v39 = vmul.f32 %v5067_v10, %v717_v3  ;;  %v739_v18 = vadd.f32 %v731_v20, %v6187_v56  ;;  %5088 = vtanh.f32 %v736_v57  ;;  %7161 = vst [vmem:[#allocation50_spill] sm:$0xff] %v6212_v11 }
 0x16a   :  { %v5071_v45 = vpop.eup %5070  ;;  %v734_v4 = vmul.f32 %v5069_v34, %v718_v54  ;;  %v740_v35 = vadd.f32 %v732_v43, %v6197_v55  ;;  %5090 = vtanh.f32 %v737_v59  ;;  %7160 = vst [vmem:[#allocation49_spill] sm:$0xff] %v6208_v37 }
 0x16b   :  { %v5073_v29 = vpop.eup %5072  ;;  %v735_v61 = vmul.f32 %v5071_v45, %v719_v6  ;;  %5092 = vtanh.f32 %v738_v51  ;;  %v741_v3 = vadd.f32 %v733_v39, %v6204_v17 }
 0x16c   :  { %v5075_v9 = vpop.eup %5074  ;;  %5094 = vtanh.f32 %v739_v18  ;;  %v742_v60 = vadd.f32 %v734_v4, %v6208_v37  ;;  %v688_v12 = vadd.f32 1.0, %v5073_v29 }
 0x16d   :  { %v5077_v2 = vpop.eup %5076  ;;  %5096 = vtanh.f32 %v740_v35  ;;  %v743_v54 = vadd.f32 %v735_v61, %v6212_v11  ;;  %v689_v8 = vadd.f32 1.0, %v5075_v9 }
 0x16e   :  { %v5079_v44 = vpop.eup %5078  ;;  %5098 = vtanh.f32 %v741_v3  ;;  %v690_v59 = vadd.f32 1.0, %v5077_v2 }
 0x16f   :  { %v5081_v33 = vpop.eup %5080  ;;  %5100 = vtanh.f32 %v742_v60  ;;  %v691_v7 = vadd.f32 1.0, %v5079_v44 }
 0x170   :  { %v5083_v57 = vpop.eup %5082  ;;  %5102 = vtanh.f32 %v743_v54  ;;  %v692_v43 = vadd.f32 1.0, %v5081_v33 }
 0x171   :  { %v5085_v6 = vpop.eup %5084  ;;  %5104 = vrcp.f32 %v688_v12  ;;  %v693_v34 = vadd.f32 1.0, %v5083_v57 }
 0x172   :  { %v5087_v20 = vpop.eup %5086  ;;  %5106 = vrcp.f32 %v689_v8  ;;  %v694_v45 = vadd.f32 1.0, %v5085_v6 }
 0x173   :  { %v6217_v10 = vpop.eup %5088  ;;  %5108 = vrcp.f32 %v690_v59  ;;  %v695_v29 = vadd.f32 1.0, %v5087_v20 }
 0x174   :  { %v6219_v24 = vpop.eup %5090  ;;  %5110 = vrcp.f32 %v691_v7 }
 0x175   :  { %v5093_v51 = vpop.eup %5092  ;;  %v760_v39 = vrot.slane %v6219_v24, 7  ;;  %5112 = vrcp.f32 %v692_v43 }
 0x176   :  { %v5095_v18 = vpop.eup %5094  ;;  %v763_v4 = vrot.slane %v5093_v51, 6  ;;  %5114 = vrcp.f32 %v693_v34 }
 0x177   :  { %v5097_v35 = vpop.eup %5096  ;;  %v762_v61 = vsel %vm761_vm2, %v760_v39, %v6217_v10  ;;  %v766_v9 = vrot.slane %v5095_v18, 5  ;;  %5116 = vrcp.f32 %v694_v45 }
 0x178   :  { %v765_v2 = vsel %vm764_vm3, %v763_v4, %v762_v61  ;;  %v769_v3 = vrot.slane %v5097_v35, 4  ;;  %v5099_v33 = vpop.eup %5098  ;;  %5118 = vrcp.f32 %v695_v29 }
 0x179   :  { %v768_v44 = vsel %vm767_vm4, %v766_v9, %v765_v2  ;;  %v5101_v54 = vpop.eup %5100  ;;  %v772_v57 = vrot.slane %v5099_v33, 3 }
 0x17a   :  { %v771_v60 = vsel %vm770_vm5, %v769_v3, %v768_v44  ;;  %v5103_v12 = vpop.eup %5102  ;;  %v775_v6 = vrot.slane %v5101_v54, 2 }
 0x17b   :  { %v5105_v8 = vpop.eup %5104  ;;  %v774_v20 = vsel %vm773_vm6, %v772_v57, %v771_v60  ;;  %v778_v59 = vrot.slane %v5103_v12, 1 }
 0x17c   :  { %v5107_v7 = vpop.eup %5106  ;;  %v777_v43 = vsel %vm776_vm7, %v775_v6, %v774_v20 }
 0x17d   :  { %v5109_v34 = vpop.eup %5108  ;;  %v780_v39 = vsel %vm779_vm8, %v778_v59, %v777_v43 }
 0x17e   :  { %v5111_v45 = vpop.eup %5110  ;;  %v782_v4 = vsub.f32 0.0, %v780_v39 }
 0x17f   :  { %v5113_v29 = vpop.eup %5112 }
 0x180   :  { %v5115_v61 = vpop.eup %5114  ;;  %v784_v9 = vrot.slane %v782_v4, 1  ;;  %v785_v2 = vrot.slane %v782_v4, 2  ;;  %v786_v3 = vrot.slane %v782_v4, 3  ;;  %v787_v44 = vrot.slane %v782_v4, 4 }
 0x181   :  { %v5117_v11 = vpop.eup %5116  ;;  %v788_v37 = vrot.slane %v782_v4, 5  ;;  %v789_v17 = vrot.slane %v782_v4, 6  ;;  %v790_v55 = vrot.slane %v782_v4, 7  ;;  %v799_v60 = vmul.f32 %v5105_v8, %v782_v4  ;;  %v7164_v4 = vld [vmem:[#allocation21_spill] sm:$0xff] }
 0x182   :  { %v5119_v57 = vpop.eup %5118  ;;  %v800_v56 = vmul.f32 %v5107_v7, %v784_v9  ;;  %v801_v46 = vmul.f32 %v5109_v34, %v785_v2  ;;  %v802_v6 = vmul.f32 %v5111_v45, %v786_v3  ;;  %v803_v20 = vmul.f32 %v5113_v29, %v787_v44  ;;  %v7165_v29 = vld [vmem:[#allocation17_spill] sm:$0xff]  ;;  %v7167_v9 = vld [vmem:[#allocation22_spill] sm:$0xff]  ;;  %v7168_v2 = vld [vmem:[#allocation19_spill] sm:$0xff] }
 0x183   :  { %v804_v1 = vmul.f32 %v5115_v61, %v788_v37  ;;  %v805_v59 = vmul.f32 %v5117_v11, %v789_v17  ;;  %v806_v43 = vmul.f32 %v5119_v57, %v790_v55  ;;  %v6231_v39 = vadd.f32 %v6217_v10, %v799_v60  ;;  %v7166_v61 = vld [vmem:[#allocation18_spill] sm:$0xff]  ;;  %v7169_v3 = vld [vmem:[#allocation20_spill] sm:$0xff]  ;;  %v7170_v44 = vld [vmem:[#allocation23_spill] sm:$0xff] }
 0x184   :  { %v6234_v31 = vadd.f32 %v6219_v24, %v800_v56  ;;  %v6236_v26 = vadd.f32 %v5093_v51, %v801_v46  ;;  %v6238_v40 = vadd.f32 %v5095_v18, %v802_v6  ;;  %v6240_v13 = vadd.f32 %v5097_v35, %v803_v20  ;;  %v7171_v60 = vld [vmem:[#allocation16_spill] sm:$0xff] }
 0x185   :  { %v6242_v8 = vadd.f32 %v5099_v33, %v804_v1  ;;  %v6244_v7 = vadd.f32 %v5101_v54, %v805_v59  ;;  %v6246_v34 = vadd.f32 %v5103_v12, %v806_v43  ;;  %v7162_v12 = vmov 0.0|0.0   ;;  %v7172_v20 = vld [vmem:[#allocation24_spill] sm:$0xff] }
 0x186   :  { %v823_v55 = vrot.slane %v6234_v31, 7  ;;  %v825_v17 = vrot.slane %v6236_v26, 6  ;;  %v827_v46 = vrot.slane %v6238_v40, 5  ;;  %v829_v11 = vrot.slane %v6240_v13, 4 }
 0x187   :  { %v831_v10 = vrot.slane %v6242_v8, 3  ;;  %v833_v51 = vrot.slane %v6244_v7, 2  ;;  %v835_v35 = vrot.slane %v6246_v34, 1  ;;  %v7163_v45 = vmov 0.0  }
 0x188   :  { %v824_v56 = vsel %vm761_vm2, %v823_v55, %v6231_v39 }
 0x189   :  { %v826_v37 = vsel %vm764_vm3, %v825_v17, %v824_v56 }
 0x18a   :  { %v828_v1 = vsel %vm767_vm4, %v827_v46, %v826_v37 }
 0x18b   :  { %v830_v24 = vsel %vm770_vm5, %v829_v11, %v828_v1 }
 0x18c   :  { %v832_v18 = vsel %vm773_vm6, %v831_v10, %v830_v24 }
 0x18d   :  { %v834_v33 = vsel %vm776_vm7, %v833_v51, %v832_v18 }
 0x18e   :  { %v836_v54 = vsel %vm779_vm8, %v835_v35, %v834_v33  ;;  %v7173_v33 = vld [vmem:[#allocation28_spill] sm:$0xff] }
 0x18f   :  { %903 = vmatmul.mubr.f32.vlgmr.msra.gmra.mrb[18].mxu0 %v836_v54  ;;  %4301 = vmatmul.mubr.f32.vlgmr.msra.gmra.mrb[10].mxu1 %v836_v54 }
 0x190   :  { %4671 = vmatpush1.bf16.msra.mxu0 %v5925_v15  ;;  %4702 = vmatpush3.bf16.msra.mxu1 %v5955_v48 }
 0x191   :  { %4673 = vmatprep.subr.bf16.mxu0 %v5928_v16  ;;  %4703 = vmatprep.subr.bf16.mxu1 %v7162_v12 }
 0x192   :  { %1322 = vmatprep.mubr.f32.mxu0 %v7163_v45  ;;  %4335 = vmatprep.mubr.msk.f32.mxu1 %vm5811_vm1, %v7163_v45 }
 0x194   :  { %4675 = vmatpush1.bf16.msra.mxu0 %v5933_v22  ;;  %4705 = vmatpush3.bf16.msra.mxu1 %v5967_v58 }
 0x195   :  { %4677 = vmatprep.subr.bf16.mxu0 %v5936_v23  ;;  %4706 = vmatprep.subr.bf16.mxu1 %v7162_v12 }
 0x198   :  { %4679 = vmatpush1.bf16.msra.mxu0 %v5941_v30  ;;  %4708 = vmatpush3.bf16.msra.mxu1 %v5981_v5 }
 0x199   :  { %4681 = vmatprep.subr.bf16.mxu0 %v5944_v32  ;;  %4709 = vmatprep.subr.bf16.mxu1 %v7162_v12 }
 0x19c   :  { %4683 = vmatpush1.bf16.msra.mxu0 %v5949_v41  ;;  %4711 = vmatpush3.bf16.msra.mxu1 %v5995_v14 }
 0x19d   :  { %4685 = vmatprep.subr.bf16.mxu0 %v5952_v42  ;;  %4712 = vmatprep.subr.bf16.mxu1 %v7162_v12 }
 0x1a0   :  { %4687 = vmatpush1.bf16.msra.mxu0 %v5960_v52  ;;  %4714 = vmatpush3.bf16.msra.mxu1 %v6007_v21 }
 0x1a1   :  { %4689 = vmatprep.subr.bf16.mxu0 %v5963_v53  ;;  %4715 = vmatprep.subr.bf16.mxu1 %v7162_v12 }
 0x1a4   :  { %4691 = vmatpush1.bf16.msra.mxu0 %v5974_v62  ;;  %4717 = vmatpush3.bf16.msra.mxu1 %v7164_v4 }
 0x1a5   :  { %4693 = vmatprep.subr.bf16.mxu0 %v7165_v29  ;;  %4718 = vmatprep.subr.bf16.mxu1 %v7162_v12 }
 0x1a8   :  { %4695 = vmatpush1.bf16.msra.mxu0 %v7166_v61  ;;  %4720 = vmatpush3.bf16.msra.mxu1 %v7167_v9 }
 0x1a9   :  { %4697 = vmatprep.subr.bf16.mxu0 %v7168_v2  ;;  %4721 = vmatprep.subr.bf16.mxu1 %v7162_v12 }
 0x1ac   :  { %4699 = vmatpush1.bf16.msra.mxu0 %v7169_v3  ;;  %4723 = vmatpush3.bf16.msra.mxu1 %v7170_v44 }
 0x1ad   :  { %4725 = vmatprep.subr.bf16.mxu0 %v7171_v60  ;;  %4756 = vmatprep.subr.bf16.mxu1 %v7162_v12 }
 0x262   :  { %v904_v57 = vpop.f32.mrb[18].mxu0  ;;  %v6298_v6 = vpop.f32.mrb[10].mxu1 }
 0x263   :  { %v905_v59 = vadd.f32 %v904_v57, %v7172_v20  ;;  %v906_v43 = vpop.f32.mrb[19].mxu0  ;;  %v4302_v55 = vpop.f32.mrb[11].mxu1 }
 0x264   :  { %v6302_v17 = vadd.f32 %v906_v43, %v6136_v28  ;;  %v7174_v28 = vld [vmem:[#allocation32_spill] sm:$0xff] }
 0x265   :  { %v980_v56 = vrot.slane %v905_v59, 7  ;;  %v981_v46 = vrot.slane %v905_v59, 1  ;;  %v982_v37 = vrot.slane %v905_v59, 2  ;;  %v983_v11 = vrot.slane %v905_v59, 3 }
 0x266   :  { %v984_v1 = vrot.slane %v905_v59, 4  ;;  %v985_v10 = vrot.slane %v905_v59, 5  ;;  %v986_v24 = vrot.slane %v905_v59, 6  ;;  %v996_v51 = vadd.f32 %v905_v59, %v6112_v25 }
 0x267   :  { %v995_v18 = vadd.f32 %v980_v56, %v6110_v19  ;;  %v997_v35 = vadd.f32 %v981_v46, %v6114_v27  ;;  %v998_v54 = vadd.f32 %v982_v37, %v7173_v33  ;;  %v999_v45 = vadd.f32 %v983_v11, %v6119_v49 }
 0x268   :  { %v1000_v57 = vadd.f32 %v984_v1, %v6121_v0  ;;  %v1001_v43 = vadd.f32 %v985_v10, %v6123_v47  ;;  %v3942_v55 = vmul.f32 -1.442695, %v996_v51  ;;  %v1002_v20 = vadd.f32 %v986_v24, %v7174_v28 }
 0x269   :  { %v3941_v60 = vmul.f32 -1.442695, %v995_v18  ;;  %v3943_v44 = vmul.f32 -1.442695, %v997_v35  ;;  %v3944_v3 = vmul.f32 -1.442695, %v998_v54  ;;  %v1068_v46 = vadd.f32 %v6302_v17, %v6144_v63 }
 0x26a   :  { %5120 = vpow2.f32 %v3942_v55  ;;  %v3945_v59 = vmul.f32 -1.442695, %v999_v45  ;;  %v3946_v56 = vmul.f32 -1.442695, %v1000_v57  ;;  %v3947_v37 = vmul.f32 -1.442695, %v1001_v43 }
 0x26b   :  { %5122 = vpow2.f32 %v3941_v60  ;;  %v1052_v11 = vrot.slane %v6302_v17, 7  ;;  %v1053_v1 = vrot.slane %v6302_v17, 1  ;;  %v3948_v10 = vmul.f32 -1.442695, %v1002_v20  ;;  %v7175_v18 = vld [vmem:[#allocation34_spill] sm:$0xff]  ;;  %v7176_v60 = vld [vmem:[#allocation37_spill] sm:$0xff] }
 0x26c   :  { %5124 = vpow2.f32 %v3943_v44  ;;  %v1054_v24 = vrot.slane %v6302_v17, 2  ;;  %v1055_v51 = vrot.slane %v6302_v17, 3  ;;  %v3950_v44 = vmul.f32 -1.442695, %v1068_v46 }
 0x26d   :  { %5126 = vpow2.f32 %v3944_v3  ;;  %v1067_v35 = vadd.f32 %v1052_v11, %v7175_v18  ;;  %v1069_v54 = vadd.f32 %v1053_v1, %v7176_v60 }
 0x26e   :  { %5128 = vpow2.f32 %v3945_v59  ;;  %v1070_v45 = vadd.f32 %v1054_v24, %v6154_v50  ;;  %v1071_v55 = vadd.f32 %v1055_v51, %v6157_v36  ;;  %v1056_v24 = vrot.slane %v6302_v17, 4 }
 0x26f   :  { %5130 = vpow2.f32 %v3946_v56  ;;  %v3949_v57 = vmul.f32 -1.442695, %v1067_v35  ;;  %v3951_v43 = vmul.f32 -1.442695, %v1069_v54  ;;  %v1057_v51 = vrot.slane %v6302_v17, 5 }
 0x270   :  { %5132 = vpow2.f32 %v3947_v37  ;;  %v3952_v3 = vmul.f32 -1.442695, %v1070_v45  ;;  %v3953_v20 = vmul.f32 -1.442695, %v1071_v55  ;;  %v1058_v54 = vrot.slane %v6302_v17, 6  ;;  %v7179_v17 = vld [vmem:[#allocation36_spill] sm:$0xff] }
 0x271   :  { %5134 = vpow2.f32 %v3948_v10 }
 0x272   :  { %5136 = vpow2.f32 %v3949_v57 }
 0x273   :  { %5138 = vpow2.f32 %v3950_v44 }
 0x274   :  { %v5121_v63 = vpop.eup %5120  ;;  %5140 = vpow2.f32 %v3951_v43  ;;  %v1072_v43 = vadd.f32 %v1056_v24, %v6160_v38 }
 0x275   :  { %v5123_v59 = vpop.eup %5122  ;;  %v1028_v11 = vadd.f32 1.0, %v5121_v63  ;;  %5142 = vpow2.f32 %v3952_v3 }
 0x276   :  { %v5125_v1 = vpop.eup %5124  ;;  %v1027_v56 = vadd.f32 1.0, %v5123_v59  ;;  %5144 = vpow2.f32 %v3953_v20  ;;  %v7177_v20 = vld [vmem:[#allocation41_spill] sm:$0xff] }
 0x277   :  { %v5127_v46 = vpop.eup %5126  ;;  %v1029_v37 = vadd.f32 1.0, %v5125_v1  ;;  %5146 = vrcp.f32 %v1028_v11  ;;  %v1073_v59 = vadd.f32 %v1057_v51, %v7177_v20 }
 0x278   :  { %v5129_v10 = vpop.eup %5128  ;;  %v1030_v35 = vadd.f32 1.0, %v5127_v46  ;;  %5148 = vrcp.f32 %v1027_v56  ;;  %v7178_v46 = vld [vmem:[#allocation42_spill] sm:$0xff] }
 0x279   :  { %v5131_v45 = vpop.eup %5130  ;;  %v1031_v44 = vadd.f32 1.0, %v5129_v10  ;;  %5150 = vrcp.f32 %v1029_v37  ;;  %v1074_v56 = vadd.f32 %v1058_v54, %v7178_v46  ;;  %v976_v10 = vadd.f32 %v6298_v6, %v7179_v17 }
 0x27a   :  { %v5133_v63 = vpop.eup %5132  ;;  %v1032_v57 = vadd.f32 1.0, %v5131_v45  ;;  %5152 = vrcp.f32 %v1030_v35  ;;  %v3954_v35 = vmul.f32 -1.442695, %v1072_v43  ;;  %v3955_v24 = vmul.f32 -1.442695, %v1073_v59 }
 0x27b   :  { %v5135_v55 = vpop.eup %5134  ;;  %5154 = vrcp.f32 %v1031_v44  ;;  %v1033_v3 = vadd.f32 1.0, %v5133_v63  ;;  %v3956_v44 = vmul.f32 -1.442695, %v1074_v56  ;;  %v1124_v50 = vrot.slane %v976_v10, 7 }
 0x27c   :  { %v5137_v11 = vpop.eup %5136  ;;  %5156 = vrcp.f32 %v1032_v57  ;;  %v1034_v1 = vadd.f32 1.0, %v5135_v55  ;;  %v1125_v57 = vrot.slane %v976_v10, 1  ;;  %v1126_v18 = vrot.slane %v976_v10, 2 }
 0x27d   :  { %v5139_v36 = vpop.eup %5138  ;;  %5158 = vrcp.f32 %v1033_v3  ;;  %v1099_v51 = vadd.f32 1.0, %v5137_v11  ;;  %v1127_v43 = vrot.slane %v976_v10, 3  ;;  %v1128_v56 = vrot.slane %v976_v10, 4  ;;  %v7181_v11 = vld [vmem:[#allocation44_spill] sm:$0xff] }
 0x27e   :  { %v5141_v37 = vpop.eup %5140  ;;  %5160 = vrcp.f32 %v1034_v1  ;;  %v1100_v54 = vadd.f32 1.0, %v5139_v36  ;;  %v7180_v1 = vld [vmem:[#allocation43_spill] sm:$0xff] }
 0x27f   :  { %v5143_v45 = vpop.eup %5142  ;;  %5162 = vpow2.f32 %v3954_v35  ;;  %v1129_v35 = vrot.slane %v976_v10, 5 }
 0x280   :  { %v5145_v38 = vpop.eup %5144  ;;  %5164 = vpow2.f32 %v3955_v24 }
 0x281   :  { %v5147_v63 = vpop.eup %5146  ;;  %5166 = vpow2.f32 %v3956_v44 }
 0x282   :  { %v5149_v20 = vpop.eup %5148  ;;  %v1140_v55 = vmul.f32 %v5147_v63, %v976_v10  ;;  %5168 = vrcp.f32 %v1099_v51  ;;  %v7182_v63 = vld [vmem:[#allocation46_spill] sm:$0xff]  ;;  %v7184_v51 = vld [vmem:[#allocation47_spill] sm:$0xff] }
 0x283   :  { %v5151_v46 = vpop.eup %5150  ;;  %v1139_v60 = vmul.f32 %v5149_v20, %v1124_v50  ;;  %5170 = vrcp.f32 %v1100_v54  ;;  %v1130_v20 = vrot.slane %v976_v10, 6  ;;  %v1103_v54 = vadd.f32 1.0, %v5145_v38 }
 0x284   :  { %v5153_v6 = vpop.eup %5152  ;;  %v1141_v3 = vmul.f32 %v5151_v46, %v1125_v57  ;;  %v1148_v59 = vadd.f32 %v1140_v55, %v7180_v1  ;;  %v7183_v46 = vld [vmem:[#allocation45_spill] sm:$0xff]  ;;  %v1101_v55 = vadd.f32 1.0, %v5141_v37 }
 0x285   :  { %v5155_v17 = vpop.eup %5154  ;;  %v1142_v28 = vmul.f32 %v5153_v6, %v1126_v18  ;;  %v1147_v47 = vadd.f32 %v1139_v60, %v7181_v11  ;;  %v1102_v18 = vadd.f32 1.0, %v5143_v45 }
 0x286   :  { %v5157_v0 = vpop.eup %5156  ;;  %v1143_v36 = vmul.f32 %v5155_v17, %v1127_v43  ;;  %v1149_v49 = vadd.f32 %v1141_v3, %v7182_v63  ;;  %v7185_v17 = vld [vmem:[#allocation48_spill] sm:$0xff] }
 0x287   :  { %v5159_v50 = vpop.eup %5158  ;;  %v1144_v24 = vmul.f32 %v5157_v0, %v1128_v56  ;;  %v1150_v44 = vadd.f32 %v1142_v28, %v7183_v46  ;;  %5172 = vtanh.f32 %v1147_v47  ;;  %v7186_v0 = vld [vmem:[#allocation49_spill] sm:$0xff]  ;;  %v7187_v47 = vld [vmem:[#allocation50_spill] sm:$0xff] }
 0x288   :  { %v5161_v57 = vpop.eup %5160  ;;  %v1145_v1 = vmul.f32 %v5159_v50, %v1129_v35  ;;  %v1151_v33 = vadd.f32 %v1143_v36, %v7184_v51  ;;  %5174 = vtanh.f32 %v1148_v59 }
 0x289   :  { %v1146_v60 = vmul.f32 %v5161_v57, %v1130_v20  ;;  %5176 = vtanh.f32 %v1149_v49  ;;  %v1152_v6 = vadd.f32 %v1144_v24, %v7185_v17  ;;  %v5163_v3 = vpop.eup %5162 }
 0x28a   :  { %5178 = vtanh.f32 %v1150_v44  ;;  %v1153_v10 = vadd.f32 %v1145_v1, %v7186_v0  ;;  %v5165_v28 = vpop.eup %5164  ;;  %v1104_v38 = vadd.f32 1.0, %v5163_v3 }
 0x28b   :  { %5180 = vtanh.f32 %v1151_v33  ;;  %v1154_v37 = vadd.f32 %v1146_v60, %v7187_v47  ;;  %v5167_v43 = vpop.eup %5166  ;;  %v1105_v35 = vadd.f32 1.0, %v5165_v28 }
 0x28c   :  { %5182 = vrcp.f32 %v1101_v55  ;;  %v5169_v56 = vpop.eup %5168  ;;  %v1106_v50 = vadd.f32 1.0, %v5167_v43 }
 0x28d   :  { %5184 = vrcp.f32 %v1102_v18  ;;  %v5171_v45 = vpop.eup %5170 }
 0x28e   :  { %5186 = vrcp.f32 %v1103_v54 }
 0x28f   :  { %5188 = vtanh.f32 %v1152_v6 }
 0x290   :  { %5190 = vtanh.f32 %v1153_v10 }
 0x291   :  { %v5173_v49 = vpop.eup %5172  ;;  %5192 = vtanh.f32 %v1154_v37 }
 0x292   :  { %v5175_v59 = vpop.eup %5174  ;;  %v1171_v33 = vrot.slane %v5173_v49, 1  ;;  %5194 = vrcp.f32 %v1104_v38 }
 0x293   :  { %v5177_v36 = vpop.eup %5176  ;;  %v1172_v20 = vrot.slane %v5175_v59, 1  ;;  %5196 = vrcp.f32 %v1105_v35 }
 0x294   :  { %v5179_v1 = vpop.eup %5178  ;;  %v1173_v24 = vrot.slane %v5177_v36, 1  ;;  %v1187_v44 = vsub.f32 %v6231_v39, %v1171_v33  ;;  %5198 = vrcp.f32 %v1106_v50 }
 0x295   :  { %v5181_v57 = vpop.eup %5180  ;;  %v1174_v55 = vrot.slane %v5179_v1, 1  ;;  %v1188_v18 = vsub.f32 %v6234_v31, %v1172_v20 }
 0x296   :  { %v5183_v60 = vpop.eup %5182  ;;  %v1175_v54 = vrot.slane %v5181_v57, 1  ;;  %v1189_v6 = vsub.f32 %v6236_v26, %v1173_v24  ;;  %v1203_v3 = vrot.slane %v1187_v44, 7 }
 0x297   :  { %v5185_v10 = vpop.eup %5184  ;;  %v1190_v28 = vsub.f32 %v6238_v40, %v1174_v55  ;;  %v1204_v37 = vrot.slane %v1188_v18, 7 }
 0x298   :  { %v5187_v43 = vpop.eup %5186  ;;  %v1191_v47 = vsub.f32 %v6240_v13, %v1175_v54  ;;  %v1205_v39 = vrot.slane %v1189_v6, 7  ;;  %v1219_v33 = vmul.f32 %v5169_v56, %v1203_v3 }
 0x299   :  { %v5189_v38 = vpop.eup %5188  ;;  %v1206_v0 = vrot.slane %v1190_v28, 7  ;;  %v1220_v17 = vmul.f32 %v5171_v45, %v1204_v37 }
 0x29a   :  { %v5191_v31 = vpop.eup %5190  ;;  %v1176_v20 = vrot.slane %v5189_v38, 1  ;;  %v1207_v35 = vrot.slane %v1191_v47, 7  ;;  %v1221_v51 = vmul.f32 %v5183_v60, %v1205_v39  ;;  %v6343_v46 = vadd.f32 %v5173_v49, %v1219_v33 }
 0x29b   :  { %v5193_v26 = vpop.eup %5192  ;;  %v1177_v24 = vrot.slane %v5191_v31, 1  ;;  %v1222_v50 = vmul.f32 %v5185_v10, %v1206_v0  ;;  %v6345_v44 = vadd.f32 %v5175_v59, %v1220_v17 }
 0x29c   :  { %v1178_v40 = vrot.slane %v5193_v26, 1  ;;  %v1192_v55 = vsub.f32 %v6242_v8, %v1176_v20  ;;  %v1223_v13 = vmul.f32 %v5187_v43, %v1207_v35  ;;  %v6348_v18 = vadd.f32 %v5177_v36, %v1221_v51  ;;  %v5195_v0 = vpop.eup %5194 }
 0x29d   :  { %v1193_v56 = vsub.f32 %v6244_v7, %v1177_v24  ;;  %v6351_v45 = vadd.f32 %v5179_v1, %v1222_v50  ;;  %v1243_v47 = vrot.slane %v6343_v46, 1  ;;  %v5197_v36 = vpop.eup %5196 }
 0x29e   :  { %v1194_v49 = vsub.f32 %v6246_v34, %v1178_v40  ;;  %v1208_v60 = vrot.slane %v1192_v55, 7  ;;  %v6355_v54 = vadd.f32 %v5181_v57, %v1223_v13  ;;  %v1245_v17 = vrot.slane %v6348_v18, 7  ;;  %v5199_v3 = vpop.eup %5198  ;;  %v7190_v13 = vld [vmem:[#allocation16_spill] sm:$0xff] }
 0x29f   :  { %v1209_v59 = vrot.slane %v1193_v56, 7  ;;  %v1244_v8 = vsel %vm761_vm2, %v6345_v44, %v1243_v47  ;;  %v1247_v51 = vrot.slane %v6351_v45, 6 }
 0x2a0   :  { %v1210_v7 = vrot.slane %v1194_v49, 7  ;;  %v1224_v1 = vmul.f32 %v5195_v0, %v1208_v60  ;;  %v1246_v6 = vsel %vm764_vm3, %v1245_v17, %v1244_v8  ;;  %v1249_v57 = vrot.slane %v6355_v54, 5  ;;  %v7191_v49 = vld [vmem:[#allocation24_spill] sm:$0xff] }
 0x2a1   :  { %v1225_v10 = vmul.f32 %v5197_v36, %v1209_v59  ;;  %v1248_v34 = vsel %vm767_vm4, %v1247_v51, %v1246_v6  ;;  %v7192_v59 = vld [vmem:[#allocation33_spill] sm:$0xff] }
 0x2a2   :  { %v1226_v28 = vmul.f32 %v5199_v3, %v1210_v7  ;;  %v6364_v37 = vadd.f32 %v5189_v38, %v1224_v1  ;;  %v1250_v39 = vsel %vm770_vm5, %v1249_v57, %v1248_v34  ;;  %v6381_v38 = vld [vmem:[#allocation2] sm:$0xff] }
 0x2a3   :  { %v6366_v43 = vadd.f32 %v5191_v31, %v1225_v10  ;;  %v7188_v31 = vld [vmem:[#allocation20_spill] sm:$0xff] }
 0x2a4   :  { %v6369_v33 = vadd.f32 %v5193_v26, %v1226_v28  ;;  %v1251_v20 = vrot.slane %v6364_v37, 4  ;;  %v7189_v26 = vld [vmem:[#allocation23_spill] sm:$0xff] }
 0x2a5   :  { %v1253_v35 = vrot.slane %v6366_v43, 3 }
 0x2a6   :  { %v1252_v24 = vsel %vm773_vm6, %v1251_v20, %v1250_v39  ;;  %v1255_v50 = vrot.slane %v6369_v33, 2  ;;  %v7193_v39 = vld [vmem:[#allocation28_spill] sm:$0xff] }
 0x2a7   :  { %v1254_v40 = vsel %vm776_vm7, %v1253_v35, %v1252_v24  ;;  %v7194_v35 = vld [vmem:[#allocation29_spill] sm:$0xff] }
 0x2a8   :  { %v1256_v55 = vsel %vm779_vm8, %v1255_v50, %v1254_v40  ;;  %v7195_v50 = vld [vmem:[#allocation30_spill] sm:$0xff] }
 0x2a9   :  { %1323 = vmatmul.mubr.f32.vlgmr.msra.gmra.mrb[20].mxu0 %v1256_v55  ;;  %4336 = vmatmul.mubr.f32.vlgmr.msra.gmra.mrb[12].mxu1 %v1256_v55  ;;  %v7196_v55 = vld [vmem:[#allocation31_spill] sm:$0xff] }
 0x2aa   :  { %4727 = vmatpush1.bf16.msra.mxu0 %v5925_v15  ;;  %4758 = vmatpush3.bf16.msra.mxu1 %v5955_v48 }
 0x2ab   :  { %4729 = vmatprep.subr.bf16.mxu0 %v5928_v16  ;;  %4759 = vmatprep.subr.bf16.mxu1 %v7162_v12 }
 0x2ac   :  { %1742 = vmatprep.mubr.f32.mxu0 %v6381_v38  ;;  %4370 = vmatprep.mubr.msk.f32.mxu1 %vm5811_vm1, %v6381_v38 }
 0x2ae   :  { %4731 = vmatpush1.bf16.msra.mxu0 %v5933_v22  ;;  %4761 = vmatpush3.bf16.msra.mxu1 %v5967_v58 }
 0x2af   :  { %4733 = vmatprep.subr.bf16.mxu0 %v5936_v23  ;;  %4762 = vmatprep.subr.bf16.mxu1 %v7162_v12 }
 0x2b2   :  { %4735 = vmatpush1.bf16.msra.mxu0 %v5941_v30  ;;  %4764 = vmatpush3.bf16.msra.mxu1 %v5981_v5 }
 0x2b3   :  { %4737 = vmatprep.subr.bf16.mxu0 %v5944_v32  ;;  %4765 = vmatprep.subr.bf16.mxu1 %v7162_v12 }
 0x2b6   :  { %4739 = vmatpush1.bf16.msra.mxu0 %v5949_v41  ;;  %4767 = vmatpush3.bf16.msra.mxu1 %v5995_v14 }
 0x2b7   :  { %4741 = vmatprep.subr.bf16.mxu0 %v5952_v42  ;;  %4768 = vmatprep.subr.bf16.mxu1 %v7162_v12 }
 0x2ba   :  { %4743 = vmatpush1.bf16.msra.mxu0 %v5960_v52  ;;  %4770 = vmatpush3.bf16.msra.mxu1 %v6007_v21 }
 0x2bb   :  { %4745 = vmatprep.subr.bf16.mxu0 %v5963_v53  ;;  %4771 = vmatprep.subr.bf16.mxu1 %v7162_v12 }
 0x2be   :  { %4747 = vmatpush1.bf16.msra.mxu0 %v5974_v62  ;;  %4773 = vmatpush3.bf16.msra.mxu1 %v7164_v4 }
 0x2bf   :  { %4749 = vmatprep.subr.bf16.mxu0 %v7165_v29  ;;  %4774 = vmatprep.subr.bf16.mxu1 %v7162_v12 }
 0x2c2   :  { %4751 = vmatpush1.bf16.msra.mxu0 %v7166_v61  ;;  %4776 = vmatpush3.bf16.msra.mxu1 %v7167_v9 }
 0x2c3   :  { %4753 = vmatprep.subr.bf16.mxu0 %v7168_v2  ;;  %4777 = vmatprep.subr.bf16.mxu1 %v7162_v12 }
 0x2c6   :  { %4755 = vmatpush1.bf16.msra.mxu0 %v7188_v31  ;;  %4779 = vmatpush3.bf16.msra.mxu1 %v7189_v26 }
 0x2c7   :  { %4781 = vmatprep.subr.bf16.mxu0 %v7190_v13  ;;  %4812 = vmatprep.subr.bf16.mxu1 %v7162_v12 }
 0x37c   :  { %v1324_v56 = vpop.f32.mrb[20].mxu0  ;;  %v6414_v47 = vpop.f32.mrb[12].mxu1 }
 0x37d   :  { %v1325_v60 = vadd.f32 %v1324_v56, %v7191_v49  ;;  %v1326_v17 = vpop.f32.mrb[21].mxu0  ;;  %v4337_v0 = vpop.f32.mrb[13].mxu1 }
 0x37e   :  { %v6418_v8 = vadd.f32 %v1326_v17, %v7192_v59  ;;  %v7197_v0 = vld [vmem:[#allocation32_spill] sm:$0xff] }
 0x37f   :  { %v1400_v51 = vrot.slane %v1325_v60, 6  ;;  %v1401_v36 = vrot.slane %v1325_v60, 7  ;;  %v1402_v7 = vrot.slane %v1325_v60, 1  ;;  %v1403_v1 = vrot.slane %v1325_v60, 2 }
 0x380   :  { %v1404_v6 = vrot.slane %v1325_v60, 3  ;;  %v1405_v3 = vrot.slane %v1325_v60, 4  ;;  %v1406_v10 = vrot.slane %v1325_v60, 5  ;;  %v1417_v34 = vadd.f32 %v1325_v60, %v6114_v27  ;;  %v7198_v27 = vld [vmem:[#allocation37_spill] sm:$0xff] }
 0x381   :  { %v1415_v57 = vadd.f32 %v1400_v51, %v6110_v19  ;;  %v1416_v28 = vadd.f32 %v1401_v36, %v6112_v25  ;;  %v1418_v20 = vadd.f32 %v1402_v7, %v7193_v39  ;;  %v1419_v24 = vadd.f32 %v1403_v1, %v7194_v35 }
 0x382   :  { %v1420_v40 = vadd.f32 %v1404_v6, %v7195_v50  ;;  %v1421_v56 = vadd.f32 %v1405_v3, %v7196_v55  ;;  %v3959_v17 = vmul.f32 -1.442695, %v1417_v34  ;;  %v1422_v59 = vadd.f32 %v1406_v10, %v7197_v0 }
 0x383   :  { %v3957_v49 = vmul.f32 -1.442695, %v1415_v57  ;;  %v3958_v13 = vmul.f32 -1.442695, %v1416_v28  ;;  %v3960_v26 = vmul.f32 -1.442695, %v1418_v20  ;;  %v1489_v36 = vadd.f32 %v6418_v8, %v7198_v27 }
 0x384   :  { %5200 = vpow2.f32 %v3959_v17  ;;  %v3961_v60 = vmul.f32 -1.442695, %v1419_v24  ;;  %v3962_v51 = vmul.f32 -1.442695, %v1420_v40  ;;  %v3963_v7 = vmul.f32 -1.442695, %v1421_v56 }
 0x385   :  { %5202 = vpow2.f32 %v3957_v49  ;;  %v1472_v1 = vrot.slane %v6418_v8, 6  ;;  %v1473_v6 = vrot.slane %v6418_v8, 7  ;;  %v3964_v3 = vmul.f32 -1.442695, %v1422_v59  ;;  %v7199_v57 = vld [vmem:[#allocation34_spill] sm:$0xff]  ;;  %v7200_v49 = vld [vmem:[#allocation35_spill] sm:$0xff] }
 0x386   :  { %5204 = vpow2.f32 %v3958_v13  ;;  %v1474_v10 = vrot.slane %v6418_v8, 1  ;;  %v1475_v34 = vrot.slane %v6418_v8, 2  ;;  %v7201_v24 = vld [vmem:[#allocation38_spill] sm:$0xff]  ;;  %v3967_v13 = vmul.f32 -1.442695, %v1489_v36  ;;  %v7202_v27 = vld [vmem:[#allocation39_spill] sm:$0xff] }
 0x387   :  { %5206 = vpow2.f32 %v3960_v26  ;;  %v1487_v28 = vadd.f32 %v1472_v1, %v7199_v57  ;;  %v1488_v20 = vadd.f32 %v1473_v6, %v7200_v49 }
 0x388   :  { %5208 = vpow2.f32 %v3961_v60  ;;  %v1490_v40 = vadd.f32 %v1474_v10, %v7201_v24  ;;  %v1491_v0 = vadd.f32 %v1475_v34, %v7202_v27  ;;  %v1476_v10 = vrot.slane %v6418_v8, 3 }
 0x389   :  { %5210 = vpow2.f32 %v3962_v51  ;;  %v3965_v56 = vmul.f32 -1.442695, %v1487_v28  ;;  %v3966_v17 = vmul.f32 -1.442695, %v1488_v20  ;;  %v1477_v34 = vrot.slane %v6418_v8, 4 }
 0x38a   :  { %5212 = vpow2.f32 %v3963_v7  ;;  %v3968_v26 = vmul.f32 -1.442695, %v1490_v40  ;;  %v3969_v59 = vmul.f32 -1.442695, %v1491_v0  ;;  %v1478_v0 = vrot.slane %v6418_v8, 5  ;;  %v7206_v8 = vld [vmem:[#allocation36_spill] sm:$0xff] }
 0x38b   :  { %5214 = vpow2.f32 %v3964_v3 }
 0x38c   :  { %5216 = vpow2.f32 %v3965_v56  ;;  %v7203_v56 = vld [vmem:[#allocation40_spill] sm:$0xff] }
 0x38d   :  { %5218 = vpow2.f32 %v3966_v17  ;;  %v1492_v17 = vadd.f32 %v1476_v10, %v7203_v56 }
 0x38e   :  { %v5201_v55 = vpop.eup %5200  ;;  %5220 = vpow2.f32 %v3967_v13 }
 0x38f   :  { %v5203_v60 = vpop.eup %5202  ;;  %v1449_v1 = vadd.f32 1.0, %v5201_v55  ;;  %5222 = vpow2.f32 %v3968_v26 }
 0x390   :  { %v5205_v6 = vpop.eup %5204  ;;  %v1447_v51 = vadd.f32 1.0, %v5203_v60  ;;  %5224 = vpow2.f32 %v3969_v59  ;;  %v7204_v60 = vld [vmem:[#allocation41_spill] sm:$0xff] }
 0x391   :  { %v5207_v36 = vpop.eup %5206  ;;  %v1448_v7 = vadd.f32 1.0, %v5205_v6  ;;  %5226 = vrcp.f32 %v1449_v1  ;;  %v1493_v1 = vadd.f32 %v1477_v34, %v7204_v60 }
 0x392   :  { %v5209_v3 = vpop.eup %5208  ;;  %v1450_v28 = vadd.f32 1.0, %v5207_v36  ;;  %5228 = vrcp.f32 %v1447_v51  ;;  %v7205_v36 = vld [vmem:[#allocation42_spill] sm:$0xff] }
 0x393   :  { %v5211_v20 = vpop.eup %5210  ;;  %v1451_v40 = vadd.f32 1.0, %v5209_v3  ;;  %5230 = vrcp.f32 %v1448_v7  ;;  %v1494_v51 = vadd.f32 %v1478_v0, %v7205_v36  ;;  %v1396_v3 = vadd.f32 %v6414_v47, %v7206_v8 }
 0x394   :  { %v5213_v55 = vpop.eup %5212  ;;  %v1452_v13 = vadd.f32 1.0, %v5211_v20  ;;  %5232 = vrcp.f32 %v1450_v28  ;;  %v3970_v28 = vmul.f32 -1.442695, %v1492_v17  ;;  %v3971_v10 = vmul.f32 -1.442695, %v1493_v1 }
 0x395   :  { %v5215_v26 = vpop.eup %5214  ;;  %5234 = vrcp.f32 %v1451_v40  ;;  %v1453_v59 = vadd.f32 1.0, %v5213_v55  ;;  %v3972_v40 = vmul.f32 -1.442695, %v1494_v51  ;;  %v1544_v57 = vrot.slane %v1396_v3, 6 }
 0x396   :  { %v5217_v6 = vpop.eup %5216  ;;  %5236 = vrcp.f32 %v1452_v13  ;;  %v1454_v27 = vadd.f32 1.0, %v5215_v26  ;;  %v1545_v13 = vrot.slane %v1396_v3, 7  ;;  %v1546_v24 = vrot.slane %v1396_v3, 1 }
 0x397   :  { %v5219_v49 = vpop.eup %5218  ;;  %5238 = vrcp.f32 %v1453_v59  ;;  %v1519_v34 = vadd.f32 1.0, %v5217_v6  ;;  %v1548_v17 = vrot.slane %v1396_v3, 3 }
 0x398   :  { %v5221_v7 = vpop.eup %5220  ;;  %5240 = vrcp.f32 %v1454_v27  ;;  %v1520_v0 = vadd.f32 1.0, %v5219_v49  ;;  %v1547_v27 = vrot.slane %v1396_v3, 2 }
 0x399   :  { %v5223_v20 = vpop.eup %5222  ;;  %5242 = vpow2.f32 %v3970_v28  ;;  %v1549_v28 = vrot.slane %v1396_v3, 4  ;;  %v1521_v19 = vadd.f32 1.0, %v5221_v7 }
 0x39a   :  { %v5225_v56 = vpop.eup %5224  ;;  %5244 = vpow2.f32 %v3971_v10 }
 0x39b   :  { %v5227_v55 = vpop.eup %5226  ;;  %5246 = vpow2.f32 %v3972_v40 }
 0x39c   :  { %v5229_v60 = vpop.eup %5228  ;;  %v1561_v26 = vmul.f32 %v5227_v55, %v1396_v3  ;;  %5248 = vrcp.f32 %v1519_v34  ;;  %v7207_v55 = vld [vmem:[#allocation43_spill] sm:$0xff] }
 0x39d   :  { %v5231_v36 = vpop.eup %5230  ;;  %v1559_v50 = vmul.f32 %v5229_v60, %v1544_v57  ;;  %5250 = vrcp.f32 %v1520_v0  ;;  %v1550_v60 = vrot.slane %v1396_v3, 5  ;;  %v1523_v0 = vadd.f32 1.0, %v5225_v56 }
 0x39e   :  { %v5233_v47 = vpop.eup %5232  ;;  %v1560_v59 = vmul.f32 %v5231_v36, %v1545_v13  ;;  %v1569_v6 = vadd.f32 %v1561_v26, %v7182_v63  ;;  %v7208_v36 = vld [vmem:[#allocation45_spill] sm:$0xff] }
 0x39f   :  { %v5235_v1 = vpop.eup %5234  ;;  %v1562_v51 = vmul.f32 %v5233_v47, %v1546_v24  ;;  %v1567_v8 = vadd.f32 %v1559_v50, %v7181_v11  ;;  %v7209_v24 = vld [vmem:[#allocation47_spill] sm:$0xff]  ;;  %v1522_v50 = vadd.f32 1.0, %v5223_v20 }
 0x3a0   :  { %v5237_v35 = vpop.eup %5236  ;;  %v1563_v49 = vmul.f32 %v5235_v1, %v1547_v27  ;;  %v1568_v25 = vadd.f32 %v1560_v59, %v7207_v55  ;;  %v7210_v27 = vld [vmem:[#allocation48_spill] sm:$0xff] }
 0x3a1   :  { %v5239_v57 = vpop.eup %5238  ;;  %v1564_v10 = vmul.f32 %v5237_v35, %v1548_v17  ;;  %v1570_v40 = vadd.f32 %v1562_v51, %v7208_v36  ;;  %5252 = vtanh.f32 %v1567_v8  ;;  %v7211_v35 = vld [vmem:[#allocation49_spill] sm:$0xff]  ;;  %v7212_v8 = vld [vmem:[#allocation50_spill] sm:$0xff] }
 0x3a2   :  { %v5241_v13 = vpop.eup %5240  ;;  %v1565_v34 = vmul.f32 %v5239_v57, %v1549_v28  ;;  %v1571_v47 = vadd.f32 %v1563_v49, %v7209_v24  ;;  %5254 = vtanh.f32 %v1568_v25 }
 0x3a3   :  { %v1566_v26 = vmul.f32 %v5241_v13, %v1550_v60  ;;  %5256 = vtanh.f32 %v1569_v6  ;;  %v1572_v1 = vadd.f32 %v1564_v10, %v7210_v27  ;;  %v5243_v59 = vpop.eup %5242 }
 0x3a4   :  { %5258 = vtanh.f32 %v1570_v40  ;;  %v1573_v3 = vadd.f32 %v1565_v34, %v7211_v35  ;;  %v5245_v17 = vpop.eup %5244  ;;  %v1524_v56 = vadd.f32 1.0, %v5243_v59 }
 0x3a5   :  { %5260 = vtanh.f32 %v1571_v47  ;;  %v1574_v7 = vadd.f32 %v1566_v26, %v7212_v8  ;;  %v5247_v51 = vpop.eup %5246  ;;  %v1525_v49 = vadd.f32 1.0, %v5245_v17 }
 0x3a6   :  { %5262 = vrcp.f32 %v1521_v19  ;;  %v5249_v28 = vpop.eup %5248  ;;  %v1526_v19 = vadd.f32 1.0, %v5247_v51 }
 0x3a7   :  { %5264 = vrcp.f32 %v1522_v50  ;;  %v5251_v25 = vpop.eup %5250 }
 0x3a8   :  { %5266 = vrcp.f32 %v1523_v0 }
 0x3a9   :  { %5268 = vtanh.f32 %v1572_v1 }
 0x3aa   :  { %5270 = vtanh.f32 %v1573_v3 }
 0x3ab   :  { %v5253_v20 = vpop.eup %5252  ;;  %5272 = vtanh.f32 %v1574_v7 }
 0x3ac   :  { %v5255_v6 = vpop.eup %5254  ;;  %v1591_v57 = vrot.slane %v5253_v20, 1  ;;  %5274 = vrcp.f32 %v1524_v56 }
 0x3ad   :  { %v5257_v60 = vpop.eup %5256  ;;  %v1592_v10 = vrot.slane %v5255_v6, 1  ;;  %5276 = vrcp.f32 %v1525_v49 }
 0x3ae   :  { %v5259_v40 = vpop.eup %5258  ;;  %v1593_v13 = vrot.slane %v5257_v60, 1  ;;  %v1607_v34 = vsub.f32 %v6343_v46, %v1591_v57  ;;  %5278 = vrcp.f32 %v1526_v19 }
 0x3af   :  { %v5261_v47 = vpop.eup %5260  ;;  %v1594_v50 = vrot.slane %v5259_v40, 1  ;;  %v1608_v26 = vsub.f32 %v6345_v44, %v1592_v10 }
 0x3b0   :  { %v5263_v0 = vpop.eup %5262  ;;  %v1595_v1 = vrot.slane %v5261_v47, 1  ;;  %v1609_v59 = vsub.f32 %v6348_v18, %v1593_v13  ;;  %v1623_v3 = vrot.slane %v1607_v34, 7 }
 0x3b1   :  { %v5265_v17 = vpop.eup %5264  ;;  %v1610_v7 = vsub.f32 %v6351_v45, %v1594_v50  ;;  %v1624_v51 = vrot.slane %v1608_v26, 7 }
 0x3b2   :  { %v5267_v8 = vpop.eup %5266  ;;  %v1611_v35 = vsub.f32 %v6355_v54, %v1595_v1  ;;  %v1625_v46 = vrot.slane %v1609_v59, 7  ;;  %v1639_v57 = vmul.f32 %v5249_v28, %v1623_v3 }
 0x3b3   :  { %v5269_v56 = vpop.eup %5268  ;;  %v1626_v27 = vrot.slane %v1610_v7, 7  ;;  %v1640_v24 = vmul.f32 %v5251_v25, %v1624_v51 }
 0x3b4   :  { %v5271_v44 = vpop.eup %5270  ;;  %v1596_v10 = vrot.slane %v5269_v56, 1  ;;  %v1627_v49 = vrot.slane %v1611_v35, 7  ;;  %v1641_v63 = vmul.f32 %v5263_v0, %v1625_v46  ;;  %v6459_v36 = vadd.f32 %v5253_v20, %v1639_v57 }
 0x3b5   :  { %v5273_v18 = vpop.eup %5272  ;;  %v1597_v13 = vrot.slane %v5271_v44, 1  ;;  %v1642_v19 = vmul.f32 %v5265_v17, %v1626_v27  ;;  %v6461_v34 = vadd.f32 %v5255_v6, %v1640_v24 }
 0x3b6   :  { %v1598_v45 = vrot.slane %v5273_v18, 1  ;;  %v1612_v50 = vsub.f32 %v6364_v37, %v1596_v10  ;;  %v1643_v54 = vmul.f32 %v5267_v8, %v1627_v49  ;;  %v6464_v26 = vadd.f32 %v5257_v60, %v1641_v63  ;;  %v5275_v24 = vpop.eup %5274 }
 0x3b7   :  { %v1613_v28 = vsub.f32 %v6366_v43, %v1597_v13  ;;  %v6467_v25 = vadd.f32 %v5259_v40, %v1642_v19  ;;  %v1663_v35 = vrot.slane %v6459_v36, 2  ;;  %v1664_v20 = vrot.slane %v6461_v34, 1  ;;  %v5277_v8 = vpop.eup %5276 }
 0x3b8   :  { %v1614_v0 = vsub.f32 %v6369_v33, %v1598_v45  ;;  %v1628_v1 = vrot.slane %v1612_v50, 7  ;;  %v6472_v27 = vadd.f32 %v5261_v47, %v1643_v54  ;;  %v5279_v59 = vpop.eup %5278  ;;  %v7215_v54 = vld [vmem:[#allocation24_spill] sm:$0xff] }
 0x3b9   :  { %v1629_v6 = vrot.slane %v1613_v28, 7  ;;  %v1665_v37 = vsel %vm761_vm2, %v1664_v20, %v1663_v35  ;;  %v1667_v63 = vrot.slane %v6467_v25, 7 }
 0x3ba   :  { %v1630_v60 = vrot.slane %v1614_v0, 7  ;;  %v1644_v43 = vmul.f32 %v5275_v24, %v1628_v1  ;;  %v1666_v40 = vsel %vm764_vm3, %v6464_v26, %v1665_v37  ;;  %v1669_v33 = vrot.slane %v6472_v27, 6  ;;  %v7216_v0 = vld [vmem:[#allocation33_spill] sm:$0xff] }
 0x3bb   :  { %v1645_v3 = vmul.f32 %v5277_v8, %v1629_v6  ;;  %v1668_v17 = vsel %vm767_vm4, %v1667_v63, %v1666_v40 }
 0x3bc   :  { %v1646_v47 = vmul.f32 %v5279_v59, %v1630_v60  ;;  %v6480_v7 = vadd.f32 %v5269_v56, %v1644_v43  ;;  %v1670_v46 = vsel %vm770_vm5, %v1669_v33, %v1668_v17  ;;  %v7214_v56 = vld [vmem:[#allocation16_spill] sm:$0xff]  ;;  %v7217_v59 = vld [vmem:[#allocation25_spill] sm:$0xff]  ;;  %v7218_v17 = vld [vmem:[#allocation26_spill] sm:$0xff] }
 0x3bd   :  { %v6482_v51 = vadd.f32 %v5271_v44, %v1645_v3 }
 0x3be   :  { %v6485_v57 = vadd.f32 %v5273_v18, %v1646_v47  ;;  %v1671_v10 = vrot.slane %v6480_v7, 5  ;;  %v7219_v47 = vld [vmem:[#allocation27_spill] sm:$0xff] }
 0x3bf   :  { %v1673_v49 = vrot.slane %v6482_v51, 4 }
 0x3c0   :  { %v1672_v13 = vsel %vm773_vm6, %v1671_v10, %v1670_v46  ;;  %v1675_v19 = vrot.slane %v6485_v57, 3  ;;  %v7220_v10 = vld [vmem:[#allocation29_spill] sm:$0xff] }
 0x3c1   :  { %v1674_v45 = vsel %vm776_vm7, %v1673_v49, %v1672_v13  ;;  %v7221_v13 = vld [vmem:[#allocation30_spill] sm:$0xff] }
 0x3c2   :  { %v1676_v50 = vsel %vm779_vm8, %v1675_v19, %v1674_v45  ;;  %v7222_v45 = vld [vmem:[#allocation31_spill] sm:$0xff] }
 0x3c3   :  { %1743 = vmatmul.mubr.f32.vlgmr.msra.gmra.mrb[22].mxu0 %v1676_v50  ;;  %4371 = vmatmul.mubr.f32.vlgmr.msra.gmra.mrb[14].mxu1 %v1676_v50 }
 0x3c4   :  { %4783 = vmatpush1.bf16.msra.mxu0 %v5925_v15  ;;  %4814 = vmatpush3.bf16.msra.mxu1 %v5955_v48 }
 0x3c5   :  { %4785 = vmatprep.subr.bf16.mxu0 %v5928_v16  ;;  %4815 = vmatprep.subr.bf16.mxu1 %v7162_v12 }
 0x3c6   :  { %2162 = vmatprep.mubr.f32.mxu0 %v6381_v38  ;;  %4405 = vmatprep.mubr.msk.f32.mxu1 %vm5811_vm1, %v6381_v38  ;;  %v7213_v38 = vld [vmem:[#allocation23_spill] sm:$0xff] }
 0x3c8   :  { %4787 = vmatpush1.bf16.msra.mxu0 %v5933_v22  ;;  %4817 = vmatpush3.bf16.msra.mxu1 %v5967_v58 }
 0x3c9   :  { %4789 = vmatprep.subr.bf16.mxu0 %v5936_v23  ;;  %4818 = vmatprep.subr.bf16.mxu1 %v7162_v12 }
 0x3cc   :  { %4791 = vmatpush1.bf16.msra.mxu0 %v5941_v30  ;;  %4820 = vmatpush3.bf16.msra.mxu1 %v5981_v5 }
 0x3cd   :  { %4793 = vmatprep.subr.bf16.mxu0 %v5944_v32  ;;  %4821 = vmatprep.subr.bf16.mxu1 %v7162_v12 }
 0x3d0   :  { %4795 = vmatpush1.bf16.msra.mxu0 %v5949_v41  ;;  %4823 = vmatpush3.bf16.msra.mxu1 %v5995_v14 }
 0x3d1   :  { %4797 = vmatprep.subr.bf16.mxu0 %v5952_v42  ;;  %4824 = vmatprep.subr.bf16.mxu1 %v7162_v12 }
 0x3d4   :  { %4799 = vmatpush1.bf16.msra.mxu0 %v5960_v52  ;;  %4826 = vmatpush3.bf16.msra.mxu1 %v6007_v21 }
 0x3d5   :  { %4801 = vmatprep.subr.bf16.mxu0 %v5963_v53  ;;  %4827 = vmatprep.subr.bf16.mxu1 %v7162_v12 }
 0x3d8   :  { %4803 = vmatpush1.bf16.msra.mxu0 %v5974_v62  ;;  %4829 = vmatpush3.bf16.msra.mxu1 %v7164_v4 }
 0x3d9   :  { %4805 = vmatprep.subr.bf16.mxu0 %v7165_v29  ;;  %4830 = vmatprep.subr.bf16.mxu1 %v7162_v12 }
 0x3dc   :  { %4807 = vmatpush1.bf16.msra.mxu0 %v7166_v61  ;;  %4832 = vmatpush3.bf16.msra.mxu1 %v7167_v9 }
 0x3dd   :  { %4809 = vmatprep.subr.bf16.mxu0 %v7168_v2  ;;  %4833 = vmatprep.subr.bf16.mxu1 %v7162_v12 }
 0x3e0   :  { %4811 = vmatpush1.bf16.msra.mxu0 %v7188_v31  ;;  %4835 = vmatpush3.bf16.msra.mxu1 %v7213_v38 }
 0x3e1   :  { %4837 = vmatprep.subr.bf16.mxu0 %v7214_v56  ;;  %4868 = vmatprep.subr.bf16.mxu1 %v7162_v12 }
 0x496   :  { %v1744_v44 = vpop.f32.mrb[22].mxu0  ;;  %v6528_v18 = vpop.f32.mrb[14].mxu1 }
 0x497   :  { %v1745_v28 = vadd.f32 %v1744_v44, %v7215_v54  ;;  %v1746_v35 = vpop.f32.mrb[23].mxu0  ;;  %v4372_v20 = vpop.f32.mrb[15].mxu1 }
 0x498   :  { %v6532_v1 = vadd.f32 %v1746_v35, %v7216_v0  ;;  %v7223_v35 = vld [vmem:[#allocation32_spill] sm:$0xff] }
 0x499   :  { %v1820_v24 = vrot.slane %v1745_v28, 5  ;;  %v1821_v6 = vrot.slane %v1745_v28, 6  ;;  %v1822_v37 = vrot.slane %v1745_v28, 7  ;;  %v1823_v63 = vrot.slane %v1745_v28, 1 }
 0x49a   :  { %v1824_v8 = vrot.slane %v1745_v28, 2  ;;  %v1825_v60 = vrot.slane %v1745_v28, 3  ;;  %v1826_v43 = vrot.slane %v1745_v28, 4  ;;  %v1838_v40 = vadd.f32 %v1745_v28, %v7193_v39  ;;  %v7224_v39 = vld [vmem:[#allocation38_spill] sm:$0xff] }
 0x49b   :  { %v1835_v3 = vadd.f32 %v1820_v24, %v7217_v59  ;;  %v1836_v33 = vadd.f32 %v1821_v6, %v7218_v17  ;;  %v1837_v46 = vadd.f32 %v1822_v37, %v7219_v47  ;;  %v1839_v49 = vadd.f32 %v1823_v63, %v7220_v10 }
 0x49c   :  { %v1840_v19 = vadd.f32 %v1824_v8, %v7221_v13  ;;  %v1841_v50 = vadd.f32 %v1825_v60, %v7222_v45  ;;  %v3976_v44 = vmul.f32 -1.442695, %v1838_v40  ;;  %v1842_v20 = vadd.f32 %v1826_v43, %v7223_v35 }
 0x49d   :  { %v3973_v0 = vmul.f32 -1.442695, %v1835_v3  ;;  %v3974_v54 = vmul.f32 -1.442695, %v1836_v33  ;;  %v3975_v56 = vmul.f32 -1.442695, %v1837_v46  ;;  %v1910_v6 = vadd.f32 %v6532_v1, %v7224_v39 }
 0x49e   :  { %5280 = vpow2.f32 %v3976_v44  ;;  %v3977_v28 = vmul.f32 -1.442695, %v1839_v49  ;;  %v3978_v24 = vmul.f32 -1.442695, %v1840_v19  ;;  %v3979_v37 = vmul.f32 -1.442695, %v1841_v50 }
 0x49f   :  { %5282 = vpow2.f32 %v3973_v0  ;;  %v1892_v63 = vrot.slane %v6532_v1, 5  ;;  %v1893_v8 = vrot.slane %v6532_v1, 6  ;;  %v3980_v60 = vmul.f32 -1.442695, %v1842_v20  ;;  %v7225_v3 = vld [vmem:[#allocation34_spill] sm:$0xff]  ;;  %v7226_v0 = vld [vmem:[#allocation35_spill] sm:$0xff] }
 0x4a0   :  { %5284 = vpow2.f32 %v3974_v54  ;;  %v1894_v43 = vrot.slane %v6532_v1, 7  ;;  %v1895_v40 = vrot.slane %v6532_v1, 1  ;;  %v7227_v49 = vld [vmem:[#allocation37_spill] sm:$0xff]  ;;  %v7228_v44 = vld [vmem:[#allocation39_spill] sm:$0xff]  ;;  %v3984_v20 = vmul.f32 -1.442695, %v1910_v6 }
 0x4a1   :  { %5286 = vpow2.f32 %v3975_v56  ;;  %v1907_v33 = vadd.f32 %v1892_v63, %v7225_v3  ;;  %v1908_v46 = vadd.f32 %v1893_v8, %v7226_v0 }
 0x4a2   :  { %5288 = vpow2.f32 %v3977_v28  ;;  %v1909_v19 = vadd.f32 %v1894_v43, %v7227_v49  ;;  %v1911_v39 = vadd.f32 %v1895_v40, %v7228_v44  ;;  %v1896_v43 = vrot.slane %v6532_v1, 2 }
 0x4a3   :  { %5290 = vpow2.f32 %v3978_v24  ;;  %v3981_v54 = vmul.f32 -1.442695, %v1907_v33  ;;  %v3982_v50 = vmul.f32 -1.442695, %v1908_v46 }
 0x4a4   :  { %5292 = vpow2.f32 %v3979_v37  ;;  %v3983_v56 = vmul.f32 -1.442695, %v1909_v19  ;;  %v3985_v35 = vmul.f32 -1.442695, %v1911_v39  ;;  %v1898_v39 = vrot.slane %v6532_v1, 4 }
 0x4a5   :  { %5294 = vpow2.f32 %v3980_v60  ;;  %v1897_v60 = vrot.slane %v6532_v1, 3  ;;  %v7232_v1 = vld [vmem:[#allocation36_spill] sm:$0xff] }
 0x4a6   :  { %5296 = vpow2.f32 %v3981_v54 }
 0x4a7   :  { %5298 = vpow2.f32 %v3982_v50  ;;  %v7229_v50 = vld [vmem:[#allocation40_spill] sm:$0xff] }
 0x4a8   :  { %v5281_v45 = vpop.eup %5280  ;;  %5300 = vpow2.f32 %v3983_v56  ;;  %v1912_v56 = vadd.f32 %v1896_v43, %v7229_v50 }
 0x4a9   :  { %v5283_v28 = vpop.eup %5282  ;;  %v1870_v63 = vadd.f32 1.0, %v5281_v45  ;;  %5302 = vpow2.f32 %v3984_v20 }
 0x4aa   :  { %v5285_v8 = vpop.eup %5284  ;;  %v1867_v24 = vadd.f32 1.0, %v5283_v28  ;;  %5304 = vpow2.f32 %v3985_v35  ;;  %v7230_v28 = vld [vmem:[#allocation41_spill] sm:$0xff] }
 0x4ab   :  { %v5287_v37 = vpop.eup %5286  ;;  %v1868_v33 = vadd.f32 1.0, %v5285_v8  ;;  %5306 = vrcp.f32 %v1870_v63  ;;  %v1913_v63 = vadd.f32 %v1897_v60, %v7230_v28 }
 0x4ac   :  { %v5289_v40 = vpop.eup %5288  ;;  %v1869_v6 = vadd.f32 1.0, %v5287_v37  ;;  %5308 = vrcp.f32 %v1867_v24  ;;  %v7231_v37 = vld [vmem:[#allocation42_spill] sm:$0xff] }
 0x4ad   :  { %v5291_v46 = vpop.eup %5290  ;;  %v1871_v19 = vadd.f32 1.0, %v5289_v40  ;;  %5310 = vrcp.f32 %v1868_v33  ;;  %v1914_v24 = vadd.f32 %v1898_v39, %v7231_v37  ;;  %v1816_v40 = vadd.f32 %v6528_v18, %v7232_v1 }
 0x4ae   :  { %v5293_v45 = vpop.eup %5292  ;;  %v1872_v54 = vadd.f32 1.0, %v5291_v46  ;;  %5312 = vrcp.f32 %v1869_v6  ;;  %v3986_v6 = vmul.f32 -1.442695, %v1912_v56  ;;  %v3987_v43 = vmul.f32 -1.442695, %v1913_v63 }
 0x4af   :  { %v5295_v20 = vpop.eup %5294  ;;  %5314 = vrcp.f32 %v1871_v19  ;;  %v1873_v35 = vadd.f32 1.0, %v5293_v45  ;;  %v3988_v19 = vmul.f32 -1.442695, %v1914_v24  ;;  %v1964_v44 = vrot.slane %v1816_v40, 5 }
 0x4b0   :  { %v5297_v8 = vpop.eup %5296  ;;  %5316 = vrcp.f32 %v1872_v54  ;;  %v1874_v49 = vadd.f32 1.0, %v5295_v20  ;;  %v1965_v54 = vrot.slane %v1816_v40, 6  ;;  %v1966_v3 = vrot.slane %v1816_v40, 7 }
 0x4b1   :  { %v5299_v0 = vpop.eup %5298  ;;  %5318 = vrcp.f32 %v1873_v35  ;;  %v1939_v60 = vadd.f32 1.0, %v5297_v8  ;;  %v1968_v56 = vrot.slane %v1816_v40, 2  ;;  %v1969_v24 = vrot.slane %v1816_v40, 3 }
 0x4b2   :  { %v5301_v33 = vpop.eup %5300  ;;  %5320 = vrcp.f32 %v1874_v49  ;;  %v1940_v20 = vadd.f32 1.0, %v5299_v0  ;;  %v1967_v49 = vrot.slane %v1816_v40, 1 }
 0x4b3   :  { %v5303_v46 = vpop.eup %5302  ;;  %5322 = vpow2.f32 %v3986_v6  ;;  %v1941_v59 = vadd.f32 1.0, %v5301_v33 }
 0x4b4   :  { %v5305_v50 = vpop.eup %5304  ;;  %5324 = vpow2.f32 %v3987_v43 }
 0x4b5   :  { %v5307_v45 = vpop.eup %5306  ;;  %5326 = vpow2.f32 %v3988_v19 }
 0x4b6   :  { %v5309_v28 = vpop.eup %5308  ;;  %v1982_v39 = vmul.f32 %v5307_v45, %v1816_v40  ;;  %5328 = vrcp.f32 %v1939_v60  ;;  %v7233_v45 = vld [vmem:[#allocation45_spill] sm:$0xff]  ;;  %v7235_v60 = vld [vmem:[#allocation47_spill] sm:$0xff] }
 0x4b7   :  { %v5311_v37 = vpop.eup %5310  ;;  %v1979_v13 = vmul.f32 %v5309_v28, %v1964_v44  ;;  %5330 = vrcp.f32 %v1940_v20  ;;  %v1970_v28 = vrot.slane %v1816_v40, 4  ;;  %v1943_v20 = vadd.f32 1.0, %v5305_v50 }
 0x4b8   :  { %v5313_v18 = vpop.eup %5312  ;;  %v1980_v35 = vmul.f32 %v5311_v37, %v1965_v54  ;;  %v1990_v17 = vadd.f32 %v1982_v39, %v7233_v45  ;;  %v7234_v37 = vld [vmem:[#allocation46_spill] sm:$0xff] }
 0x4b9   :  { %v5315_v63 = vpop.eup %5314  ;;  %v1981_v1 = vmul.f32 %v5313_v18, %v1966_v3  ;;  %v1987_v8 = vadd.f32 %v1979_v13, %v7181_v11  ;;  %v1942_v13 = vadd.f32 1.0, %v5303_v46 }
 0x4ba   :  { %v5317_v47 = vpop.eup %5316  ;;  %v1983_v6 = vmul.f32 %v5315_v63, %v1967_v49  ;;  %v1988_v0 = vadd.f32 %v1980_v35, %v7207_v55  ;;  %v7236_v35 = vld [vmem:[#allocation48_spill] sm:$0xff] }
 0x4bb   :  { %v5319_v44 = vpop.eup %5318  ;;  %v1984_v43 = vmul.f32 %v5317_v47, %v1968_v56  ;;  %v1989_v19 = vadd.f32 %v1981_v1, %v7234_v37  ;;  %5332 = vtanh.f32 %v1987_v8  ;;  %v7237_v47 = vld [vmem:[#allocation49_spill] sm:$0xff]  ;;  %v7238_v56 = vld [vmem:[#allocation50_spill] sm:$0xff] }
 0x4bc   :  { %v5321_v54 = vpop.eup %5320  ;;  %v1985_v3 = vmul.f32 %v5319_v44, %v1969_v24  ;;  %v1991_v18 = vadd.f32 %v1983_v6, %v7235_v60  ;;  %5334 = vtanh.f32 %v1988_v0 }
 0x4bd   :  { %v1986_v11 = vmul.f32 %v5321_v54, %v1970_v28  ;;  %5336 = vtanh.f32 %v1989_v19  ;;  %v1992_v49 = vadd.f32 %v1984_v43, %v7236_v35  ;;  %v5323_v39 = vpop.eup %5322 }
 0x4be   :  { %5338 = vtanh.f32 %v1990_v17  ;;  %v1993_v40 = vadd.f32 %v1985_v3, %v7237_v47  ;;  %v5325_v1 = vpop.eup %5324  ;;  %v1944_v50 = vadd.f32 1.0, %v5323_v39 }
 0x4bf   :  { %5340 = vtanh.f32 %v1991_v18  ;;  %v1994_v33 = vadd.f32 %v1986_v11, %v7238_v56  ;;  %v5327_v63 = vpop.eup %5326  ;;  %v1945_v6 = vadd.f32 1.0, %v5325_v1 }
 0x4c0   :  { %5342 = vrcp.f32 %v1941_v59  ;;  %v5329_v24 = vpop.eup %5328  ;;  %v1946_v59 = vadd.f32 1.0, %v5327_v63 }
 0x4c1   :  { %5344 = vrcp.f32 %v1942_v13  ;;  %v5331_v46 = vpop.eup %5330 }
 0x4c2   :  { %5346 = vrcp.f32 %v1943_v20 }
 0x4c3   :  { %5348 = vtanh.f32 %v1992_v49 }
 0x4c4   :  { %5350 = vtanh.f32 %v1993_v40 }
 0x4c5   :  { %v5333_v8 = vpop.eup %5332  ;;  %5352 = vtanh.f32 %v1994_v33 }
 0x4c6   :  { %v5335_v17 = vpop.eup %5334  ;;  %v2011_v0 = vrot.slane %v5333_v8, 1  ;;  %5354 = vrcp.f32 %v1944_v50 }
 0x4c7   :  { %v5337_v44 = vpop.eup %5336  ;;  %v2012_v28 = vrot.slane %v5335_v17, 1  ;;  %5356 = vrcp.f32 %v1945_v6 }
 0x4c8   :  { %v5339_v43 = vpop.eup %5338  ;;  %v2013_v19 = vrot.slane %v5337_v44, 1  ;;  %v2027_v54 = vsub.f32 %v6459_v36, %v2011_v0  ;;  %5358 = vrcp.f32 %v1946_v59 }
 0x4c9   :  { %v5341_v11 = vpop.eup %5340  ;;  %v2014_v3 = vrot.slane %v5339_v43, 1  ;;  %v2028_v18 = vsub.f32 %v6461_v34, %v2012_v28 }
 0x4ca   :  { %v5343_v13 = vpop.eup %5342  ;;  %v2015_v20 = vrot.slane %v5341_v11, 1  ;;  %v2029_v49 = vsub.f32 %v6464_v26, %v2013_v19  ;;  %v2043_v39 = vrot.slane %v2027_v54, 7 }
 0x4cb   :  { %v5345_v40 = vpop.eup %5344  ;;  %v2030_v1 = vsub.f32 %v6467_v25, %v2014_v3  ;;  %v2044_v33 = vrot.slane %v2028_v18, 7 }
 0x4cc   :  { %v5347_v63 = vpop.eup %5346  ;;  %v2031_v56 = vsub.f32 %v6472_v27, %v2015_v20  ;;  %v2045_v36 = vrot.slane %v2029_v49, 7  ;;  %v2059_v0 = vmul.f32 %v5329_v24, %v2043_v39 }
 0x4cd   :  { %v5349_v50 = vpop.eup %5348  ;;  %v2046_v47 = vrot.slane %v2030_v1, 7  ;;  %v2060_v35 = vmul.f32 %v5331_v46, %v2044_v33 }
 0x4ce   :  { %v5351_v34 = vpop.eup %5350  ;;  %v2016_v28 = vrot.slane %v5349_v50, 1  ;;  %v2047_v6 = vrot.slane %v2031_v56, 7  ;;  %v2061_v45 = vmul.f32 %v5343_v13, %v2045_v36  ;;  %v6573_v60 = vadd.f32 %v5333_v8, %v2059_v0 }
 0x4cf   :  { %v5353_v26 = vpop.eup %5352  ;;  %v2017_v19 = vrot.slane %v5351_v34, 1  ;;  %v2062_v59 = vmul.f32 %v5345_v40, %v2046_v47  ;;  %v6575_v54 = vadd.f32 %v5335_v17, %v2060_v35 }
 0x4d0   :  { %v2018_v25 = vrot.slane %v5353_v26, 1  ;;  %v2032_v3 = vsub.f32 %v6480_v7, %v2016_v28  ;;  %v2063_v27 = vmul.f32 %v5347_v63, %v2047_v6  ;;  %v6578_v18 = vadd.f32 %v5337_v44, %v2061_v45  ;;  %v5355_v17 = vpop.eup %5354 }
 0x4d1   :  { %v2033_v24 = vsub.f32 %v6482_v51, %v2017_v19  ;;  %v6581_v46 = vadd.f32 %v5339_v43, %v2062_v59  ;;  %v2083_v56 = vrot.slane %v6573_v60, 3  ;;  %v2084_v8 = vrot.slane %v6575_v54, 2  ;;  %v5357_v44 = vpop.eup %5356 }
 0x4d2   :  { %v2034_v13 = vsub.f32 %v6485_v57, %v2018_v25  ;;  %v2048_v20 = vrot.slane %v2032_v3, 7  ;;  %v6586_v47 = vadd.f32 %v5341_v11, %v2063_v27  ;;  %v2086_v35 = vrot.slane %v6578_v18, 1  ;;  %v5359_v39 = vpop.eup %5358 }
 0x4d3   :  { %v2049_v7 = vrot.slane %v2033_v24, 7  ;;  %v2085_v45 = vsel %vm761_vm2, %v2084_v8, %v2083_v56  ;;  %v7240_v24 = vld [vmem:[#allocation24_spill] sm:$0xff] }
 0x4d4   :  { %v2050_v49 = vrot.slane %v2034_v13, 7  ;;  %v2064_v51 = vmul.f32 %v5355_v17, %v2048_v20  ;;  %v2087_v43 = vsel %vm764_vm3, %v2086_v35, %v2085_v45  ;;  %v2089_v57 = vrot.slane %v6586_v47, 7  ;;  %v7241_v20 = vld [vmem:[#allocation33_spill] sm:$0xff] }
 0x4d5   :  { %v2065_v40 = vmul.f32 %v5357_v44, %v2049_v7  ;;  %v2088_v1 = vsel %vm767_vm4, %v6581_v46, %v2087_v43 }
 0x4d6   :  { %v2066_v11 = vmul.f32 %v5359_v39, %v2050_v49  ;;  %v6594_v33 = vadd.f32 %v5349_v50, %v2064_v51  ;;  %v2090_v36 = vsel %vm770_vm5, %v2089_v57, %v2088_v1  ;;  %v6611_v50 = vld [vmem:[#allocation2] sm:$0xff]  ;;  %v7243_v57 = vld [vmem:[#allocation26_spill] sm:$0xff] }
 0x4d7   :  { %v6596_v63 = vadd.f32 %v5351_v34, %v2065_v40  ;;  %v7239_v34 = vld [vmem:[#allocation16_spill] sm:$0xff]  ;;  %v7242_v40 = vld [vmem:[#allocation25_spill] sm:$0xff] }
 0x4d8   :  { %v6599_v0 = vadd.f32 %v5353_v26, %v2066_v11  ;;  %v2091_v28 = vrot.slane %v6594_v33, 6 }
 0x4d9   :  { %v2093_v6 = vrot.slane %v6596_v63, 5 }
 0x4da   :  { %v2092_v19 = vsel %vm773_vm6, %v2091_v28, %v2090_v36  ;;  %v2095_v59 = vrot.slane %v6599_v0, 4  ;;  %v7244_v36 = vld [vmem:[#allocation27_spill] sm:$0xff] }
 0x4db   :  { %v2094_v25 = vsel %vm776_vm7, %v2093_v6, %v2092_v19  ;;  %v7245_v6 = vld [vmem:[#allocation28_spill] sm:$0xff] }
 0x4dc   :  { %v2096_v3 = vsel %vm779_vm8, %v2095_v59, %v2094_v25  ;;  %v7246_v59 = vld [vmem:[#allocation30_spill] sm:$0xff] }
 0x4dd   :  { %2163 = vmatmul.mubr.f32.vlgmr.msra.gmra.mrb[24].mxu0 %v2096_v3  ;;  %4406 = vmatmul.mubr.f32.vlgmr.msra.gmra.mrb[16].mxu1 %v2096_v3  ;;  %v7247_v3 = vld [vmem:[#allocation31_spill] sm:$0xff] }
 0x4de   :  { %4839 = vmatpush1.bf16.msra.mxu0 %v5925_v15  ;;  %4870 = vmatpush3.bf16.msra.mxu1 %v5955_v48 }
 0x4df   :  { %4841 = vmatprep.subr.bf16.mxu0 %v5928_v16  ;;  %4871 = vmatprep.subr.bf16.mxu1 %v7162_v12 }
 0x4e0   :  { %2582 = vmatprep.mubr.f32.mxu0 %v6611_v50  ;;  %4440 = vmatprep.mubr.msk.f32.mxu1 %vm5811_vm1, %v6611_v50 }
 0x4e2   :  { %4843 = vmatpush1.bf16.msra.mxu0 %v5933_v22  ;;  %4873 = vmatpush3.bf16.msra.mxu1 %v5967_v58 }
 0x4e3   :  { %4845 = vmatprep.subr.bf16.mxu0 %v5936_v23  ;;  %4874 = vmatprep.subr.bf16.mxu1 %v7162_v12 }
 0x4e6   :  { %4847 = vmatpush1.bf16.msra.mxu0 %v5941_v30  ;;  %4876 = vmatpush3.bf16.msra.mxu1 %v5981_v5 }
 0x4e7   :  { %4849 = vmatprep.subr.bf16.mxu0 %v5944_v32  ;;  %4877 = vmatprep.subr.bf16.mxu1 %v7162_v12 }
 0x4ea   :  { %4851 = vmatpush1.bf16.msra.mxu0 %v5949_v41  ;;  %4879 = vmatpush3.bf16.msra.mxu1 %v5995_v14 }
 0x4eb   :  { %4853 = vmatprep.subr.bf16.mxu0 %v5952_v42  ;;  %4880 = vmatprep.subr.bf16.mxu1 %v7162_v12 }
 0x4ee   :  { %4855 = vmatpush1.bf16.msra.mxu0 %v5960_v52  ;;  %4882 = vmatpush3.bf16.msra.mxu1 %v6007_v21 }
 0x4ef   :  { %4857 = vmatprep.subr.bf16.mxu0 %v5963_v53  ;;  %4883 = vmatprep.subr.bf16.mxu1 %v7162_v12 }
 0x4f2   :  { %4859 = vmatpush1.bf16.msra.mxu0 %v5974_v62  ;;  %4885 = vmatpush3.bf16.msra.mxu1 %v7164_v4 }
 0x4f3   :  { %4861 = vmatprep.subr.bf16.mxu0 %v7165_v29  ;;  %4886 = vmatprep.subr.bf16.mxu1 %v7162_v12 }
 0x4f6   :  { %4863 = vmatpush1.bf16.msra.mxu0 %v7166_v61  ;;  %4888 = vmatpush3.bf16.msra.mxu1 %v7167_v9 }
 0x4f7   :  { %4865 = vmatprep.subr.bf16.mxu0 %v7168_v2  ;;  %4889 = vmatprep.subr.bf16.mxu1 %v7162_v12 }
 0x4fa   :  { %4867 = vmatpush1.bf16.msra.mxu0 %v7188_v31  ;;  %4891 = vmatpush3.bf16.msra.mxu1 %v7213_v38 }
 0x4fb   :  { %4893 = vmatprep.subr.bf16.mxu0 %v7239_v34  ;;  %4924 = vmatprep.subr.bf16.mxu1 %v7162_v12 }
 0x5b0   :  { %v2164_v26 = vpop.f32.mrb[24].mxu0  ;;  %v6644_v27 = vpop.f32.mrb[16].mxu1 }
 0x5b1   :  { %v2165_v56 = vadd.f32 %v2164_v26, %v7240_v24  ;;  %v2166_v8 = vpop.f32.mrb[25].mxu0  ;;  %v4407_v13 = vpop.f32.mrb[17].mxu1 }
 0x5b2   :  { %v6648_v35 = vadd.f32 %v2166_v8, %v7241_v20  ;;  %v7248_v8 = vld [vmem:[#allocation32_spill] sm:$0xff] }
 0x5b3   :  { %v2240_v17 = vrot.slane %v2165_v56, 4  ;;  %v2241_v7 = vrot.slane %v2165_v56, 5  ;;  %v2242_v45 = vrot.slane %v2165_v56, 6  ;;  %v2243_v44 = vrot.slane %v2165_v56, 7 }
 0x5b4   :  { %v2244_v49 = vrot.slane %v2165_v56, 1  ;;  %v2245_v51 = vrot.slane %v2165_v56, 2  ;;  %v2246_v43 = vrot.slane %v2165_v56, 3  ;;  %v2259_v39 = vadd.f32 %v2165_v56, %v7220_v10 }
 0x5b5   :  { %v2255_v1 = vadd.f32 %v2240_v17, %v7242_v40  ;;  %v2256_v11 = vadd.f32 %v2241_v7, %v7243_v57  ;;  %v2257_v28 = vadd.f32 %v2242_v45, %v7244_v36  ;;  %v2258_v19 = vadd.f32 %v2243_v44, %v7245_v6  ;;  %v7258_v6 = vld [vmem:[#allocation44_spill] sm:$0xff] }
 0x5b6   :  { %v2260_v25 = vadd.f32 %v2244_v49, %v7246_v59  ;;  %v2261_v26 = vadd.f32 %v2245_v51, %v7247_v3  ;;  %v2262_v13 = vadd.f32 %v2246_v43, %v7248_v8  ;;  %v3993_v20 = vmul.f32 -1.442695, %v2259_v39  ;;  %v7249_v43 = vld [vmem:[#allocation34_spill] sm:$0xff] }
 0x5b7   :  { %v3989_v24 = vmul.f32 -1.442695, %v2255_v1  ;;  %v3990_v34 = vmul.f32 -1.442695, %v2256_v11  ;;  %v3991_v38 = vmul.f32 -1.442695, %v2257_v28 }
 0x5b8   :  { %v3992_v31 = vmul.f32 -1.442695, %v2258_v19  ;;  %5360 = vpow2.f32 %v3993_v20  ;;  %v3994_v56 = vmul.f32 -1.442695, %v2260_v25  ;;  %v3995_v17 = vmul.f32 -1.442695, %v2261_v26 }
 0x5b9   :  { %5362 = vpow2.f32 %v3989_v24  ;;  %v3996_v7 = vmul.f32 -1.442695, %v2262_v13  ;;  %v2312_v45 = vrot.slane %v6648_v35, 4  ;;  %v2313_v44 = vrot.slane %v6648_v35, 5  ;;  %v7250_v1 = vld [vmem:[#allocation39_spill] sm:$0xff]  ;;  %v7252_v11 = vld [vmem:[#allocation37_spill] sm:$0xff] }
 0x5ba   :  { %5364 = vpow2.f32 %v3990_v34  ;;  %v2314_v49 = vrot.slane %v6648_v35, 6  ;;  %v2315_v51 = vrot.slane %v6648_v35, 7  ;;  %v2331_v20 = vadd.f32 %v6648_v35, %v7250_v1  ;;  %v7251_v24 = vld [vmem:[#allocation35_spill] sm:$0xff]  ;;  %v7253_v19 = vld [vmem:[#allocation38_spill] sm:$0xff] }
 0x5bb   :  { %5366 = vpow2.f32 %v3991_v38  ;;  %v2327_v39 = vadd.f32 %v2312_v45, %v7249_v43  ;;  %v2328_v34 = vadd.f32 %v2313_v44, %v7251_v24 }
 0x5bc   :  { %5368 = vpow2.f32 %v3992_v31  ;;  %v2329_v28 = vadd.f32 %v2314_v49, %v7252_v11  ;;  %v2330_v25 = vadd.f32 %v2315_v51, %v7253_v19  ;;  %v4001_v31 = vmul.f32 -1.442695, %v2331_v20 }
 0x5bd   :  { %5370 = vpow2.f32 %v3994_v56  ;;  %v3997_v38 = vmul.f32 -1.442695, %v2327_v39  ;;  %v3998_v26 = vmul.f32 -1.442695, %v2328_v34  ;;  %v2316_v49 = vrot.slane %v6648_v35, 1 }
 0x5be   :  { %5372 = vpow2.f32 %v3995_v17  ;;  %v3999_v13 = vmul.f32 -1.442695, %v2329_v28  ;;  %v4000_v8 = vmul.f32 -1.442695, %v2330_v25  ;;  %v2318_v20 = vrot.slane %v6648_v35, 3 }
 0x5bf   :  { %5374 = vpow2.f32 %v3996_v7  ;;  %v2317_v7 = vrot.slane %v6648_v35, 2  ;;  %v7257_v35 = vld [vmem:[#allocation36_spill] sm:$0xff] }
 0x5c0   :  { %5376 = vpow2.f32 %v3997_v38 }
 0x5c1   :  { %5378 = vpow2.f32 %v3998_v26 }
 0x5c2   :  { %v5361_v45 = vpop.eup %5360  ;;  %5380 = vpow2.f32 %v3999_v13 }
 0x5c3   :  { %v5363_v43 = vpop.eup %5362  ;;  %v2291_v1 = vadd.f32 1.0, %v5361_v45  ;;  %5382 = vpow2.f32 %v4000_v8  ;;  %v7255_v45 = vld [vmem:[#allocation41_spill] sm:$0xff] }
 0x5c4   :  { %v5365_v56 = vpop.eup %5364  ;;  %v2287_v44 = vadd.f32 1.0, %v5363_v43  ;;  %5384 = vpow2.f32 %v4001_v31  ;;  %v7254_v43 = vld [vmem:[#allocation40_spill] sm:$0xff] }
 0x5c5   :  { %v5367_v51 = vpop.eup %5366  ;;  %v2288_v17 = vadd.f32 1.0, %v5365_v56  ;;  %5386 = vrcp.f32 %v2291_v1  ;;  %v2332_v26 = vadd.f32 %v2316_v49, %v7254_v43  ;;  %v2333_v1 = vadd.f32 %v2317_v7, %v7255_v45 }
 0x5c6   :  { %v5369_v39 = vpop.eup %5368  ;;  %v2289_v34 = vadd.f32 1.0, %v5367_v51  ;;  %5388 = vrcp.f32 %v2287_v44  ;;  %v7256_v51 = vld [vmem:[#allocation42_spill] sm:$0xff] }
 0x5c7   :  { %v5371_v28 = vpop.eup %5370  ;;  %v2290_v25 = vadd.f32 1.0, %v5369_v39  ;;  %5390 = vrcp.f32 %v2288_v17  ;;  %v2334_v44 = vadd.f32 %v2318_v20, %v7256_v51  ;;  %v2236_v39 = vadd.f32 %v6644_v27, %v7257_v35 }
 0x5c8   :  { %v5373_v38 = vpop.eup %5372  ;;  %v2292_v8 = vadd.f32 1.0, %v5371_v28  ;;  %5392 = vrcp.f32 %v2289_v34  ;;  %v4002_v34 = vmul.f32 -1.442695, %v2332_v26  ;;  %v4003_v49 = vmul.f32 -1.442695, %v2333_v1 }
 0x5c9   :  { %v5375_v13 = vpop.eup %5374  ;;  %5394 = vrcp.f32 %v2290_v25  ;;  %v2293_v31 = vadd.f32 1.0, %v5373_v38  ;;  %v4004_v25 = vmul.f32 -1.442695, %v2334_v44  ;;  %v2384_v24 = vrot.slane %v2236_v39, 4 }
 0x5ca   :  { %v5377_v56 = vpop.eup %5376  ;;  %5396 = vrcp.f32 %v2292_v8  ;;  %v2294_v19 = vadd.f32 1.0, %v5375_v13  ;;  %v2385_v8 = vrot.slane %v2236_v39, 5  ;;  %v2386_v3 = vrot.slane %v2236_v39, 6 }
 0x5cb   :  { %v5379_v11 = vpop.eup %5378  ;;  %5398 = vrcp.f32 %v2293_v31  ;;  %v2359_v7 = vadd.f32 1.0, %v5377_v56  ;;  %v2387_v31 = vrot.slane %v2236_v39, 7  ;;  %v2388_v26 = vrot.slane %v2236_v39, 1 }
 0x5cc   :  { %v5381_v17 = vpop.eup %5380  ;;  %5400 = vrcp.f32 %v2294_v19  ;;  %v2360_v13 = vadd.f32 1.0, %v5379_v11  ;;  %v2389_v44 = vrot.slane %v2236_v39, 2 }
 0x5cd   :  { %v5383_v28 = vpop.eup %5382  ;;  %5402 = vpow2.f32 %v4002_v34  ;;  %v2390_v34 = vrot.slane %v2236_v39, 3 }
 0x5ce   :  { %v5385_v43 = vpop.eup %5384  ;;  %5404 = vpow2.f32 %v4003_v49  ;;  %v7259_v49 = vld [vmem:[#allocation47_spill] sm:$0xff] }
 0x5cf   :  { %v5387_v38 = vpop.eup %5386  ;;  %5406 = vpow2.f32 %v4004_v25 }
 0x5d0   :  { %v5389_v45 = vpop.eup %5388  ;;  %v2403_v20 = vmul.f32 %v5387_v38, %v2236_v39  ;;  %5408 = vrcp.f32 %v2359_v7  ;;  %v7260_v7 = vld [vmem:[#allocation45_spill] sm:$0xff]  ;;  %v2363_v39 = vadd.f32 1.0, %v5385_v43 }
 0x5d1   :  { %v5391_v51 = vpop.eup %5390  ;;  %v2399_v10 = vmul.f32 %v5389_v45, %v2384_v24  ;;  %5410 = vrcp.f32 %v2360_v13  ;;  %v7261_v13 = vld [vmem:[#allocation48_spill] sm:$0xff] }
 0x5d2   :  { %v5393_v27 = vpop.eup %5392  ;;  %v2400_v19 = vmul.f32 %v5391_v51, %v2385_v8  ;;  %v2411_v51 = vadd.f32 %v2403_v20, %v7259_v49  ;;  %v2361_v8 = vadd.f32 1.0, %v5381_v17 }
 0x5d3   :  { %v5395_v1 = vpop.eup %5394  ;;  %v2401_v35 = vmul.f32 %v5393_v27, %v2386_v3  ;;  %v2407_v56 = vadd.f32 %v2399_v10, %v7258_v6  ;;  %v2362_v10 = vadd.f32 1.0, %v5383_v28 }
 0x5d4   :  { %v5397_v36 = vpop.eup %5396  ;;  %v2402_v11 = vmul.f32 %v5395_v1, %v2387_v31  ;;  %v2408_v38 = vadd.f32 %v2400_v19, %v7207_v55 }
 0x5d5   :  { %v5399_v57 = vpop.eup %5398  ;;  %v2404_v24 = vmul.f32 %v5397_v36, %v2388_v26  ;;  %v2409_v45 = vadd.f32 %v2401_v35, %v7234_v37  ;;  %5412 = vtanh.f32 %v2407_v56  ;;  %v7262_v35 = vld [vmem:[#allocation49_spill] sm:$0xff]  ;;  %v7263_v26 = vld [vmem:[#allocation50_spill] sm:$0xff] }
 0x5d6   :  { %v5401_v25 = vpop.eup %5400  ;;  %v2405_v3 = vmul.f32 %v5399_v57, %v2389_v44  ;;  %v2410_v27 = vadd.f32 %v2402_v11, %v7260_v7  ;;  %5414 = vtanh.f32 %v2408_v38 }
 0x5d7   :  { %v2406_v6 = vmul.f32 %v5401_v25, %v2390_v34  ;;  %5416 = vtanh.f32 %v2409_v45  ;;  %v2412_v31 = vadd.f32 %v2404_v24, %v7261_v13  ;;  %v5403_v36 = vpop.eup %5402 }
 0x5d8   :  { %5418 = vtanh.f32 %v2410_v27  ;;  %v2413_v19 = vadd.f32 %v2405_v3, %v7262_v35  ;;  %v5405_v20 = vpop.eup %5404  ;;  %v2364_v43 = vadd.f32 1.0, %v5403_v36 }
 0x5d9   :  { %5420 = vtanh.f32 %v2411_v51  ;;  %v2414_v17 = vadd.f32 %v2406_v6, %v7263_v26  ;;  %v5407_v57 = vpop.eup %5406  ;;  %v2365_v34 = vadd.f32 1.0, %v5405_v20 }
 0x5da   :  { %5422 = vrcp.f32 %v2361_v8  ;;  %v5409_v1 = vpop.eup %5408  ;;  %v2366_v24 = vadd.f32 1.0, %v5407_v57 }
 0x5db   :  { %5424 = vrcp.f32 %v2362_v10  ;;  %v5411_v28 = vpop.eup %5410 }
 0x5dc   :  { %5426 = vrcp.f32 %v2363_v39 }
 0x5dd   :  { %5428 = vtanh.f32 %v2412_v31 }
 0x5de   :  { %5430 = vtanh.f32 %v2413_v19 }
 0x5df   :  { %v5413_v44 = vpop.eup %5412  ;;  %5432 = vtanh.f32 %v2414_v17 }
 0x5e0   :  { %v5415_v56 = vpop.eup %5414  ;;  %v2431_v11 = vrot.slane %v5413_v44, 1  ;;  %5434 = vrcp.f32 %v2364_v43 }
 0x5e1   :  { %v5417_v38 = vpop.eup %5416  ;;  %v2432_v45 = vrot.slane %v5415_v56, 1  ;;  %5436 = vrcp.f32 %v2365_v34 }
 0x5e2   :  { %v5419_v51 = vpop.eup %5418  ;;  %v2433_v25 = vrot.slane %v5417_v38, 1  ;;  %v2447_v8 = vsub.f32 %v6573_v60, %v2431_v11  ;;  %5438 = vrcp.f32 %v2366_v24 }
 0x5e3   :  { %v5421_v6 = vpop.eup %5420  ;;  %v2434_v3 = vrot.slane %v5419_v51, 1  ;;  %v2448_v27 = vsub.f32 %v6575_v54, %v2432_v45 }
 0x5e4   :  { %v5423_v10 = vpop.eup %5422  ;;  %v2435_v39 = vrot.slane %v5421_v6, 1  ;;  %v2449_v31 = vsub.f32 %v6578_v18, %v2433_v25  ;;  %v2463_v36 = vrot.slane %v2447_v8, 7 }
 0x5e5   :  { %v5425_v19 = vpop.eup %5424  ;;  %v2450_v20 = vsub.f32 %v6581_v46, %v2434_v3  ;;  %v2464_v17 = vrot.slane %v2448_v27, 7 }
 0x5e6   :  { %v5427_v57 = vpop.eup %5426  ;;  %v2451_v26 = vsub.f32 %v6586_v47, %v2435_v39  ;;  %v2465_v60 = vrot.slane %v2449_v31, 7  ;;  %v2479_v11 = vmul.f32 %v5409_v1, %v2463_v36 }
 0x5e7   :  { %v5429_v43 = vpop.eup %5428  ;;  %v2466_v35 = vrot.slane %v2450_v20, 7  ;;  %v2480_v13 = vmul.f32 %v5411_v28, %v2464_v17 }
 0x5e8   :  { %v5431_v54 = vpop.eup %5430  ;;  %v2436_v45 = vrot.slane %v5429_v43, 1  ;;  %v2467_v34 = vrot.slane %v2451_v26, 7  ;;  %v2481_v49 = vmul.f32 %v5423_v10, %v2465_v60  ;;  %v6689_v7 = vadd.f32 %v5413_v44, %v2479_v11 }
 0x5e9   :  { %v5433_v18 = vpop.eup %5432  ;;  %v2437_v25 = vrot.slane %v5431_v54, 1  ;;  %v2482_v24 = vmul.f32 %v5425_v19, %v2466_v35  ;;  %v6691_v8 = vadd.f32 %v5415_v56, %v2480_v13 }
 0x5ea   :  { %v2438_v46 = vrot.slane %v5433_v18, 1  ;;  %v2452_v3 = vsub.f32 %v6594_v33, %v2436_v45  ;;  %v2483_v47 = vmul.f32 %v5427_v57, %v2467_v34  ;;  %v6694_v27 = vadd.f32 %v5417_v38, %v2481_v49  ;;  %v5435_v56 = vpop.eup %5434 }
 0x5eb   :  { %v2453_v1 = vsub.f32 %v6596_v63, %v2437_v25  ;;  %v6697_v28 = vadd.f32 %v5419_v51, %v2482_v24  ;;  %v2503_v26 = vrot.slane %v6689_v7, 4  ;;  %v2504_v44 = vrot.slane %v6691_v8, 3  ;;  %v5437_v63 = vpop.eup %5436 }
 0x5ec   :  { %v2454_v10 = vsub.f32 %v6599_v0, %v2438_v46  ;;  %v2468_v39 = vrot.slane %v2452_v3, 7  ;;  %v6702_v35 = vadd.f32 %v5421_v6, %v2483_v47  ;;  %v2506_v13 = vrot.slane %v6694_v27, 2  ;;  %v5439_v19 = vpop.eup %5438 }
 0x5ed   :  { %v2469_v33 = vrot.slane %v2453_v1, 7  ;;  %v2505_v49 = vsel %vm761_vm2, %v2504_v44, %v2503_v26  ;;  %v2508_v38 = vrot.slane %v6697_v28, 1  ;;  %v7267_v1 = vld [vmem:[#allocation24_spill] sm:$0xff] }
 0x5ee   :  { %v2470_v51 = vrot.slane %v2454_v10, 7  ;;  %v2484_v31 = vmul.f32 %v5435_v56, %v2468_v39  ;;  %v2507_v36 = vsel %vm764_vm3, %v2506_v13, %v2505_v49  ;;  %v7268_v39 = vld [vmem:[#allocation33_spill] sm:$0xff] }
 0x5ef   :  { %v2485_v20 = vmul.f32 %v5437_v63, %v2469_v33  ;;  %v2509_v0 = vsel %vm767_vm4, %v2508_v38, %v2507_v36 }
 0x5f0   :  { %v2486_v17 = vmul.f32 %v5439_v19, %v2470_v51  ;;  %v6709_v6 = vadd.f32 %v5429_v43, %v2484_v31  ;;  %v2510_v60 = vsel %vm770_vm5, %v6702_v35, %v2509_v0 }
 0x5f1   :  { %v6711_v57 = vadd.f32 %v5431_v54, %v2485_v20  ;;  %v7265_v54 = vld [vmem:[#allocation23_spill] sm:$0xff]  ;;  %v7269_v20 = vld [vmem:[#allocation26_spill] sm:$0xff] }
 0x5f2   :  { %v6715_v11 = vadd.f32 %v5433_v18, %v2486_v17  ;;  %v2511_v45 = vrot.slane %v6709_v6, 7  ;;  %v7266_v18 = vld [vmem:[#allocation16_spill] sm:$0xff]  ;;  %v7270_v17 = vld [vmem:[#allocation27_spill] sm:$0xff] }
 0x5f3   :  { %v2513_v34 = vrot.slane %v6711_v57, 6 }
 0x5f4   :  { %v2512_v25 = vsel %vm773_vm6, %v2511_v45, %v2510_v60  ;;  %v2515_v24 = vrot.slane %v6715_v11, 5  ;;  %v7271_v45 = vld [vmem:[#allocation28_spill] sm:$0xff] }
 0x5f5   :  { %v2514_v46 = vsel %vm776_vm7, %v2513_v34, %v2512_v25  ;;  %v7272_v25 = vld [vmem:[#allocation29_spill] sm:$0xff] }
 0x5f6   :  { %v2516_v43 = vsel %vm779_vm8, %v2515_v24, %v2514_v46  ;;  %v7273_v46 = vld [vmem:[#allocation31_spill] sm:$0xff] }
 0x5f7   :  { %2583 = vmatmul.mubr.f32.vlgmr.msra.gmra.mrb[26].mxu0 %v2516_v43  ;;  %4441 = vmatmul.mubr.f32.vlgmr.msra.gmra.mrb[18].mxu1 %v2516_v43 }
 0x5f8   :  { %4895 = vmatpush1.bf16.msra.mxu0 %v5925_v15  ;;  %4926 = vmatpush3.bf16.msra.mxu1 %v5955_v48 }
 0x5f9   :  { %4897 = vmatprep.subr.bf16.mxu0 %v5928_v16  ;;  %4927 = vmatprep.subr.bf16.mxu1 %v7162_v12 }
 0x5fa   :  { %3002 = vmatprep.mubr.f32.mxu0 %v6611_v50  ;;  %4475 = vmatprep.mubr.msk.f32.mxu1 %vm5811_vm1, %v6611_v50  ;;  %v7264_v50 = vld [vmem:[#allocation20_spill] sm:$0xff] }
 0x5fc   :  { %4899 = vmatpush1.bf16.msra.mxu0 %v5933_v22  ;;  %4929 = vmatpush3.bf16.msra.mxu1 %v5967_v58 }
 0x5fd   :  { %4901 = vmatprep.subr.bf16.mxu0 %v5936_v23  ;;  %4930 = vmatprep.subr.bf16.mxu1 %v7162_v12 }
 0x600   :  { %4903 = vmatpush1.bf16.msra.mxu0 %v5941_v30  ;;  %4932 = vmatpush3.bf16.msra.mxu1 %v5981_v5 }
 0x601   :  { %4905 = vmatprep.subr.bf16.mxu0 %v5944_v32  ;;  %4933 = vmatprep.subr.bf16.mxu1 %v7162_v12 }
 0x604   :  { %4907 = vmatpush1.bf16.msra.mxu0 %v5949_v41  ;;  %4935 = vmatpush3.bf16.msra.mxu1 %v5995_v14 }
 0x605   :  { %4909 = vmatprep.subr.bf16.mxu0 %v5952_v42  ;;  %4936 = vmatprep.subr.bf16.mxu1 %v7162_v12 }
 0x608   :  { %4911 = vmatpush1.bf16.msra.mxu0 %v5960_v52  ;;  %4938 = vmatpush3.bf16.msra.mxu1 %v6007_v21 }
 0x609   :  { %4913 = vmatprep.subr.bf16.mxu0 %v5963_v53  ;;  %4939 = vmatprep.subr.bf16.mxu1 %v7162_v12 }
 0x60c   :  { %4915 = vmatpush1.bf16.msra.mxu0 %v5974_v62  ;;  %4941 = vmatpush3.bf16.msra.mxu1 %v7164_v4 }
 0x60d   :  { %4917 = vmatprep.subr.bf16.mxu0 %v7165_v29  ;;  %4942 = vmatprep.subr.bf16.mxu1 %v7162_v12 }
 0x610   :  { %4919 = vmatpush1.bf16.msra.mxu0 %v7166_v61  ;;  %4944 = vmatpush3.bf16.msra.mxu1 %v7167_v9 }
 0x611   :  { %4921 = vmatprep.subr.bf16.mxu0 %v7168_v2  ;;  %4945 = vmatprep.subr.bf16.mxu1 %v7162_v12 }
 0x614   :  { %4923 = vmatpush1.bf16.msra.mxu0 %v7264_v50  ;;  %4947 = vmatpush3.bf16.msra.mxu1 %v7265_v54 }
 0x615   :  { %4949 = vmatprep.subr.bf16.mxu0 %v7266_v18  ;;  %4980 = vmatprep.subr.bf16.mxu1 %v7162_v12  ;;  %v7274_v18 = vld [vmem:[#allocation32_spill] sm:$0xff] }
 0x6ca   :  { %v2584_v3 = vpop.f32.mrb[26].mxu0  ;;  %v6758_v47 = vpop.f32.mrb[18].mxu1 }
 0x6cb   :  { %v2585_v26 = vadd.f32 %v2584_v3, %v7267_v1  ;;  %v2586_v44 = vpop.f32.mrb[27].mxu0  ;;  %v4442_v10 = vpop.f32.mrb[19].mxu1 }
 0x6cc   :  { %v6762_v13 = vadd.f32 %v2586_v44, %v7268_v39 }
 0x6cd   :  { %v2660_v56 = vrot.slane %v2585_v26, 3  ;;  %v2661_v33 = vrot.slane %v2585_v26, 4  ;;  %v2662_v49 = vrot.slane %v2585_v26, 5  ;;  %v2663_v38 = vrot.slane %v2585_v26, 6 }
 0x6ce   :  { %v2664_v63 = vrot.slane %v2585_v26, 7  ;;  %v2665_v51 = vrot.slane %v2585_v26, 1  ;;  %v2666_v31 = vrot.slane %v2585_v26, 2  ;;  %v2680_v36 = vadd.f32 %v2585_v26, %v7246_v59 }
 0x6cf   :  { %v2675_v19 = vadd.f32 %v2660_v56, %v7242_v40  ;;  %v2676_v0 = vadd.f32 %v2661_v33, %v7269_v20  ;;  %v2677_v60 = vadd.f32 %v2662_v49, %v7270_v17  ;;  %v2678_v34 = vadd.f32 %v2663_v38, %v7271_v45 }
 0x6d0   :  { %v2679_v24 = vadd.f32 %v2664_v63, %v7272_v25  ;;  %v2681_v43 = vadd.f32 %v2665_v51, %v7273_v46  ;;  %v2682_v3 = vadd.f32 %v2666_v31, %v7274_v18  ;;  %v4010_v44 = vmul.f32 -1.442695, %v2680_v36  ;;  %v7275_v36 = vld [vmem:[#allocation34_spill] sm:$0xff] }
 0x6d1   :  { %v4005_v10 = vmul.f32 -1.442695, %v2675_v19  ;;  %v4006_v39 = vmul.f32 -1.442695, %v2676_v0  ;;  %v4007_v1 = vmul.f32 -1.442695, %v2677_v60 }
 0x6d2   :  { %v4008_v54 = vmul.f32 -1.442695, %v2678_v34  ;;  %5440 = vpow2.f32 %v4010_v44  ;;  %v4009_v26 = vmul.f32 -1.442695, %v2679_v24  ;;  %v4011_v56 = vmul.f32 -1.442695, %v2681_v43 }
 0x6d3   :  { %5442 = vpow2.f32 %v4005_v10  ;;  %v4012_v33 = vmul.f32 -1.442695, %v2682_v3  ;;  %v2732_v49 = vrot.slane %v6762_v13, 3  ;;  %v2733_v38 = vrot.slane %v6762_v13, 4  ;;  %v7276_v0 = vld [vmem:[#allocation35_spill] sm:$0xff]  ;;  %v7278_v24 = vld [vmem:[#allocation38_spill] sm:$0xff] }
 0x6d4   :  { %5444 = vpow2.f32 %v4006_v39  ;;  %v2734_v63 = vrot.slane %v6762_v13, 5  ;;  %v2735_v51 = vrot.slane %v6762_v13, 6  ;;  %v2736_v31 = vrot.slane %v6762_v13, 7  ;;  %v7277_v39 = vld [vmem:[#allocation37_spill] sm:$0xff]  ;;  %v7279_v3 = vld [vmem:[#allocation39_spill] sm:$0xff] }
 0x6d5   :  { %5446 = vpow2.f32 %v4007_v1  ;;  %v2747_v19 = vadd.f32 %v2732_v49, %v7275_v36  ;;  %v2748_v60 = vadd.f32 %v2733_v38, %v7276_v0 }
 0x6d6   :  { %5448 = vpow2.f32 %v4008_v54  ;;  %v2749_v34 = vadd.f32 %v2734_v63, %v7277_v39  ;;  %v2750_v43 = vadd.f32 %v2735_v51, %v7278_v24  ;;  %v2751_v44 = vadd.f32 %v2736_v31, %v7279_v3  ;;  %v7283_v24 = vld [vmem:[#allocation36_spill] sm:$0xff] }
 0x6d7   :  { %5450 = vpow2.f32 %v4009_v26  ;;  %v4013_v1 = vmul.f32 -1.442695, %v2747_v19  ;;  %v4014_v10 = vmul.f32 -1.442695, %v2748_v60  ;;  %v2737_v31 = vrot.slane %v6762_v13, 1 }
 0x6d8   :  { %5452 = vpow2.f32 %v4011_v56  ;;  %v4015_v18 = vmul.f32 -1.442695, %v2749_v34  ;;  %v4016_v59 = vmul.f32 -1.442695, %v2750_v43  ;;  %v4017_v54 = vmul.f32 -1.442695, %v2751_v44 }
 0x6d9   :  { %5454 = vpow2.f32 %v4012_v33  ;;  %v2738_v60 = vrot.slane %v6762_v13, 2 }
 0x6da   :  { %5456 = vpow2.f32 %v4013_v1 }
 0x6db   :  { %5458 = vpow2.f32 %v4014_v10 }
 0x6dc   :  { %v5441_v25 = vpop.eup %5440  ;;  %5460 = vpow2.f32 %v4015_v18 }
 0x6dd   :  { %v5443_v26 = vpop.eup %5442  ;;  %v2712_v49 = vadd.f32 1.0, %v5441_v25  ;;  %5462 = vpow2.f32 %v4016_v59  ;;  %v7280_v59 = vld [vmem:[#allocation40_spill] sm:$0xff] }
 0x6de   :  { %v5445_v38 = vpop.eup %5444  ;;  %v2707_v63 = vadd.f32 1.0, %v5443_v26  ;;  %5464 = vpow2.f32 %v4017_v54  ;;  %v2752_v25 = vadd.f32 %v6762_v13, %v7280_v59  ;;  %v7281_v54 = vld [vmem:[#allocation41_spill] sm:$0xff] }
 0x6df   :  { %v5447_v51 = vpop.eup %5446  ;;  %v2708_v56 = vadd.f32 1.0, %v5445_v38  ;;  %5466 = vrcp.f32 %v2712_v49  ;;  %v2753_v26 = vadd.f32 %v2737_v31, %v7281_v54 }
 0x6e0   :  { %v5449_v33 = vpop.eup %5448  ;;  %v2709_v19 = vadd.f32 1.0, %v5447_v51  ;;  %5468 = vrcp.f32 %v2707_v63  ;;  %v7282_v63 = vld [vmem:[#allocation42_spill] sm:$0xff] }
 0x6e1   :  { %v5451_v34 = vpop.eup %5450  ;;  %v2710_v43 = vadd.f32 1.0, %v5449_v33  ;;  %5470 = vrcp.f32 %v2708_v56  ;;  %v2754_v51 = vadd.f32 %v2738_v60, %v7282_v63  ;;  %v2656_v56 = vadd.f32 %v6758_v47, %v7283_v24  ;;  %v7284_v24 = vld [vmem:[#allocation44_spill] sm:$0xff] }
 0x6e2   :  { %v5453_v18 = vpop.eup %5452  ;;  %v2711_v1 = vadd.f32 1.0, %v5451_v34  ;;  %5472 = vrcp.f32 %v2709_v19  ;;  %v4018_v19 = vmul.f32 -1.442695, %v2752_v25  ;;  %v4019_v13 = vmul.f32 -1.442695, %v2753_v26 }
 0x6e3   :  { %v5455_v44 = vpop.eup %5454  ;;  %5474 = vrcp.f32 %v2710_v43  ;;  %v2713_v10 = vadd.f32 1.0, %v5453_v18  ;;  %v4020_v43 = vmul.f32 -1.442695, %v2754_v51  ;;  %v2804_v39 = vrot.slane %v2656_v56, 3 }
 0x6e4   :  { %v5457_v49 = vpop.eup %5456  ;;  %5476 = vrcp.f32 %v2711_v1  ;;  %v2714_v38 = vadd.f32 1.0, %v5455_v44  ;;  %v2805_v1 = vrot.slane %v2656_v56, 4  ;;  %v2806_v0 = vrot.slane %v2656_v56, 5 }
 0x6e5   :  { %v5459_v3 = vpop.eup %5458  ;;  %5478 = vrcp.f32 %v2713_v10  ;;  %v2779_v31 = vadd.f32 1.0, %v5457_v49  ;;  %v2807_v10 = vrot.slane %v2656_v56, 6  ;;  %v2808_v51 = vrot.slane %v2656_v56, 7 }
 0x6e6   :  { %v5461_v33 = vpop.eup %5460  ;;  %5480 = vrcp.f32 %v2714_v38  ;;  %v2780_v44 = vadd.f32 1.0, %v5459_v3  ;;  %v2809_v17 = vrot.slane %v2656_v56, 1  ;;  %v2810_v20 = vrot.slane %v2656_v56, 2 }
 0x6e7   :  { %v5463_v34 = vpop.eup %5462  ;;  %5482 = vpow2.f32 %v4018_v19 }
 0x6e8   :  { %v5465_v59 = vpop.eup %5464  ;;  %5484 = vpow2.f32 %v4019_v13  ;;  %v2781_v13 = vadd.f32 1.0, %v5461_v33 }
 0x6e9   :  { %v5467_v18 = vpop.eup %5466  ;;  %5486 = vpow2.f32 %v4020_v43 }
 0x6ea   :  { %v5469_v54 = vpop.eup %5468  ;;  %v2824_v60 = vmul.f32 %v5467_v18, %v2656_v56  ;;  %5488 = vrcp.f32 %v2779_v31 }
 0x6eb   :  { %v5471_v63 = vpop.eup %5470  ;;  %v2819_v36 = vmul.f32 %v5469_v54, %v2804_v39  ;;  %5490 = vrcp.f32 %v2780_v44 }
 0x6ec   :  { %v5473_v47 = vpop.eup %5472  ;;  %v2820_v38 = vmul.f32 %v5471_v63, %v2805_v1  ;;  %v2782_v1 = vadd.f32 1.0, %v5463_v34 }
 0x6ed   :  { %v5475_v25 = vpop.eup %5474  ;;  %v2821_v26 = vmul.f32 %v5473_v47, %v2806_v0  ;;  %v2827_v45 = vadd.f32 %v2819_v36, %v7284_v24  ;;  %v7285_v0 = vld [vmem:[#allocation45_spill] sm:$0xff]  ;;  %v7286_v47 = vld [vmem:[#allocation47_spill] sm:$0xff] }
 0x6ee   :  { %v5477_v49 = vpop.eup %5476  ;;  %v2822_v19 = vmul.f32 %v5475_v25, %v2807_v10  ;;  %v2828_v3 = vadd.f32 %v2820_v38, %v7207_v55  ;;  %v2783_v10 = vadd.f32 1.0, %v5465_v59  ;;  %v7287_v38 = vld [vmem:[#allocation48_spill] sm:$0xff] }
 0x6ef   :  { %v5479_v18 = vpop.eup %5478  ;;  %v2823_v39 = vmul.f32 %v5477_v49, %v2808_v51  ;;  %v2829_v54 = vadd.f32 %v2821_v26, %v7234_v37  ;;  %5492 = vtanh.f32 %v2827_v45  ;;  %v2832_v25 = vadd.f32 %v2824_v60, %v7287_v38  ;;  %v7288_v26 = vld [vmem:[#allocation49_spill] sm:$0xff] }
 0x6f0   :  { %v5481_v63 = vpop.eup %5480  ;;  %v2825_v43 = vmul.f32 %v5479_v18, %v2809_v17  ;;  %v2830_v31 = vadd.f32 %v2822_v19, %v7285_v0  ;;  %5494 = vtanh.f32 %v2828_v3  ;;  %v7289_v17 = vld [vmem:[#allocation50_spill] sm:$0xff] }
 0x6f1   :  { %v2826_v36 = vmul.f32 %v5481_v63, %v2810_v20  ;;  %v2831_v44 = vadd.f32 %v2823_v39, %v7286_v47  ;;  %5496 = vtanh.f32 %v2829_v54  ;;  %v5483_v56 = vpop.eup %5482 }
 0x6f2   :  { %5498 = vtanh.f32 %v2830_v31  ;;  %v2833_v45 = vadd.f32 %v2825_v43, %v7288_v26  ;;  %v5485_v51 = vpop.eup %5484  ;;  %v2784_v59 = vadd.f32 1.0, %v5483_v56 }
 0x6f3   :  { %5500 = vtanh.f32 %v2831_v44  ;;  %v2834_v33 = vadd.f32 %v2826_v36, %v7289_v17  ;;  %v5487_v49 = vpop.eup %5486  ;;  %v2785_v60 = vadd.f32 1.0, %v5485_v51 }
 0x6f4   :  { %5502 = vrcp.f32 %v2781_v13  ;;  %v5489_v34 = vpop.eup %5488  ;;  %v2786_v54 = vadd.f32 1.0, %v5487_v49 }
 0x6f5   :  { %5504 = vrcp.f32 %v2782_v1  ;;  %v5491_v20 = vpop.eup %5490 }
 0x6f6   :  { %5506 = vrcp.f32 %v2783_v10 }
 0x6f7   :  { %5508 = vtanh.f32 %v2832_v25 }
 0x6f8   :  { %5510 = vtanh.f32 %v2833_v45 }
 0x6f9   :  { %v5493_v19 = vpop.eup %5492  ;;  %5512 = vtanh.f32 %v2834_v33 }
 0x6fa   :  { %v5495_v3 = vpop.eup %5494  ;;  %v2851_v18 = vrot.slane %v5493_v19, 1  ;;  %5514 = vrcp.f32 %v2784_v59 }
 0x6fb   :  { %v5497_v39 = vpop.eup %5496  ;;  %v2852_v63 = vrot.slane %v5495_v3, 1  ;;  %5516 = vrcp.f32 %v2785_v60 }
 0x6fc   :  { %v5499_v13 = vpop.eup %5498  ;;  %v2853_v43 = vrot.slane %v5497_v39, 1  ;;  %v2867_v31 = vsub.f32 %v6689_v7, %v2851_v18  ;;  %5518 = vrcp.f32 %v2786_v54 }
 0x6fd   :  { %v5501_v1 = vpop.eup %5500  ;;  %v2854_v36 = vrot.slane %v5499_v13, 1  ;;  %v2868_v44 = vsub.f32 %v6691_v8, %v2852_v63 }
 0x6fe   :  { %v5503_v10 = vpop.eup %5502  ;;  %v2855_v25 = vrot.slane %v5501_v1, 1  ;;  %v2869_v56 = vsub.f32 %v6694_v27, %v2853_v43  ;;  %v2883_v45 = vrot.slane %v2867_v31, 7 }
 0x6ff   :  { %v5505_v51 = vpop.eup %5504  ;;  %v2870_v33 = vsub.f32 %v6697_v28, %v2854_v36  ;;  %v2884_v49 = vrot.slane %v2868_v44, 7 }
 0x700   :  { %v5507_v17 = vpop.eup %5506  ;;  %v2871_v26 = vsub.f32 %v6702_v35, %v2855_v25  ;;  %v2885_v7 = vrot.slane %v2869_v56, 7  ;;  %v2899_v18 = vmul.f32 %v5489_v34, %v2883_v45 }
 0x701   :  { %v5509_v59 = vpop.eup %5508  ;;  %v2886_v38 = vrot.slane %v2870_v33, 7  ;;  %v2900_v47 = vmul.f32 %v5491_v20, %v2884_v49 }
 0x702   :  { %v5511_v8 = vpop.eup %5510  ;;  %v2856_v63 = vrot.slane %v5509_v59, 1  ;;  %v2887_v60 = vrot.slane %v2871_v26, 7  ;;  %v2901_v0 = vmul.f32 %v5503_v10, %v2885_v7  ;;  %v6803_v37 = vadd.f32 %v5493_v19, %v2899_v18 }
 0x703   :  { %v5513_v27 = vpop.eup %5512  ;;  %v2857_v43 = vrot.slane %v5511_v8, 1  ;;  %v2902_v54 = vmul.f32 %v5505_v51, %v2886_v38  ;;  %v6805_v31 = vadd.f32 %v5495_v3, %v2900_v47 }
 0x704   :  { %v2858_v28 = vrot.slane %v5513_v27, 1  ;;  %v2872_v36 = vsub.f32 %v6709_v6, %v2856_v63  ;;  %v2903_v35 = vmul.f32 %v5507_v17, %v2887_v60  ;;  %v6808_v44 = vadd.f32 %v5497_v39, %v2901_v0  ;;  %v5515_v3 = vpop.eup %5514 }
 0x705   :  { %v2873_v34 = vsub.f32 %v6711_v57, %v2857_v43  ;;  %v6811_v20 = vadd.f32 %v5499_v13, %v2902_v54  ;;  %v2923_v26 = vrot.slane %v6803_v37, 5  ;;  %v2924_v19 = vrot.slane %v6805_v31, 4  ;;  %v5517_v57 = vpop.eup %5516 }
 0x706   :  { %v2874_v10 = vsub.f32 %v6715_v11, %v2858_v28  ;;  %v2888_v25 = vrot.slane %v2872_v36, 7  ;;  %v6816_v38 = vadd.f32 %v5501_v1, %v2903_v35  ;;  %v2926_v47 = vrot.slane %v6808_v44, 3  ;;  %v5519_v51 = vpop.eup %5518  ;;  %v7296_v35 = vld [vmem:[#allocation29_spill] sm:$0xff] }
 0x707   :  { %v2889_v6 = vrot.slane %v2873_v34, 7  ;;  %v2925_v0 = vsel %vm761_vm2, %v2924_v19, %v2923_v26  ;;  %v2928_v17 = vrot.slane %v6811_v20, 2  ;;  %v7297_v26 = vld [vmem:[#allocation30_spill] sm:$0xff] }
 0x708   :  { %v2890_v39 = vrot.slane %v2874_v10, 7  ;;  %v2904_v13 = vmul.f32 %v5515_v3, %v2888_v25  ;;  %v2927_v56 = vsel %vm764_vm3, %v2926_v47, %v2925_v0  ;;  %v2930_v45 = vrot.slane %v6816_v38, 1  ;;  %v7298_v10 = vld [vmem:[#allocation32_spill] sm:$0xff] }
 0x709   :  { %v2905_v11 = vmul.f32 %v5517_v57, %v2889_v6  ;;  %v2929_v1 = vsel %vm767_vm4, %v2928_v17, %v2927_v56 }
 0x70a   :  { %v2906_v33 = vmul.f32 %v5519_v51, %v2890_v39  ;;  %v6824_v49 = vadd.f32 %v5509_v59, %v2904_v13  ;;  %v2931_v7 = vsel %vm770_vm5, %v2930_v45, %v2929_v1  ;;  %v6841_v59 = vld [vmem:[#allocation2] sm:$0xff] }
 0x70b   :  { %v6827_v18 = vadd.f32 %v5511_v8, %v2905_v11  ;;  %v7295_v8 = vld [vmem:[#allocation28_spill] sm:$0xff] }
 0x70c   :  { %v6829_v63 = vadd.f32 %v5513_v27, %v2906_v33  ;;  %v2932_v60 = vsel %vm773_vm6, %v6824_v49, %v2931_v7  ;;  %v7299_v33 = vld [vmem:[#allocation34_spill] sm:$0xff] }
 0x70d   :  { %v2933_v43 = vrot.slane %v6827_v18, 7 }
 0x70e   :  { %v2935_v54 = vrot.slane %v6829_v63, 6 }
 0x70f   :  { %v2934_v28 = vsel %vm776_vm7, %v2933_v43, %v2932_v60  ;;  %v7300_v60 = vld [vmem:[#allocation35_spill] sm:$0xff] }
 0x710   :  { %v2936_v36 = vsel %vm779_vm8, %v2935_v54, %v2934_v28  ;;  %v7301_v54 = vld [vmem:[#allocation37_spill] sm:$0xff] }
 0x711   :  { %3003 = vmatmul.mubr.f32.vlgmr.msra.gmra.mrb[28].mxu0 %v2936_v36  ;;  %4476 = vmatmul.mubr.f32.vlgmr.msra.gmra.mrb[20].mxu1 %v2936_v36  ;;  %v7302_v36 = vld [vmem:[#allocation38_spill] sm:$0xff] }
 0x712   :  { %4951 = vmatpush1.bf16.msra.mxu0 %v5925_v15  ;;  %4982 = vmatpush3.bf16.msra.mxu1 %v5955_v48  ;;  %v7290_v15 = vld [vmem:[#allocation23_spill] sm:$0xff] }
 0x713   :  { %4953 = vmatprep.subr.bf16.mxu0 %v5928_v16  ;;  %4983 = vmatprep.subr.bf16.mxu1 %v7162_v12 }
 0x714   :  { %3422 = vmatprep.mubr.f32.mxu0 %v6841_v59  ;;  %4510 = vmatprep.mubr.msk.f32.mxu1 %vm5811_vm1, %v6841_v59 }
 0x716   :  { %4955 = vmatpush1.bf16.msra.mxu0 %v5933_v22  ;;  %4985 = vmatpush3.bf16.msra.mxu1 %v5967_v58 }
 0x717   :  { %4957 = vmatprep.subr.bf16.mxu0 %v5936_v23  ;;  %4986 = vmatprep.subr.bf16.mxu1 %v7162_v12  ;;  %v7291_v23 = vld [vmem:[#allocation24_spill] sm:$0xff] }
 0x71a   :  { %4959 = vmatpush1.bf16.msra.mxu0 %v5941_v30  ;;  %4988 = vmatpush3.bf16.msra.mxu1 %v5981_v5 }
 0x71b   :  { %4961 = vmatprep.subr.bf16.mxu0 %v5944_v32  ;;  %4989 = vmatprep.subr.bf16.mxu1 %v7162_v12 }
 0x71e   :  { %4963 = vmatpush1.bf16.msra.mxu0 %v5949_v41  ;;  %4991 = vmatpush3.bf16.msra.mxu1 %v5995_v14 }
 0x71f   :  { %4965 = vmatprep.subr.bf16.mxu0 %v5952_v42  ;;  %4992 = vmatprep.subr.bf16.mxu1 %v7162_v12  ;;  %v7292_v42 = vld [vmem:[#allocation33_spill] sm:$0xff] }
 0x722   :  { %4967 = vmatpush1.bf16.msra.mxu0 %v5960_v52  ;;  %4994 = vmatpush3.bf16.msra.mxu1 %v6007_v21 }
 0x723   :  { %4969 = vmatprep.subr.bf16.mxu0 %v5963_v53  ;;  %4995 = vmatprep.subr.bf16.mxu1 %v7162_v12 }
 0x726   :  { %4971 = vmatpush1.bf16.msra.mxu0 %v5974_v62  ;;  %4997 = vmatpush3.bf16.msra.mxu1 %v7164_v4 }
 0x727   :  { %4973 = vmatprep.subr.bf16.mxu0 %v7165_v29  ;;  %4998 = vmatprep.subr.bf16.mxu1 %v7162_v12 }
 0x72a   :  { %4975 = vmatpush1.bf16.msra.mxu0 %v7166_v61  ;;  %5000 = vmatpush3.bf16.msra.mxu1 %v7167_v9  ;;  %v7293_v61 = vld [vmem:[#allocation26_spill] sm:$0xff] }
 0x72b   :  { %4977 = vmatprep.subr.bf16.mxu0 %v7168_v2  ;;  %5001 = vmatprep.subr.bf16.mxu1 %v7162_v12  ;;  %v7294_v2 = vld [vmem:[#allocation27_spill] sm:$0xff] }
 0x72e   :  { %4979 = vmatpush1.bf16.msra.mxu0 %v7264_v50  ;;  %5003 = vmatpush3.bf16.msra.mxu1 %v7290_v15 }
 0x72f   :  { %5004 = vmatprep.subr.bf16.mxu0 %v7162_v12 }
 0x7e4   :  { %v3004_v16 = vpop.f32.mrb[28].mxu0  ;;  %v6873_v22 = vpop.f32.mrb[20].mxu1 }
 0x7e5   :  { %v3005_v30 = vadd.f32 %v3004_v16, %v7291_v23  ;;  %v3006_v32 = vpop.f32.mrb[29].mxu0  ;;  %v4477_v41 = vpop.f32.mrb[21].mxu1 }
 0x7e6   :  { %v6877_v48 = vadd.f32 %v3006_v32, %v7292_v42 }
 0x7e7   :  { %v3080_v52 = vrot.slane %v3005_v30, 2  ;;  %v3081_v53 = vrot.slane %v3005_v30, 3  ;;  %v3082_v58 = vrot.slane %v3005_v30, 4  ;;  %v3083_v62 = vrot.slane %v3005_v30, 5 }
 0x7e8   :  { %v3084_v5 = vrot.slane %v3005_v30, 6  ;;  %v3085_v14 = vrot.slane %v3005_v30, 7  ;;  %v3086_v21 = vrot.slane %v3005_v30, 1  ;;  %v3101_v4 = vadd.f32 %v3005_v30, %v7273_v46  ;;  %v7303_v30 = vld [vmem:[#allocation39_spill] sm:$0xff] }
 0x7e9   :  { %v3095_v29 = vadd.f32 %v3080_v52, %v7242_v40  ;;  %v3096_v9 = vadd.f32 %v3081_v53, %v7293_v61  ;;  %v3097_v50 = vadd.f32 %v3082_v58, %v7294_v2  ;;  %v3098_v27 = vadd.f32 %v3083_v62, %v7295_v8 }
 0x7ea   :  { %v3099_v34 = vadd.f32 %v3084_v5, %v7296_v35  ;;  %v3100_v19 = vadd.f32 %v3085_v14, %v7297_v26  ;;  %v3102_v25 = vadd.f32 %v3086_v21, %v7298_v10  ;;  %v4027_v47 = vmul.f32 -1.442695, %v3101_v4 }
 0x7eb   :  { %v4021_v3 = vmul.f32 -1.442695, %v3095_v29  ;;  %v4022_v6 = vmul.f32 -1.442695, %v3096_v9  ;;  %v4023_v0 = vmul.f32 -1.442695, %v3097_v50 }
 0x7ec   :  { %v4024_v17 = vmul.f32 -1.442695, %v3098_v27  ;;  %5520 = vpow2.f32 %v4027_v47  ;;  %v4025_v57 = vmul.f32 -1.442695, %v3099_v34  ;;  %v4026_v39 = vmul.f32 -1.442695, %v3100_v19 }
 0x7ed   :  { %5522 = vpow2.f32 %v4021_v3  ;;  %v4028_v13 = vmul.f32 -1.442695, %v3102_v25  ;;  %v3152_v56 = vrot.slane %v6877_v48, 2  ;;  %v3153_v45 = vrot.slane %v6877_v48, 3 }
 0x7ee   :  { %5524 = vpow2.f32 %v4022_v6  ;;  %v3154_v51 = vrot.slane %v6877_v48, 4  ;;  %v3155_v11 = vrot.slane %v6877_v48, 5  ;;  %v3156_v1 = vrot.slane %v6877_v48, 6 }
 0x7ef   :  { %5526 = vpow2.f32 %v4023_v0  ;;  %v3167_v7 = vadd.f32 %v3152_v56, %v7299_v33  ;;  %v3168_v43 = vadd.f32 %v3153_v45, %v7300_v60  ;;  %v3157_v29 = vrot.slane %v6877_v48, 7  ;;  %v7304_v0 = vld [vmem:[#allocation40_spill] sm:$0xff] }
 0x7f0   :  { %5528 = vpow2.f32 %v4024_v17  ;;  %v3169_v28 = vadd.f32 %v3154_v51, %v7301_v54  ;;  %v3170_v15 = vadd.f32 %v3155_v11, %v7302_v36  ;;  %v3171_v32 = vadd.f32 %v3156_v1, %v7303_v30  ;;  %v7306_v11 = vld [vmem:[#allocation42_spill] sm:$0xff] }
 0x7f1   :  { %5530 = vpow2.f32 %v4025_v57  ;;  %v4029_v16 = vmul.f32 -1.442695, %v3167_v7  ;;  %v4030_v41 = vmul.f32 -1.442695, %v3168_v43  ;;  %v3158_v19 = vrot.slane %v6877_v48, 1  ;;  %v7307_v43 = vld [vmem:[#allocation36_spill] sm:$0xff] }
 0x7f2   :  { %5532 = vpow2.f32 %v4026_v39  ;;  %v4031_v52 = vmul.f32 -1.442695, %v3169_v28  ;;  %v4032_v53 = vmul.f32 -1.442695, %v3170_v15  ;;  %v4033_v58 = vmul.f32 -1.442695, %v3171_v32 }
 0x7f3   :  { %5534 = vpow2.f32 %v4028_v13  ;;  %v3172_v17 = vadd.f32 %v3157_v29, %v7304_v0  ;;  %v7305_v13 = vld [vmem:[#allocation41_spill] sm:$0xff]  ;;  %v3174_v1 = vadd.f32 %v3158_v19, %v7306_v11  ;;  %v3076_v28 = vadd.f32 %v6873_v22, %v7307_v43 }
 0x7f4   :  { %5536 = vpow2.f32 %v4029_v16  ;;  %v3173_v56 = vadd.f32 %v6877_v48, %v7305_v13 }
 0x7f5   :  { %5538 = vpow2.f32 %v4030_v41  ;;  %v4034_v16 = vmul.f32 -1.442695, %v3172_v17  ;;  %v3229_v17 = vrot.slane %v3076_v28, 7 }
 0x7f6   :  { %v5521_v62 = vpop.eup %5520  ;;  %5540 = vpow2.f32 %v4031_v52  ;;  %v4035_v41 = vmul.f32 -1.442695, %v3173_v56 }
 0x7f7   :  { %v5523_v5 = vpop.eup %5522  ;;  %v3133_v14 = vadd.f32 1.0, %v5521_v62  ;;  %5542 = vpow2.f32 %v4032_v53  ;;  %v4036_v53 = vmul.f32 -1.442695, %v3174_v1  ;;  %v3224_v62 = vrot.slane %v3076_v28, 2  ;;  %v7308_v1 = vld [vmem:[#allocation46_spill] sm:$0xff] }
 0x7f8   :  { %v5525_v21 = vpop.eup %5524  ;;  %v3127_v4 = vadd.f32 1.0, %v5523_v5  ;;  %5544 = vpow2.f32 %v4033_v58 }
 0x7f9   :  { %v5527_v9 = vpop.eup %5526  ;;  %v3128_v50 = vadd.f32 1.0, %v5525_v21  ;;  %5546 = vrcp.f32 %v3133_v14  ;;  %v3225_v14 = vrot.slane %v3076_v28, 3 }
 0x7fa   :  { %v5529_v27 = vpop.eup %5528  ;;  %v3129_v34 = vadd.f32 1.0, %v5527_v9  ;;  %5548 = vrcp.f32 %v3127_v4  ;;  %v3226_v9 = vrot.slane %v3076_v28, 4 }
 0x7fb   :  { %v5531_v25 = vpop.eup %5530  ;;  %v3130_v47 = vadd.f32 1.0, %v5529_v27  ;;  %5550 = vrcp.f32 %v3128_v50  ;;  %v3227_v27 = vrot.slane %v3076_v28, 5 }
 0x7fc   :  { %v5533_v3 = vpop.eup %5532  ;;  %v3131_v6 = vadd.f32 1.0, %v5531_v25  ;;  %5552 = vrcp.f32 %v3129_v34 }
 0x7fd   :  { %v5535_v57 = vpop.eup %5534  ;;  %v3132_v39 = vadd.f32 1.0, %v5533_v3  ;;  %5554 = vrcp.f32 %v3130_v47  ;;  %v3228_v47 = vrot.slane %v3076_v28, 6 }
 0x7fe   :  { %v5537_v45 = vpop.eup %5536  ;;  %5556 = vrcp.f32 %v3131_v6  ;;  %v3134_v51 = vadd.f32 1.0, %v5535_v57 }
 0x7ff   :  { %v5539_v7 = vpop.eup %5538  ;;  %5558 = vrcp.f32 %v3132_v39  ;;  %v3199_v48 = vadd.f32 1.0, %v5537_v45  ;;  %v3230_v45 = vrot.slane %v3076_v28, 1 }
 0x800   :  { %v5541_v15 = vpop.eup %5540  ;;  %5560 = vrcp.f32 %v3134_v51  ;;  %v3200_v21 = vadd.f32 1.0, %v5539_v7 }
 0x801   :  { %v5543_v32 = vpop.eup %5542  ;;  %5562 = vpow2.f32 %v4034_v16 }
 0x802   :  { %v5545_v52 = vpop.eup %5544  ;;  %5564 = vpow2.f32 %v4035_v41  ;;  %v3201_v41 = vadd.f32 1.0, %v5541_v15  ;;  %v7313_v15 = vld [vmem:[#allocation50_spill] sm:$0xff] }
 0x803   :  { %v5547_v58 = vpop.eup %5546  ;;  %5566 = vpow2.f32 %v4036_v53 }
 0x804   :  { %v5549_v5 = vpop.eup %5548  ;;  %v3245_v4 = vmul.f32 %v5547_v58, %v3076_v28  ;;  %5568 = vrcp.f32 %v3199_v48  ;;  %v7309_v58 = vld [vmem:[#allocation45_spill] sm:$0xff]  ;;  %v3202_v48 = vadd.f32 1.0, %v5543_v32 }
 0x805   :  { %v5551_v29 = vpop.eup %5550  ;;  %v3239_v50 = vmul.f32 %v5549_v5, %v3224_v62  ;;  %5570 = vrcp.f32 %v3200_v21 }
 0x806   :  { %v5553_v22 = vpop.eup %5552  ;;  %v3240_v34 = vmul.f32 %v5551_v29, %v3225_v14  ;;  %v7310_v14 = vld [vmem:[#allocation47_spill] sm:$0xff]  ;;  %v3203_v29 = vadd.f32 1.0, %v5545_v52 }
 0x807   :  { %v5555_v19 = vpop.eup %5554  ;;  %v3241_v25 = vmul.f32 %v5553_v22, %v3226_v9  ;;  %v3247_v3 = vadd.f32 %v3239_v50, %v7284_v24  ;;  %v7311_v9 = vld [vmem:[#allocation48_spill] sm:$0xff]  ;;  %v7312_v22 = vld [vmem:[#allocation49_spill] sm:$0xff] }
 0x808   :  { %v5557_v6 = vpop.eup %5556  ;;  %v3242_v57 = vmul.f32 %v5555_v19, %v3227_v27  ;;  %v3248_v39 = vadd.f32 %v3240_v34, %v7207_v55  ;;  %v3253_v27 = vadd.f32 %v3245_v4, %v7312_v22 }
 0x809   :  { %v5559_v56 = vpop.eup %5558  ;;  %v3243_v51 = vmul.f32 %v5557_v6, %v3228_v47  ;;  %v3249_v7 = vadd.f32 %v3241_v25, %v7308_v1  ;;  %5572 = vtanh.f32 %v3247_v3 }
 0x80a   :  { %v5561_v16 = vpop.eup %5560  ;;  %v3244_v53 = vmul.f32 %v5559_v56, %v3229_v17  ;;  %v3250_v62 = vadd.f32 %v3242_v57, %v7309_v58  ;;  %5574 = vtanh.f32 %v3248_v39 }
 0x80b   :  { %v3246_v5 = vmul.f32 %v5561_v16, %v3230_v45  ;;  %v3251_v21 = vadd.f32 %v3243_v51, %v7310_v14  ;;  %5576 = vtanh.f32 %v3249_v7  ;;  %v5563_v28 = vpop.eup %5562 }
 0x80c   :  { %5578 = vtanh.f32 %v3250_v62  ;;  %v3252_v50 = vadd.f32 %v3244_v53, %v7311_v9  ;;  %v5565_v34 = vpop.eup %5564  ;;  %v3204_v52 = vadd.f32 1.0, %v5563_v28 }
 0x80d   :  { %5580 = vtanh.f32 %v3251_v21  ;;  %v3254_v19 = vadd.f32 %v3246_v5, %v7313_v15  ;;  %v5567_v25 = vpop.eup %5566  ;;  %v3205_v17 = vadd.f32 1.0, %v5565_v34 }
 0x80e   :  { %5582 = vrcp.f32 %v3201_v41  ;;  %v5569_v32 = vpop.eup %5568  ;;  %v3206_v56 = vadd.f32 1.0, %v5567_v25 }
 0x80f   :  { %5584 = vrcp.f32 %v3202_v48  ;;  %v5571_v47 = vpop.eup %5570 }
 0x810   :  { %5586 = vrcp.f32 %v3203_v29 }
 0x811   :  { %5588 = vtanh.f32 %v3252_v50 }
 0x812   :  { %5590 = vtanh.f32 %v3253_v27 }
 0x813   :  { %v5573_v3 = vpop.eup %5572  ;;  %5592 = vtanh.f32 %v3254_v19 }
 0x814   :  { %v5575_v6 = vpop.eup %5574  ;;  %v3271_v57 = vrot.slane %v5573_v3, 1  ;;  %5594 = vrcp.f32 %v3204_v52 }
 0x815   :  { %v5577_v39 = vpop.eup %5576  ;;  %v3272_v45 = vrot.slane %v5575_v6, 1  ;;  %5596 = vrcp.f32 %v3205_v17 }
 0x816   :  { %v5579_v4 = vpop.eup %5578  ;;  %v3273_v51 = vrot.slane %v5577_v39, 1  ;;  %v3287_v7 = vsub.f32 %v6803_v37, %v3271_v57  ;;  %5598 = vrcp.f32 %v3206_v56 }
 0x817   :  { %v5581_v16 = vpop.eup %5580  ;;  %v3274_v41 = vrot.slane %v5579_v4, 1  ;;  %v3288_v53 = vsub.f32 %v6805_v31, %v3272_v45 }
 0x818   :  { %v5583_v62 = vpop.eup %5582  ;;  %v3275_v48 = vrot.slane %v5581_v16, 1  ;;  %v3289_v5 = vsub.f32 %v6808_v44, %v3273_v51  ;;  %v3303_v21 = vrot.slane %v3287_v7, 7 }
 0x819   :  { %v5585_v29 = vpop.eup %5584  ;;  %v3290_v50 = vsub.f32 %v6811_v20, %v3274_v41  ;;  %v3304_v28 = vrot.slane %v3288_v53, 7 }
 0x81a   :  { %v5587_v27 = vpop.eup %5586  ;;  %v3291_v34 = vsub.f32 %v6816_v38, %v3275_v48  ;;  %v3305_v37 = vrot.slane %v3289_v5, 7  ;;  %v3319_v19 = vmul.f32 %v5569_v32, %v3303_v21 }
 0x81b   :  { %v5589_v25 = vpop.eup %5588  ;;  %v3306_v52 = vrot.slane %v3290_v50, 7  ;;  %v3320_v57 = vmul.f32 %v5571_v47, %v3304_v28 }
 0x81c   :  { %v5591_v31 = vpop.eup %5590  ;;  %v3276_v45 = vrot.slane %v5589_v25, 1  ;;  %v3307_v17 = vrot.slane %v3291_v34, 7  ;;  %v3321_v15 = vmul.f32 %v5583_v62, %v3305_v37  ;;  %v6918_v22 = vadd.f32 %v5573_v3, %v3319_v19 }
 0x81d   :  { %v5593_v44 = vpop.eup %5592  ;;  %v3277_v51 = vrot.slane %v5591_v31, 1  ;;  %v3322_v56 = vmul.f32 %v5585_v29, %v3306_v52  ;;  %v6920_v7 = vadd.f32 %v5575_v6, %v3320_v57 }
 0x81e   :  { %v3278_v20 = vrot.slane %v5593_v44, 1  ;;  %v3292_v41 = vsub.f32 %v6824_v49, %v3276_v45  ;;  %v3323_v38 = vmul.f32 %v5587_v27, %v3307_v17  ;;  %v6923_v53 = vadd.f32 %v5577_v39, %v3321_v15  ;;  %v5595_v29 = vpop.eup %5594 }
 0x81f   :  { %v3293_v32 = vsub.f32 %v6827_v18, %v3277_v51  ;;  %v6926_v47 = vadd.f32 %v5579_v4, %v3322_v56  ;;  %v3343_v48 = vrot.slane %v6918_v22, 6  ;;  %v3344_v3 = vrot.slane %v6920_v7, 5  ;;  %v5597_v18 = vpop.eup %5596 }
 0x820   :  { %v3294_v62 = vsub.f32 %v6829_v63, %v3278_v20  ;;  %v3308_v5 = vrot.slane %v3292_v41, 7  ;;  %v6931_v21 = vadd.f32 %v5581_v16, %v3323_v38  ;;  %v3346_v6 = vrot.slane %v6923_v53, 4  ;;  %v5599_v27 = vpop.eup %5598 }
 0x821   :  { %v3309_v49 = vrot.slane %v3293_v32, 7  ;;  %v3345_v15 = vsel %vm761_vm2, %v3344_v3, %v3343_v48  ;;  %v3348_v39 = vrot.slane %v6926_v47, 3  ;;  %v3786_v32 = vld [vmem:[#allocation9 + $0x18] sm:$0xff]  ;;  %v3787_v3 = vld [vmem:[#allocation9 + $0x20] sm:$0xff] }
 0x822   :  { %v3310_v4 = vrot.slane %v3294_v62, 7  ;;  %v3324_v50 = vmul.f32 %v5595_v29, %v3308_v5  ;;  %v3347_v28 = vsel %vm764_vm3, %v3346_v6, %v3345_v15  ;;  %v3350_v16 = vrot.slane %v6931_v21, 2  ;;  %v3788_v62 = vld [vmem:[#allocation9 + $0x28] sm:$0xff]  ;;  %v3789_v6 = vld [vmem:[#allocation9 + $0x30] sm:$0xff]  ;;  %v3790_v29 = vld [vmem:[#allocation9 + $0x38] sm:$0xff] }
 0x823   :  { %v3325_v34 = vmul.f32 %v5597_v18, %v3309_v49  ;;  %v3349_v63 = vsel %vm767_vm4, %v3348_v39, %v3347_v28  ;;  %v5011_v5 = vpack.c.bf16 %v3788_v62, %v3787_v3  ;;  %v5014_v49 = vpack.c.bf16 %v3790_v29, %v3789_v6  ;;  %v3792_v15 = vld [vmem:[#allocation9 + $0x48] sm:$0xff]  ;;  %v3793_v18 = vld [vmem:[#allocation9 + $0x50] sm:$0xff]  ;;  %v3795_v28 = vld [vmem:[#allocation9 + $0x60] sm:$0xff] }
 0x824   :  { %v3326_v37 = vmul.f32 %v5599_v27, %v3310_v4  ;;  %v6939_v19 = vadd.f32 %v5589_v25, %v3324_v50  ;;  %v3351_v57 = vsel %vm770_vm5, %v3350_v16, %v3349_v63  ;;  %v3783_v25 = vld [vmem:[#allocation9] sm:$0xff]  ;;  %v3794_v4 = vld [vmem:[#allocation9 + $0x58] sm:$0xff]  ;;  %v3796_v27 = vld [vmem:[#allocation9 + $0x68] sm:$0xff] }
 0x825   :  { %v6941_v52 = vadd.f32 %v5591_v31, %v3325_v34  ;;  %v3784_v31 = vld [vmem:[#allocation9 + $0x8] sm:$0xff]  ;;  %v5020_v50 = vpack.c.bf16 %v3794_v4, %v3793_v18  ;;  %v5023_v34 = vpack.c.bf16 %v3796_v27, %v3795_v28  ;;  %v3797_v63 = vld [vmem:[#allocation9 + $0x70] sm:$0xff]  ;;  %v3798_v16 = vld [vmem:[#allocation9 + $0x78] sm:$0xff] }
 0x826   :  { %v6944_v45 = vadd.f32 %v5593_v44, %v3326_v37  ;;  %v3352_v17 = vrot.slane %v6939_v19, 1  ;;  %v3785_v44 = vld [vmem:[#allocation9 + $0x10] sm:$0xff]  ;;  %v5005_v38 = vpack.c.bf16 %v3784_v31, %v3783_v25  ;;  %v5026_v37 = vpack.c.bf16 %v3798_v16, %v3797_v63 }
 0x827   :  { %v5008_v48 = vpack.c.bf16 %v3786_v32, %v3785_v44 }
 0x828   :  { %v3353_v51 = vsel %vm773_vm6, %v3352_v17, %v3351_v57  ;;  %v3355_v56 = vrot.slane %v6944_v45, 7 }
 0x829   :  { %v3354_v20 = vsel %vm776_vm7, %v6941_v52, %v3353_v51 }
 0x82a   :  { %v3356_v41 = vsel %vm779_vm8, %v3355_v56, %v3354_v20 }
 0x82b   :  { %3423 = vmatmul.mubr.f32.vlgmr.msra.gmra.mrb[30].mxu0 %v3356_v41  ;;  %4511 = vmatmul.mubr.f32.vlgmr.msra.gmra.mrb[22].mxu1 %v3356_v41 }
 0x82c   :  { %4545 = vmatprep.mubr.msk.f32.mxu0 %vm5811_vm1, %v6841_v59  ;;  %5006 = vmatpush3.bf16.msra.mxu0 %v5005_v38  ;;  %v3791_v59 = vld [vmem:[#allocation9 + $0x40] sm:$0xff] }
 0x82d   :  { %5007 = vmatprep.subr.bf16.mxu0 %v7162_v12  ;;  %v5017_v39 = vpack.c.bf16 %v3792_v15, %v3791_v59 }
 0x830   :  { %5009 = vmatpush3.bf16.msra.mxu0 %v5008_v48 }
 0x831   :  { %5010 = vmatprep.subr.bf16.mxu0 %v7162_v12 }
 0x834   :  { %5012 = vmatpush3.bf16.msra.mxu0 %v5011_v5 }
 0x835   :  { %5013 = vmatprep.subr.bf16.mxu0 %v7162_v12 }
 0x838   :  { %5015 = vmatpush3.bf16.msra.mxu0 %v5014_v49 }
 0x839   :  { %5016 = vmatprep.subr.bf16.mxu0 %v7162_v12 }
 0x83c   :  { %5018 = vmatpush3.bf16.msra.mxu0 %v5017_v39 }
 0x83d   :  { %5019 = vmatprep.subr.bf16.mxu0 %v7162_v12 }
 0x840   :  { %5021 = vmatpush3.bf16.msra.mxu0 %v5020_v50 }
 0x841   :  { %5022 = vmatprep.subr.bf16.mxu0 %v7162_v12 }
 0x844   :  { %5024 = vmatpush3.bf16.msra.mxu0 %v5023_v34 }
 0x845   :  { %5025 = vmatprep.subr.bf16.mxu0 %v7162_v12 }
 0x848   :  { %5027 = vmatpush3.bf16.msra.mxu0 %v5026_v37 }
 0x8fe   :  { %v3424_v57 = vpop.f32.mrb[30].mxu0  ;;  %v6961_v17 = vpop.f32.mrb[22].mxu1 }
 0x8ff   :  { %v3425_v51 = vadd.f32 %v3424_v57, %v7291_v23  ;;  %v3426_v56 = vpop.f32.mrb[31].mxu0  ;;  %v4512_v20 = vpop.f32.mrb[23].mxu1 }
 0x900   :  { %v6965_v41 = vadd.f32 %v3426_v56, %v7292_v42 }
 0x901   :  { %v3500_v25 = vrot.slane %v3425_v51, 1  ;;  %v3501_v31 = vrot.slane %v3425_v51, 2  ;;  %v3502_v44 = vrot.slane %v3425_v51, 3  ;;  %v3503_v38 = vrot.slane %v3425_v51, 4 }
 0x902   :  { %v3504_v32 = vrot.slane %v3425_v51, 5  ;;  %v3505_v48 = vrot.slane %v3425_v51, 6  ;;  %v3506_v3 = vrot.slane %v3425_v51, 7  ;;  %v3522_v12 = vadd.f32 %v3425_v51, %v7298_v10 }
 0x903   :  { %v3515_v62 = vadd.f32 %v3500_v25, %v7242_v40  ;;  %v3516_v5 = vadd.f32 %v3501_v31, %v7293_v61  ;;  %v3517_v23 = vadd.f32 %v3502_v44, %v7294_v2  ;;  %v3518_v6 = vadd.f32 %v3503_v38, %v7295_v8 }
 0x904   :  { %v3519_v42 = vadd.f32 %v3504_v32, %v7296_v35  ;;  %v3520_v29 = vadd.f32 %v3505_v48, %v7297_v26  ;;  %v3521_v49 = vadd.f32 %v3506_v3, %v7273_v46  ;;  %v4044_v59 = vmul.f32 -1.442695, %v3522_v12 }
 0x905   :  { %v4037_v15 = vmul.f32 -1.442695, %v3515_v62  ;;  %v4038_v39 = vmul.f32 -1.442695, %v3516_v5  ;;  %v4039_v18 = vmul.f32 -1.442695, %v3517_v23 }
 0x906   :  { %v4040_v4 = vmul.f32 -1.442695, %v3518_v6  ;;  %5600 = vpow2.f32 %v4044_v59  ;;  %v4041_v40 = vmul.f32 -1.442695, %v3519_v42  ;;  %v4042_v61 = vmul.f32 -1.442695, %v3520_v29 }
 0x907   :  { %5602 = vpow2.f32 %v4037_v15  ;;  %v4043_v10 = vmul.f32 -1.442695, %v3521_v49  ;;  %v3572_v2 = vrot.slane %v6965_v41, 1  ;;  %v3573_v8 = vrot.slane %v6965_v41, 2 }
 0x908   :  { %5604 = vpow2.f32 %v4038_v39  ;;  %v3574_v35 = vrot.slane %v6965_v41, 3  ;;  %v3575_v46 = vrot.slane %v6965_v41, 4  ;;  %v3576_v26 = vrot.slane %v6965_v41, 5 }
 0x909   :  { %5606 = vpow2.f32 %v4039_v18  ;;  %v3587_v50 = vadd.f32 %v3572_v2, %v7299_v33  ;;  %v3588_v28 = vadd.f32 %v3573_v8, %v7300_v60  ;;  %v3594_v59 = vadd.f32 %v6965_v41, %v7306_v11 }
 0x90a   :  { %5608 = vpow2.f32 %v4040_v4  ;;  %v3589_v27 = vadd.f32 %v3574_v35, %v7301_v54  ;;  %v3590_v34 = vadd.f32 %v3575_v46, %v7302_v36  ;;  %v3591_v16 = vadd.f32 %v3576_v26, %v7303_v30 }
 0x90b   :  { %5610 = vpow2.f32 %v4041_v40  ;;  %v4045_v63 = vmul.f32 -1.442695, %v3587_v50  ;;  %v4046_v37 = vmul.f32 -1.442695, %v3588_v28  ;;  %v3577_v36 = vrot.slane %v6965_v41, 6 }
 0x90c   :  { %5612 = vpow2.f32 %v4042_v61  ;;  %v4047_v57 = vmul.f32 -1.442695, %v3589_v27  ;;  %v4048_v51 = vmul.f32 -1.442695, %v3590_v34  ;;  %v4049_v56 = vmul.f32 -1.442695, %v3591_v16 }
 0x90d   :  { %5614 = vpow2.f32 %v4043_v10  ;;  %v3578_v30 = vrot.slane %v6965_v41, 7  ;;  %v3592_v5 = vadd.f32 %v3577_v36, %v7304_v0  ;;  %v3496_v39 = vadd.f32 %v6961_v17, %v7307_v43 }
 0x90e   :  { %5616 = vpow2.f32 %v4045_v63  ;;  %v4052_v10 = vmul.f32 -1.442695, %v3594_v59 }
 0x90f   :  { %5618 = vpow2.f32 %v4046_v37  ;;  %v3593_v42 = vadd.f32 %v3578_v30, %v7305_v13  ;;  %v4050_v4 = vmul.f32 -1.442695, %v3592_v5  ;;  %v3644_v13 = vrot.slane %v3496_v39, 1  ;;  %v7315_v5 = vld [vmem:[#allocation50_spill] sm:$0xff] }
 0x910   :  { %v5601_v20 = vpop.eup %5600  ;;  %5620 = vpow2.f32 %v4047_v57  ;;  %v3645_v46 = vrot.slane %v3496_v39, 2  ;;  %v3646_v50 = vrot.slane %v3496_v39, 3  ;;  %v3647_v17 = vrot.slane %v3496_v39, 4 }
 0x911   :  { %v5603_v33 = vpop.eup %5602  ;;  %v3554_v25 = vadd.f32 1.0, %v5601_v20  ;;  %5622 = vpow2.f32 %v4048_v51  ;;  %v4051_v40 = vmul.f32 -1.442695, %v3593_v42  ;;  %v3648_v16 = vrot.slane %v3496_v39, 5 }
 0x912   :  { %v5605_v60 = vpop.eup %5604  ;;  %v3547_v54 = vadd.f32 1.0, %v5603_v33  ;;  %5624 = vpow2.f32 %v4049_v56  ;;  %v3649_v51 = vrot.slane %v3496_v39, 6 }
 0x913   :  { %v5607_v31 = vpop.eup %5606  ;;  %v3548_v44 = vadd.f32 1.0, %v5605_v60  ;;  %5626 = vrcp.f32 %v3554_v25  ;;  %v3650_v25 = vrot.slane %v3496_v39, 7 }
 0x914   :  { %v5609_v38 = vpop.eup %5608  ;;  %v3549_v32 = vadd.f32 1.0, %v5607_v31  ;;  %5628 = vrcp.f32 %v3547_v54 }
 0x915   :  { %v5611_v48 = vpop.eup %5610  ;;  %v3550_v3 = vadd.f32 1.0, %v5609_v38  ;;  %5630 = vrcp.f32 %v3548_v44 }
 0x916   :  { %v5613_v12 = vpop.eup %5612  ;;  %v3551_v62 = vadd.f32 1.0, %v5611_v48  ;;  %5632 = vrcp.f32 %v3549_v32 }
 0x917   :  { %v5615_v23 = vpop.eup %5614  ;;  %v3552_v6 = vadd.f32 1.0, %v5613_v12  ;;  %5634 = vrcp.f32 %v3550_v3 }
 0x918   :  { %v5617_v29 = vpop.eup %5616  ;;  %5636 = vrcp.f32 %v3551_v62  ;;  %v3553_v49 = vadd.f32 1.0, %v5615_v23 }
 0x919   :  { %v5619_v15 = vpop.eup %5618  ;;  %5638 = vrcp.f32 %v3552_v6  ;;  %v3619_v8 = vadd.f32 1.0, %v5617_v29 }
 0x91a   :  { %v5621_v18 = vpop.eup %5620  ;;  %5640 = vrcp.f32 %v3553_v49  ;;  %v3620_v26 = vadd.f32 1.0, %v5619_v15 }
 0x91b   :  { %v5623_v0 = vpop.eup %5622  ;;  %5642 = vpow2.f32 %v4050_v4  ;;  %v3621_v31 = vadd.f32 1.0, %v5621_v18 }
 0x91c   :  { %v5625_v61 = vpop.eup %5624  ;;  %5644 = vpow2.f32 %v4051_v40  ;;  %v3622_v38 = vadd.f32 1.0, %v5623_v0 }
 0x91d   :  { %v5627_v2 = vpop.eup %5626  ;;  %5646 = vpow2.f32 %v4052_v10  ;;  %v3623_v48 = vadd.f32 1.0, %v5625_v61 }
 0x91e   :  { %v5629_v35 = vpop.eup %5628  ;;  %v3666_v11 = vmul.f32 %v5627_v2, %v3496_v39  ;;  %5648 = vrcp.f32 %v3619_v8 }
 0x91f   :  { %v5631_v41 = vpop.eup %5630  ;;  %v3659_v28 = vmul.f32 %v5629_v35, %v3644_v13  ;;  %5650 = vrcp.f32 %v3620_v26 }
 0x920   :  { %v5633_v43 = vpop.eup %5632  ;;  %v3660_v27 = vmul.f32 %v5631_v41, %v3645_v46  ;;  %v3674_v23 = vadd.f32 %v3666_v11, %v7315_v5 }
 0x921   :  { %v5635_v34 = vpop.eup %5634  ;;  %v3661_v63 = vmul.f32 %v5633_v43, %v3646_v50  ;;  %v3667_v37 = vadd.f32 %v3659_v28, %v7284_v24 }
 0x922   :  { %v5637_v57 = vpop.eup %5636  ;;  %v3662_v56 = vmul.f32 %v5635_v34, %v3647_v17  ;;  %v3668_v20 = vadd.f32 %v3660_v27, %v7207_v55 }
 0x923   :  { %v5639_v33 = vpop.eup %5638  ;;  %v3663_v60 = vmul.f32 %v5637_v57, %v3648_v16  ;;  %v3669_v54 = vadd.f32 %v3661_v63, %v7308_v1  ;;  %5652 = vtanh.f32 %v3667_v37  ;;  %v7314_v1 = vld [vmem:[#allocation49_spill] sm:$0xff] }
 0x924   :  { %v5641_v36 = vpop.eup %5640  ;;  %v3664_v44 = vmul.f32 %v5639_v33, %v3649_v51  ;;  %v3670_v30 = vadd.f32 %v3662_v56, %v7309_v58  ;;  %5654 = vtanh.f32 %v3668_v20 }
 0x925   :  { %v3665_v24 = vmul.f32 %v5641_v36, %v3650_v25  ;;  %v3671_v32 = vadd.f32 %v3663_v60, %v7310_v14  ;;  %5656 = vtanh.f32 %v3669_v54  ;;  %v5643_v3 = vpop.eup %5642 }
 0x926   :  { %5658 = vtanh.f32 %v3670_v30  ;;  %v3672_v55 = vadd.f32 %v3664_v44, %v7311_v9  ;;  %v5645_v62 = vpop.eup %5644  ;;  %v3624_v29 = vadd.f32 1.0, %v5643_v3 }
 0x927   :  { %5660 = vtanh.f32 %v3671_v32  ;;  %v3673_v12 = vadd.f32 %v3665_v24, %v7314_v1  ;;  %v5647_v58 = vpop.eup %5646  ;;  %v3625_v9 = vadd.f32 1.0, %v5645_v62 }
 0x928   :  { %5662 = vrcp.f32 %v3621_v31  ;;  %v5649_v6 = vpop.eup %5648  ;;  %v3626_v39 = vadd.f32 1.0, %v5647_v58 }
 0x929   :  { %5664 = vrcp.f32 %v3622_v38  ;;  %v5651_v42 = vpop.eup %5650 }
 0x92a   :  { %5666 = vrcp.f32 %v3623_v48 }
 0x92b   :  { %5668 = vtanh.f32 %v3672_v55 }
 0x92c   :  { %5670 = vtanh.f32 %v3673_v12 }
 0x92d   :  { %v5653_v14 = vpop.eup %5652  ;;  %5672 = vtanh.f32 %v3674_v23 }
 0x92e   :  { %v5655_v49 = vpop.eup %5654  ;;  %v3691_v59 = vrot.slane %v5653_v14, 1  ;;  %5674 = vrcp.f32 %v3624_v29 }
 0x92f   :  { %v5657_v15 = vpop.eup %5656  ;;  %v3692_v18 = vrot.slane %v5655_v49, 1  ;;  %5676 = vrcp.f32 %v3625_v9 }
 0x930   :  { %v5659_v4 = vpop.eup %5658  ;;  %v3693_v0 = vrot.slane %v5657_v15, 1  ;;  %v3707_v40 = vsub.f32 %v6918_v22, %v3691_v59  ;;  %5678 = vrcp.f32 %v3626_v39 }
 0x931   :  { %v5661_v61 = vpop.eup %5660  ;;  %v3694_v10 = vrot.slane %v5659_v4, 1  ;;  %v3708_v2 = vsub.f32 %v6920_v7, %v3692_v18 }
 0x932   :  { %v5663_v13 = vpop.eup %5662  ;;  %v3695_v8 = vrot.slane %v5661_v61, 1  ;;  %v3709_v35 = vsub.f32 %v6923_v53, %v3693_v0  ;;  %v3723_v46 = vrot.slane %v3707_v40, 7 }
 0x933   :  { %v5665_v26 = vpop.eup %5664  ;;  %v3710_v11 = vsub.f32 %v6926_v47, %v3694_v10  ;;  %v3724_v41 = vrot.slane %v3708_v2, 7 }
 0x934   :  { %v5667_v50 = vpop.eup %5666  ;;  %v3711_v28 = vsub.f32 %v6931_v21, %v3695_v8  ;;  %v3725_v22 = vrot.slane %v3709_v35, 7  ;;  %v3739_v43 = vmul.f32 %v5649_v6, %v3723_v46 }
 0x935   :  { %v5669_v17 = vpop.eup %5668  ;;  %v3726_v27 = vrot.slane %v3710_v11, 7  ;;  %v3740_v34 = vmul.f32 %v5651_v42, %v3724_v41  ;;  %v4053_v41 = vld [vmem:[%s7043_s6] ss:$0 sm:$0xff] }
 0x936   :  { %v5671_v7 = vpop.eup %5670  ;;  %v3696_v63 = vrot.slane %v5669_v17, 1  ;;  %v3727_v16 = vrot.slane %v3711_v28, 7  ;;  %v3741_v37 = vmul.f32 %v5663_v13, %v3725_v22  ;;  %v3747_v57 = vadd.f32 %v5653_v14, %v3739_v43 }
 0x937   :  { %v5673_v53 = vpop.eup %5672  ;;  %v3697_v51 = vrot.slane %v5671_v7, 1  ;;  %v3742_v56 = vmul.f32 %v5665_v26, %v3726_v27  ;;  %v3748_v20 = vadd.f32 %v5655_v49, %v3740_v34 }
 0x938   :  { %v3698_v33 = vrot.slane %v5673_v53, 1  ;;  %v3712_v47 = vsub.f32 %v6939_v19, %v3696_v63  ;;  %v3743_v25 = vmul.f32 %v5667_v50, %v3727_v16  ;;  %v3749_v60 = vadd.f32 %v5657_v15, %v3741_v37  ;;  %3778 = vst [vmem:[#allocation2 - $0x7] sm:$0x80] %v3747_v57  ;;  %v5675_v32 = vpop.eup %5674 }
 0x939   :  { %v3713_v21 = vsub.f32 %v6941_v52, %v3697_v51  ;;  %v3750_v54 = vadd.f32 %v5659_v4, %v3742_v56  ;;  %v3763_v36 = vrot.slane %v3748_v20, 7  ;;  %v3806_v31 = vrot.slane %v3747_v57, 7  ;;  %v5677_v12 = vpop.eup %5676 }
 0x93a   :  { %v3714_v44 = vsub.f32 %v6944_v45, %v3698_v33  ;;  %v3728_v30 = vrot.slane %v3712_v47, 7  ;;  %v3751_v38 = vadd.f32 %v5661_v61, %v3743_v25  ;;  %v3764_v24 = vrot.slane %v3749_v60, 6  ;;  %v5679_v52 = vpop.eup %5678 }
 0x93b   :  { %v3729_v48 = vrot.slane %v3713_v21, 7  ;;  %v3766_v55 = vrot.slane %v3750_v54, 5  ;;  %v3807_v3 = vrot.slane %v3748_v20, 6  ;;  %v3809_v1 = vrot.slane %v3749_v60, 5 }
 0x93c   :  { %v3730_v19 = vrot.slane %v3714_v44, 7  ;;  %v3744_v62 = vmul.f32 %v5675_v32, %v3728_v30  ;;  %v3765_v5 = vsel %vm761_vm2, %v3764_v24, %v3763_v36  ;;  %v3768_v23 = vrot.slane %v3751_v38, 4 }
 0x93d   :  { %v3745_v58 = vmul.f32 %v5677_v12, %v3729_v48  ;;  %v3767_v6 = vsel %vm764_vm3, %v3766_v55, %v3765_v5  ;;  %v3808_v45 = vsel %vm761_vm2, %v3807_v3, %v3806_v31  ;;  %v3811_v42 = vrot.slane %v3750_v54, 4 }
 0x93e   :  { %v3746_v14 = vmul.f32 %v5679_v52, %v3730_v19  ;;  %v3752_v29 = vadd.f32 %v5669_v17, %v3744_v62  ;;  %v3769_v49 = vsel %vm767_vm4, %v3768_v23, %v3767_v6  ;;  %v3810_v9 = vsel %vm764_vm3, %v3809_v1, %v3808_v45 }
 0x93f   :  { %v3753_v59 = vadd.f32 %v5671_v7, %v3745_v58  ;;  %v3812_v15 = vsel %vm767_vm4, %v3811_v42, %v3810_v9  ;;  %v3813_v39 = vrot.slane %v3751_v38, 3 }
 0x940   :  { %v3754_v18 = vadd.f32 %v5673_v53, %v3746_v14  ;;  %v3770_v4 = vrot.slane %v3752_v29, 3  ;;  %v3815_v0 = vrot.slane %v3752_v29, 2 }
 0x941   :  { %v3772_v40 = vrot.slane %v3753_v59, 2  ;;  %v3814_v61 = vsel %vm770_vm5, %v3813_v39, %v3812_v15  ;;  %v3817_v10 = vrot.slane %v3753_v59, 1 }
 0x942   :  { %v3771_v2 = vsel %vm770_vm5, %v3770_v4, %v3769_v49  ;;  %v3774_v13 = vrot.slane %v3754_v18, 1  ;;  %v3816_v8 = vsel %vm773_vm6, %v3815_v0, %v3814_v61 }
 0x943   :  { %v3773_v35 = vsel %vm773_vm6, %v3772_v40, %v3771_v2  ;;  %v3818_v46 = vsel %vm776_vm7, %v3817_v10, %v3816_v8 }
 0x944   :  { %v3775_v26 = vsel %vm776_vm7, %v3774_v13, %v3773_v35  ;;  %v3819_v11 = vsel %vm779_vm8, %v3754_v18, %v3818_v46 }
 0x945   :  { %3779 = vst [vmem:[#allocation2 + $0x1] sm:$0x7f] %v3775_v26  ;;  %4546 = vmatmul.mubr.f32.vlgmr.msra.gmra.mrb[32].mxu0 %v3819_v11 }
 0xa18   :  { %v3887_v50 = vpop.f32.mrb[32].mxu0 }
 0xa19   :  { %v3888_v28 = vadd.f32 %v4053_v41, %v3887_v50  ;;  %v4547_v22 = vpop.f32.mrb[33].mxu0 }
 0xa1b   :  { %3891 = vst [vmem:[#allocation11] sm:$0xff] %v3888_v28 }
 0xa1c   :  { %5782 = shalt.err (!%p5779_p8)
}
 0xa1d   :  { %s5783_s13 = scalar_lea.hbm %s7044_s7, 128 }
 0xa1e   :  { %p5784_p9 = scmp.ne.s32.totalorder %s7044_s7, %s5783_s13  ;;  %p5787_p10 = scmp.lt.u32.totalorder %s5783_s13, %s7044_s7 }
 0xa20   :  { %p5789_p11 = pnand %p5787_p10, %p5784_p9 }
 0xa22   :  { %5792 = shalt.err (!%p5789_p11)
}
 0xa23   :  { %3901 = dma.vmem_to_hbm [thread:$0]  %s3899_s30, 128, %s7044_s7, [#allocation5]  }
 0xa24   :  { %5799 = dma.done.wait [#allocation5], 128  }
 0xa25   :  { %5800 = vsyncadd [#allocation5], 4294967168 }
 0xa26   :  { %3905 = vsyncpa [#allocation4], 1 }
 0xa27   :  { %3906 = vsyncpa [#allocation7], 1 }
 0xa28   :  { %3907 = vsyncpa [#allocation10], 1 }
 0xa29   :  { %3908 = vsyncpa [#allocation5], 1 }

</bundles_post_ra>
